<compile_context>
chip_gen: v6e
topology: v6e:2x2x1
jax: 0.10.0
libtpu: 0.0.40
codegen_flags: <defaults>
</compile_context>

<pallas_src>
import functools

import jax
import jax.numpy as jnp
from jax.experimental import pallas as pl
from jax.experimental.pallas import tpu as pltpu


# --------------------------------------------------------------------------- #
# In-kernel helpers (operate on values, not Refs)
# --------------------------------------------------------------------------- #
def _pad_hw(a, p, value):
    """Pad a (H, W, C) value by `p` on each side of H and W with `value`."""
    if p == 0:
        return a
    H, W, C = a.shape
    cols = jnp.full((H, p, C), value, a.dtype)
    a = jnp.concatenate([cols, a, cols], axis=1)              # (H, W+2p, C)
    rows = jnp.full((p, W + 2 * p, C), value, a.dtype)
    return jnp.concatenate([rows, a, rows], axis=0)           # (H+2p, W+2p, C)


def _conv_kxk(r_bf16, k, w_ref, b_ref, H, W):
    """kxk 'same' conv via per-kh-row accumulation.

    r_bf16: (H, W, C) bf16 input (already ReLU'd reduce output).
    w_ref : (k, k*C, Co) bf16 weight slabs, tap order (kw, c) within a slab.
    b_ref : (1, Co) f32 bias.
    Returns (H*W, Co) f32, ReLU applied.
    """
    p = (k - 1) // 2
    rp = _pad_hw(r_bf16, p, 0.0)                              # (H+2p, W+2p, C) bf16
    acc = None
    for kh in range(k):
        taps = [rp[kh:kh + H, kw:kw + W, :] for kw in range(k)]
        patch = jnp.concatenate(taps, axis=-1).reshape(H * W, -1)   # (rows, k*C) bf16
        part = jnp.dot(patch, w_ref[kh], preferred_element_type=jnp.float32)
        acc = part if acc is None else acc + part
    return jnp.maximum(acc + b_ref[...], 0.0)


def _maxpool3(x_b, H, W):
    """Separable 3x3 stride-1 pad-1 maxpool on (H, W, C) bf16 values."""
    C = x_b.shape[-1]
    neg = jnp.finfo(x_b.dtype).min       # every window has >=1 real element
    cols = jnp.full((H, 1, C), neg, x_b.dtype)
    xw = jnp.concatenate([cols, x_b, cols], axis=1)           # (H, W+2, C)
    mw = jnp.maximum(jnp.maximum(xw[:, 0:W, :], xw[:, 1:W + 1, :]),
                     xw[:, 2:W + 2, :])                       # row max, (H, W, C)
    rows = jnp.full((1, W, C), neg, x_b.dtype)
    mh = jnp.concatenate([rows, mw, rows], axis=0)            # (H+2, W, C)
    return jnp.maximum(jnp.maximum(mh[0:H], mh[1:H + 1]), mh[2:H + 2])


# --------------------------------------------------------------------------- #
# Pallas kernel
# --------------------------------------------------------------------------- #
def inception_kernel(x_ref, wf_ref, bf_ref, w2_ref, b2_ref, w3_ref, b3_ref,
                     w4_ref, b4_ref, o_ref, *,
                     ch1x1, ch3x3red, ch3x3, ch5x5red, ch5x5, pool_proj):
    x = x_ref[0]                                              # (H, W, Cin) bf16
    H, W, Cin = x.shape
    rows = H * W
    x2d = x.reshape(rows, Cin)

    # ---- fused 1x1 stage: branch-1 conv + branch-2/3 reduces, one MXU pass ----
    y = jnp.dot(x2d, wf_ref[...], preferred_element_type=jnp.float32)
    y = jnp.maximum(y + bf_ref[...], 0.0)                     # (rows, cf) f32

    off_r2 = ch1x1
    off_r3 = ch1x1 + ch3x3red
    br1 = y[:, 0:ch1x1]
    r2 = y[:, off_r2:off_r2 + ch3x3red].astype(jnp.bfloat16).reshape(H, W, ch3x3red)
    r3 = y[:, off_r3:off_r3 + ch5x5red].astype(jnp.bfloat16).reshape(H, W, ch5x5red)

    # ---- branch 1: 1x1 conv + ReLU (already computed) ----
    o_ref[0, :, :, 0:ch1x1] = br1.reshape(H, W, ch1x1)

    # ---- branch 2: 3x3 conv (pad=1) + ReLU, per-kh accumulation ----
    br2 = _conv_kxk(r2, 3, w2_ref, b2_ref, H, W)
    c2 = ch1x1
    o_ref[0, :, :, c2:c2 + ch3x3] = br2.reshape(H, W, ch3x3)

    # ---- branch 3: 5x5 conv (pad=2) + ReLU, per-kh accumulation ----
    br3 = _conv_kxk(r3, 5, w3_ref, b3_ref, H, W)
    c3 = ch1x1 + ch3x3
    o_ref[0, :, :, c3:c3 + ch5x5] = br3.reshape(H, W, ch5x5)

    # ---- branch 4: 3x3 maxpool (stride 1, pad 1) then 1x1 conv + ReLU ----
    mp = _maxpool3(x, H, W)
    br4 = jnp.dot(mp.reshape(rows, Cin), w4_ref[...],
                  preferred_element_type=jnp.float32)
    br4 = jnp.maximum(br4 + b4_ref[...], 0.0)
    c4 = ch1x1 + ch3x3 + ch5x5
    o_ref[0, :, :, c4:c4 + pool_proj] = br4.reshape(H, W, pool_proj)


def _resident(shape):
    """Whole-array block, constant index map (weights stay VMEM-resident)."""
    zeros = (0,) * len(shape)
    return pl.BlockSpec(shape, lambda n: zeros)


# --------------------------------------------------------------------------- #
# Wrapper
# --------------------------------------------------------------------------- #
@jax.jit
def inception_forward(x_nchw, params):
    (w1, b1, w2r, b2r, w2, b2, w3r, b3r, w3, b3, w4, b4) = params
    N, Cin, H, W = x_nchw.shape
    x = jnp.transpose(x_nchw, (0, 2, 3, 1)).astype(jnp.bfloat16)   # NHWC bf16

    ch1x1 = w1.shape[1]
    ch3x3red, ch3x3 = w2r.shape[1], w2.shape[-1]
    ch5x5red, ch5x5 = w3r.shape[1], w3.shape[-1]
    pool_proj = w4.shape[1]
    cout = ch1x1 + ch3x3 + ch5x5 + pool_proj

    # Fused 1x1 weights/biases (branch1 | branch2-reduce | branch3-reduce).
    wf = jnp.concatenate([w1, w2r, w3r], axis=1).astype(jnp.bfloat16)
    bf = jnp.concatenate([b1, b2r, b3r], axis=1).astype(jnp.float32)

    # Per-kh slabs for the kxk convs: (k, k, Ci, Co) -> (k, k*Ci, Co), bf16.
    w2k = w2.reshape(3, 3 * ch3x3red, ch3x3).astype(jnp.bfloat16)
    w3k = w3.reshape(5, 5 * ch5x5red, ch5x5).astype(jnp.bfloat16)
    w4b = w4.astype(jnp.bfloat16)
    b2f, b3f, b4f = (b.astype(jnp.float32) for b in (b2, b3, b4))

    flops = 2 * N * H * W * (Cin * (ch1x1 + ch3x3red + ch5x5red)
                             + 9 * ch3x3red * ch3x3
                             + 25 * ch5x5red * ch5x5
                             + Cin * pool_proj)
    bytes_accessed = (2 * (x.size + wf.size + w2k.size + w3k.size + w4b.size)
                      + 4 * (bf.size + b2f.size + b3f.size + b4f.size
                             + N * H * W * cout))

    kernel = functools.partial(
        inception_kernel,
        ch1x1=ch1x1, ch3x3red=ch3x3red, ch3x3=ch3x3,
        ch5x5red=ch5x5red, ch5x5=ch5x5, pool_proj=pool_proj)

    grid_spec = pltpu.PrefetchScalarGridSpec(
        num_scalar_prefetch=0,
        grid=(N,),
        in_specs=[pl.BlockSpec((1, H, W, Cin), lambda n: (n, 0, 0, 0)),
                  _resident(wf.shape), _resident(bf.shape),
                  _resident(w2k.shape), _resident(b2f.shape),
                  _resident(w3k.shape), _resident(b3f.shape),
                  _resident(w4b.shape), _resident(b4f.shape)],
        out_specs=pl.BlockSpec((1, H, W, cout), lambda n: (n, 0, 0, 0)),
    )

    out_nhwc = pl.pallas_call(
        kernel,
        out_shape=jax.ShapeDtypeStruct((N, H, W, cout), jnp.float32),
        grid_spec=grid_spec,
        compiler_params=pltpu.CompilerParams(
            dimension_semantics=("parallel",),
            vmem_limit_bytes=32 * 1024 * 1024),
        cost_estimate=pl.CostEstimate(flops=flops, transcendentals=0,
                                      bytes_accessed=bytes_accessed),
    )(x, wf, bf, w2k, b2f, w3k, b3f, w4b, b4f)

    # Single dense NHWC output from the kernel; only a layout change remains.
    return jnp.transpose(out_nhwc, (0, 3, 1, 2))              # NCHW == torch.cat(dim=1)


# --------------------------------------------------------------------------- #
# Parameters + pure-JAX reference
# --------------------------------------------------------------------------- #
def make_params(key, in_channels, ch1x1, ch3x3red, ch3x3, ch5x5red, ch5x5, pool_proj):
    """Deterministic synthetic weights in kernel-friendly layouts.

    1x1 conv weights: (Cin, Cout); kxk conv weights: (k, k, Cin, Cout) [HWIO];
    biases: (1, Cout). Equivalent to PyTorch (Cout, Cin, k, k) transposed."""
    ks = jax.random.split(key, 12)

    def w2d(k, ci, co):
        return jax.random.normal(k, (ci, co), jnp.float32) * 0.1

    def wkk(k, kk, ci, co):
        return jax.random.normal(k, (kk, kk, ci, co), jnp.float32) * 0.1

    def bias(k, co):
        return jax.random.normal(k, (1, co), jnp.float32) * 0.05

    return (
        w2d(ks[0], in_channels, ch1x1), bias(ks[1], ch1x1),
        w2d(ks[2], in_channels, ch3x3red), bias(ks[3], ch3x3red),
        wkk(ks[4], 3, ch3x3red, ch3x3), bias(ks[5], ch3x3),
        w2d(ks[6], in_channels, ch5x5red), bias(ks[7], ch5x5red),
        wkk(ks[8], 5, ch5x5red, ch5x5), bias(ks[9], ch5x5),
        w2d(ks[10], in_channels, pool_proj), bias(ks[11], pool_proj),
    )


def inception_reference(x_nchw, params):
    """Pure-JAX (XLA, f32) reference mirroring the PyTorch forward."""
    (w1, b1, w2r, b2r, w2, b2, w3r, b3r, w3, b3, w4, b4) = params
    x = jnp.transpose(x_nchw, (0, 2, 3, 1)).astype(jnp.float32)

    def conv(v, w, b, pad):
        if w.ndim == 2:
            w = w[None, None]
        y = jax.lax.conv_general_dilated(
            v, w, window_strides=(1, 1), padding=[(pad, pad), (pad, pad)],
            dimension_numbers=("NHWC", "HWIO", "NHWC"))
        return y + b.reshape(1, 1, 1, -1)

    relu = lambda v: jnp.maximum(v, 0.0)
    br1 = relu(conv(x, w1, b1, 0))
    br2 = relu(conv(relu(conv(x, w2r, b2r, 0)), w2, b2, 1))
    br3 = relu(conv(relu(conv(x, w3r, b3r, 0)), w3, b3, 2))
    mp = jax.lax.reduce_window(
        x, -jnp.inf, jax.lax.max, window_dimensions=(1, 3, 3, 1),
        window_strides=(1, 1, 1, 1), padding=((0, 0), (1, 1), (1, 1), (0, 0)))
    br4 = relu(conv(mp, w4, b4, 0))
    out = jnp.concatenate([br1, br2, br3, br4], axis=-1)
    return jnp.transpose(out, (0, 3, 1, 2))


if __name__ == "__main__":
    # Small config consistent with the module:
    # Inception(in_channels=4, ch1x1=8, ch3x3red=4, ch3x3=8, ch5x5red=2, ch5x5=4, pool_proj=4)
    N, Cin, H, W = 2, 4, 16, 16
    key = jax.random.PRNGKey(0)
    kx, kp = jax.random.split(key)
    x = jax.random.normal(kx, (N, Cin, H, W), jnp.float32)
    params = make_params(kp, Cin, 8, 4, 8, 2, 4, 4)

    out = jax.block_until_ready(inception_forward(x, params))
    ref = jax.block_until_ready(inception_reference(x, params))

    assert out.shape == (N, 8 + 8 + 4 + 4, H, W), out.shape
    # bf16 MXU operands vs. f32 reference -> loosened tolerance.
    err = float(jnp.max(jnp.abs(out - ref)))
    assert jnp.allclose(out, ref, atol=5e-2, rtol=5e-2), err

    print("KERNEL_OK")
</pallas_src>

<mosaic_0001>
module attributes {stable_mosaic.version = 11 : i64} {
  func.func @inception_kernel(%arg0: i32, %arg1: memref<1x16x16x4xbf16, #tpu.memory_space<vmem>>, %arg2: memref<4x14xbf16, #tpu.memory_space<vmem>>, %arg3: memref<1x14xf32, #tpu.memory_space<vmem>>, %arg4: memref<3x12x8xbf16, #tpu.memory_space<vmem>>, %arg5: memref<1x8xf32, #tpu.memory_space<vmem>>, %arg6: memref<5x10x4xbf16, #tpu.memory_space<vmem>>, %arg7: memref<1x4xf32, #tpu.memory_space<vmem>>, %arg8: memref<4x4xbf16, #tpu.memory_space<vmem>>, %arg9: memref<1x4xf32, #tpu.memory_space<vmem>>, %arg10: memref<1x16x16x24xf32, #tpu.memory_space<vmem>>) attributes {dimension_semantics = [#tpu.dimension_semantics<parallel>], iteration_bounds = array<i64: 2>, scalar_prefetch = 0 : i64, scratch_operands = 0 : i64, tpu.core_type = #tpu.core_type<tc>, window_params = [{transform_indices = @transform_0, window_bounds = array<i64: 1, 16, 16, 4>}, {pipeline_mode = #tpu.pipeline_mode<synchronous>, transform_indices = @transform_1, window_bounds = array<i64: 4, 14>}, {pipeline_mode = #tpu.pipeline_mode<synchronous>, transform_indices = @transform_2, window_bounds = array<i64: 1, 14>}, {pipeline_mode = #tpu.pipeline_mode<synchronous>, transform_indices = @transform_3, window_bounds = array<i64: 3, 12, 8>}, {pipeline_mode = #tpu.pipeline_mode<synchronous>, transform_indices = @transform_4, window_bounds = array<i64: 1, 8>}, {pipeline_mode = #tpu.pipeline_mode<synchronous>, transform_indices = @transform_5, window_bounds = array<i64: 5, 10, 4>}, {pipeline_mode = #tpu.pipeline_mode<synchronous>, transform_indices = @transform_6, window_bounds = array<i64: 1, 4>}, {pipeline_mode = #tpu.pipeline_mode<synchronous>, transform_indices = @transform_7, window_bounds = array<i64: 4, 4>}, {pipeline_mode = #tpu.pipeline_mode<synchronous>, transform_indices = @transform_8, window_bounds = array<i64: 1, 4>}, {transform_indices = @transform_9, window_bounds = array<i64: 1, 16, 16, 24>}]} {
    %c0 = arith.constant 0 : index
    %c0_0 = arith.constant 0 : index
    %c0_1 = arith.constant 0 : index
    %c0_2 = arith.constant 0 : index
    %0 = vector.load %arg1[%c0, %c0_0, %c0_1, %c0_2] : memref<1x16x16x4xbf16, #tpu.memory_space<vmem>>, vector<1x16x16x4xbf16>
    %1 = vector.shape_cast %0 : vector<1x16x16x4xbf16> to vector<16x16x4xbf16>
    %2 = vector.shape_cast %1 : vector<16x16x4xbf16> to vector<256x4xbf16>
    %c0_3 = arith.constant 0 : index
    %c0_4 = arith.constant 0 : index
    %3 = vector.load %arg2[%c0_3, %c0_4] : memref<4x14xbf16, #tpu.memory_space<vmem>>, vector<4x14xbf16>
    %cst = arith.constant dense<0.000000e+00> : vector<256x14xf32>
    %4 = tpu.matmul %2, %3, %cst {dimension_numbers = #tpu.dot_dimension_numbers<[1], [0], [0], [1], [0, 0, 1, 1], [], []>} : vector<256x4xbf16>, vector<4x14xbf16>, vector<256x14xf32> -> vector<256x14xf32>
    %c0_5 = arith.constant 0 : index
    %c0_6 = arith.constant 0 : index
    %5 = vector.load %arg3[%c0_5, %c0_6] : memref<1x14xf32, #tpu.memory_space<vmem>>, vector<1x14xf32>
    %6 = vector.broadcast %5 : vector<1x14xf32> to vector<256x14xf32>
    %7 = arith.addf %4, %6 : vector<256x14xf32>
    %cst_7 = arith.constant 0.000000e+00 : f32
    %8 = vector.broadcast %cst_7 : f32 to vector<256x14xf32>
    %9 = arith.maximumf %7, %8 : vector<256x14xf32>
    %10 = vector.extract_strided_slice %9 {offsets = [0, 0], sizes = [256, 8], strides = [1, 1]} : vector<256x14xf32> to vector<256x8xf32>
    %11 = vector.extract_strided_slice %9 {offsets = [0, 8], sizes = [256, 4], strides = [1, 1]} : vector<256x14xf32> to vector<256x4xf32>
    %12 = arith.truncf %11 : vector<256x4xf32> to vector<256x4xbf16>
    %13 = vector.shape_cast %12 : vector<256x4xbf16> to vector<16x16x4xbf16>
    %14 = vector.extract_strided_slice %9 {offsets = [0, 12], sizes = [256, 2], strides = [1, 1]} : vector<256x14xf32> to vector<256x2xf32>
    %15 = arith.truncf %14 : vector<256x2xf32> to vector<256x2xbf16>
    %16 = vector.shape_cast %15 : vector<256x2xbf16> to vector<16x16x2xbf16>
    %17 = vector.shape_cast %10 : vector<256x8xf32> to vector<16x16x8xf32>
    %c0_8 = arith.constant 0 : index
    %c0_9 = arith.constant 0 : index
    %c0_10 = arith.constant 0 : index
    %c0_11 = arith.constant 0 : index
    %18 = vector.load %arg10[%c0_8, %c0_9, %c0_10, %c0_11] : memref<1x16x16x24xf32, #tpu.memory_space<vmem>>, vector<1x16x16x8xf32>
    %19 = vector.shape_cast %18 : vector<1x16x16x8xf32> to vector<16x16x8xf32>
    %20 = vector.shape_cast %17 : vector<16x16x8xf32> to vector<1x16x16x8xf32>
    tpu.vector_store %arg10[%c0_8, %c0_9, %c0_10, %c0_11], %20 {strides = array<i32>} : memref<1x16x16x24xf32, #tpu.memory_space<vmem>>, vector<1x16x16x8xf32>,
    %cst_12 = arith.constant 0.000000e+00 : bf16
    %21 = vector.broadcast %cst_12 : bf16 to vector<16x1x4xbf16>
    %22 = tpu.concatenate %21, %13, %21 in 1 : vector<16x1x4xbf16>, vector<16x16x4xbf16>, vector<16x1x4xbf16> -> vector<16x18x4xbf16>
    %cst_13 = arith.constant 0.000000e+00 : bf16
    %23 = vector.broadcast %cst_13 : bf16 to vector<1x18x4xbf16>
    %24 = tpu.concatenate %23, %22, %23 in 0 : vector<1x18x4xbf16>, vector<16x18x4xbf16>, vector<1x18x4xbf16> -> vector<18x18x4xbf16>
    %25 = vector.extract_strided_slice %24 {offsets = [0, 0, 0], sizes = [16, 16, 4], strides = [1, 1, 1]} : vector<18x18x4xbf16> to vector<16x16x4xbf16>
    %26 = vector.extract_strided_slice %24 {offsets = [0, 1, 0], sizes = [16, 16, 4], strides = [1, 1, 1]} : vector<18x18x4xbf16> to vector<16x16x4xbf16>
    %27 = vector.extract_strided_slice %24 {offsets = [0, 2, 0], sizes = [16, 16, 4], strides = [1, 1, 1]} : vector<18x18x4xbf16> to vector<16x16x4xbf16>
    %28 = tpu.concatenate %25, %26, %27 in 2 : vector<16x16x4xbf16>, vector<16x16x4xbf16>, vector<16x16x4xbf16> -> vector<16x16x12xbf16>
    %29 = vector.shape_cast %28 : vector<16x16x12xbf16> to vector<256x12xbf16>
    %c0_14 = arith.constant 0 : index
    %c0_15 = arith.constant 0 : index
    %c0_16 = arith.constant 0 : index
    %30 = vector.load %arg4[%c0_14, %c0_15, %c0_16] : memref<3x12x8xbf16, #tpu.memory_space<vmem>>, vector<1x12x8xbf16>
    %31 = vector.shape_cast %30 : vector<1x12x8xbf16> to vector<12x8xbf16>
    %cst_17 = arith.constant dense<0.000000e+00> : vector<256x8xf32>
    %32 = tpu.matmul %29, %31, %cst_17 {dimension_numbers = #tpu.dot_dimension_numbers<[1], [0], [0], [1], [0, 0, 1, 1], [], []>} : vector<256x12xbf16>, vector<12x8xbf16>, vector<256x8xf32> -> vector<256x8xf32>
    %33 = vector.extract_strided_slice %24 {offsets = [1, 0, 0], sizes = [16, 16, 4], strides = [1, 1, 1]} : vector<18x18x4xbf16> to vector<16x16x4xbf16>
    %34 = vector.extract_strided_slice %24 {offsets = [1, 1, 0], sizes = [16, 16, 4], strides = [1, 1, 1]} : vector<18x18x4xbf16> to vector<16x16x4xbf16>
    %35 = vector.extract_strided_slice %24 {offsets = [1, 2, 0], sizes = [16, 16, 4], strides = [1, 1, 1]} : vector<18x18x4xbf16> to vector<16x16x4xbf16>
    %36 = tpu.concatenate %33, %34, %35 in 2 : vector<16x16x4xbf16>, vector<16x16x4xbf16>, vector<16x16x4xbf16> -> vector<16x16x12xbf16>
    %37 = vector.shape_cast %36 : vector<16x16x12xbf16> to vector<256x12xbf16>
    %c1 = arith.constant 1 : index
    %c0_18 = arith.constant 0 : index
    %c0_19 = arith.constant 0 : index
    %38 = vector.load %arg4[%c1, %c0_18, %c0_19] : memref<3x12x8xbf16, #tpu.memory_space<vmem>>, vector<1x12x8xbf16>
    %39 = vector.shape_cast %38 : vector<1x12x8xbf16> to vector<12x8xbf16>
    %cst_20 = arith.constant dense<0.000000e+00> : vector<256x8xf32>
    %40 = tpu.matmul %37, %39, %cst_20 {dimension_numbers = #tpu.dot_dimension_numbers<[1], [0], [0], [1], [0, 0, 1, 1], [], []>} : vector<256x12xbf16>, vector<12x8xbf16>, vector<256x8xf32> -> vector<256x8xf32>
    %41 = arith.addf %32, %40 : vector<256x8xf32>
    %42 = vector.extract_strided_slice %24 {offsets = [2, 0, 0], sizes = [16, 16, 4], strides = [1, 1, 1]} : vector<18x18x4xbf16> to vector<16x16x4xbf16>
    %43 = vector.extract_strided_slice %24 {offsets = [2, 1, 0], sizes = [16, 16, 4], strides = [1, 1, 1]} : vector<18x18x4xbf16> to vector<16x16x4xbf16>
    %44 = vector.extract_strided_slice %24 {offsets = [2, 2, 0], sizes = [16, 16, 4], strides = [1, 1, 1]} : vector<18x18x4xbf16> to vector<16x16x4xbf16>
    %45 = tpu.concatenate %42, %43, %44 in 2 : vector<16x16x4xbf16>, vector<16x16x4xbf16>, vector<16x16x4xbf16> -> vector<16x16x12xbf16>
    %46 = vector.shape_cast %45 : vector<16x16x12xbf16> to vector<256x12xbf16>
    %c2 = arith.constant 2 : index
    %c0_21 = arith.constant 0 : index
    %c0_22 = arith.constant 0 : index
    %47 = vector.load %arg4[%c2, %c0_21, %c0_22] : memref<3x12x8xbf16, #tpu.memory_space<vmem>>, vector<1x12x8xbf16>
    %48 = vector.shape_cast %47 : vector<1x12x8xbf16> to vector<12x8xbf16>
    %cst_23 = arith.constant dense<0.000000e+00> : vector<256x8xf32>
    %49 = tpu.matmul %46, %48, %cst_23 {dimension_numbers = #tpu.dot_dimension_numbers<[1], [0], [0], [1], [0, 0, 1, 1], [], []>} : vector<256x12xbf16>, vector<12x8xbf16>, vector<256x8xf32> -> vector<256x8xf32>
    %50 = arith.addf %41, %49 : vector<256x8xf32>
    %c0_24 = arith.constant 0 : index
    %c0_25 = arith.constant 0 : index
    %51 = vector.load %arg5[%c0_24, %c0_25] : memref<1x8xf32, #tpu.memory_space<vmem>>, vector<1x8xf32>
    %52 = vector.broadcast %51 : vector<1x8xf32> to vector<256x8xf32>
    %53 = arith.addf %50, %52 : vector<256x8xf32>
    %cst_26 = arith.constant 0.000000e+00 : f32
    %54 = vector.broadcast %cst_26 : f32 to vector<256x8xf32>
    %55 = arith.maximumf %53, %54 : vector<256x8xf32>
    %56 = vector.shape_cast %55 : vector<256x8xf32> to vector<16x16x8xf32>
    %c0_27 = arith.constant 0 : index
    %c0_28 = arith.constant 0 : index
    %c0_29 = arith.constant 0 : index
    %c8 = arith.constant 8 : index
    %57 = vector.load %arg10[%c0_27, %c0_28, %c0_29, %c8] : memref<1x16x16x24xf32, #tpu.memory_space<vmem>>, vector<1x16x16x8xf32>
    %58 = vector.shape_cast %57 : vector<1x16x16x8xf32> to vector<16x16x8xf32>
    %59 = vector.shape_cast %56 : vector<16x16x8xf32> to vector<1x16x16x8xf32>
    tpu.vector_store %arg10[%c0_27, %c0_28, %c0_29, %c8], %59 {strides = array<i32>} : memref<1x16x16x24xf32, #tpu.memory_space<vmem>>, vector<1x16x16x8xf32>,
    %cst_30 = arith.constant 0.000000e+00 : bf16
    %60 = vector.broadcast %cst_30 : bf16 to vector<16x2x2xbf16>
    %61 = tpu.concatenate %60, %16, %60 in 1 : vector<16x2x2xbf16>, vector<16x16x2xbf16>, vector<16x2x2xbf16> -> vector<16x20x2xbf16>
    %cst_31 = arith.constant 0.000000e+00 : bf16
    %62 = vector.broadcast %cst_31 : bf16 to vector<2x20x2xbf16>
    %63 = tpu.concatenate %62, %61, %62 in 0 : vector<2x20x2xbf16>, vector<16x20x2xbf16>, vector<2x20x2xbf16> -> vector<20x20x2xbf16>
    %64 = vector.extract_strided_slice %63 {offsets = [0, 0, 0], sizes = [16, 16, 2], strides = [1, 1, 1]} : vector<20x20x2xbf16> to vector<16x16x2xbf16>
    %65 = vector.extract_strided_slice %63 {offsets = [0, 1, 0], sizes = [16, 16, 2], strides = [1, 1, 1]} : vector<20x20x2xbf16> to vector<16x16x2xbf16>
    %66 = vector.extract_strided_slice %63 {offsets = [0, 2, 0], sizes = [16, 16, 2], strides = [1, 1, 1]} : vector<20x20x2xbf16> to vector<16x16x2xbf16>
    %67 = vector.extract_strided_slice %63 {offsets = [0, 3, 0], sizes = [16, 16, 2], strides = [1, 1, 1]} : vector<20x20x2xbf16> to vector<16x16x2xbf16>
    %68 = vector.extract_strided_slice %63 {offsets = [0, 4, 0], sizes = [16, 16, 2], strides = [1, 1, 1]} : vector<20x20x2xbf16> to vector<16x16x2xbf16>
    %69 = tpu.concatenate %64, %65, %66, %67, %68 in 2 : vector<16x16x2xbf16>, vector<16x16x2xbf16>, vector<16x16x2xbf16>, vector<16x16x2xbf16>, vector<16x16x2xbf16> -> vector<16x16x10xbf16>
    %70 = vector.shape_cast %69 : vector<16x16x10xbf16> to vector<256x10xbf16>
    %c0_32 = arith.constant 0 : index
    %c0_33 = arith.constant 0 : index
    %c0_34 = arith.constant 0 : index
    %71 = vector.load %arg6[%c0_32, %c0_33, %c0_34] : memref<5x10x4xbf16, #tpu.memory_space<vmem>>, vector<1x10x4xbf16>
    %72 = vector.shape_cast %71 : vector<1x10x4xbf16> to vector<10x4xbf16>
    %cst_35 = arith.constant dense<0.000000e+00> : vector<256x4xf32>
    %73 = tpu.matmul %70, %72, %cst_35 {dimension_numbers = #tpu.dot_dimension_numbers<[1], [0], [0], [1], [0, 0, 1, 1], [], []>} : vector<256x10xbf16>, vector<10x4xbf16>, vector<256x4xf32> -> vector<256x4xf32>
    %74 = vector.extract_strided_slice %63 {offsets = [1, 0, 0], sizes = [16, 16, 2], strides = [1, 1, 1]} : vector<20x20x2xbf16> to vector<16x16x2xbf16>
    %75 = vector.extract_strided_slice %63 {offsets = [1, 1, 0], sizes = [16, 16, 2], strides = [1, 1, 1]} : vector<20x20x2xbf16> to vector<16x16x2xbf16>
    %76 = vector.extract_strided_slice %63 {offsets = [1, 2, 0], sizes = [16, 16, 2], strides = [1, 1, 1]} : vector<20x20x2xbf16> to vector<16x16x2xbf16>
    %77 = vector.extract_strided_slice %63 {offsets = [1, 3, 0], sizes = [16, 16, 2], strides = [1, 1, 1]} : vector<20x20x2xbf16> to vector<16x16x2xbf16>
    %78 = vector.extract_strided_slice %63 {offsets = [1, 4, 0], sizes = [16, 16, 2], strides = [1, 1, 1]} : vector<20x20x2xbf16> to vector<16x16x2xbf16>
    %79 = tpu.concatenate %74, %75, %76, %77, %78 in 2 : vector<16x16x2xbf16>, vector<16x16x2xbf16>, vector<16x16x2xbf16>, vector<16x16x2xbf16>, vector<16x16x2xbf16> -> vector<16x16x10xbf16>
    %80 = vector.shape_cast %79 : vector<16x16x10xbf16> to vector<256x10xbf16>
    %c1_36 = arith.constant 1 : index
    %c0_37 = arith.constant 0 : index
    %c0_38 = arith.constant 0 : index
    %81 = vector.load %arg6[%c1_36, %c0_37, %c0_38] : memref<5x10x4xbf16, #tpu.memory_space<vmem>>, vector<1x10x4xbf16>
    %82 = vector.shape_cast %81 : vector<1x10x4xbf16> to vector<10x4xbf16>
    %cst_39 = arith.constant dense<0.000000e+00> : vector<256x4xf32>
    %83 = tpu.matmul %80, %82, %cst_39 {dimension_numbers = #tpu.dot_dimension_numbers<[1], [0], [0], [1], [0, 0, 1, 1], [], []>} : vector<256x10xbf16>, vector<10x4xbf16>, vector<256x4xf32> -> vector<256x4xf32>
    %84 = arith.addf %73, %83 : vector<256x4xf32>
    %85 = vector.extract_strided_slice %63 {offsets = [2, 0, 0], sizes = [16, 16, 2], strides = [1, 1, 1]} : vector<20x20x2xbf16> to vector<16x16x2xbf16>
    %86 = vector.extract_strided_slice %63 {offsets = [2, 1, 0], sizes = [16, 16, 2], strides = [1, 1, 1]} : vector<20x20x2xbf16> to vector<16x16x2xbf16>
    %87 = vector.extract_strided_slice %63 {offsets = [2, 2, 0], sizes = [16, 16, 2], strides = [1, 1, 1]} : vector<20x20x2xbf16> to vector<16x16x2xbf16>
    %88 = vector.extract_strided_slice %63 {offsets = [2, 3, 0], sizes = [16, 16, 2], strides = [1, 1, 1]} : vector<20x20x2xbf16> to vector<16x16x2xbf16>
    %89 = vector.extract_strided_slice %63 {offsets = [2, 4, 0], sizes = [16, 16, 2], strides = [1, 1, 1]} : vector<20x20x2xbf16> to vector<16x16x2xbf16>
    %90 = tpu.concatenate %85, %86, %87, %88, %89 in 2 : vector<16x16x2xbf16>, vector<16x16x2xbf16>, vector<16x16x2xbf16>, vector<16x16x2xbf16>, vector<16x16x2xbf16> -> vector<16x16x10xbf16>
    %91 = vector.shape_cast %90 : vector<16x16x10xbf16> to vector<256x10xbf16>
    %c2_40 = arith.constant 2 : index
    %c0_41 = arith.constant 0 : index
    %c0_42 = arith.constant 0 : index
    %92 = vector.load %arg6[%c2_40, %c0_41, %c0_42] : memref<5x10x4xbf16, #tpu.memory_space<vmem>>, vector<1x10x4xbf16>
    %93 = vector.shape_cast %92 : vector<1x10x4xbf16> to vector<10x4xbf16>
    %cst_43 = arith.constant dense<0.000000e+00> : vector<256x4xf32>
    %94 = tpu.matmul %91, %93, %cst_43 {dimension_numbers = #tpu.dot_dimension_numbers<[1], [0], [0], [1], [0, 0, 1, 1], [], []>} : vector<256x10xbf16>, vector<10x4xbf16>, vector<256x4xf32> -> vector<256x4xf32>
    %95 = arith.addf %84, %94 : vector<256x4xf32>
    %96 = vector.extract_strided_slice %63 {offsets = [3, 0, 0], sizes = [16, 16, 2], strides = [1, 1, 1]} : vector<20x20x2xbf16> to vector<16x16x2xbf16>
    %97 = vector.extract_strided_slice %63 {offsets = [3, 1, 0], sizes = [16, 16, 2], strides = [1, 1, 1]} : vector<20x20x2xbf16> to vector<16x16x2xbf16>
    %98 = vector.extract_strided_slice %63 {offsets = [3, 2, 0], sizes = [16, 16, 2], strides = [1, 1, 1]} : vector<20x20x2xbf16> to vector<16x16x2xbf16>
    %99 = vector.extract_strided_slice %63 {offsets = [3, 3, 0], sizes = [16, 16, 2], strides = [1, 1, 1]} : vector<20x20x2xbf16> to vector<16x16x2xbf16>
    %100 = vector.extract_strided_slice %63 {offsets = [3, 4, 0], sizes = [16, 16, 2], strides = [1, 1, 1]} : vector<20x20x2xbf16> to vector<16x16x2xbf16>
    %101 = tpu.concatenate %96, %97, %98, %99, %100 in 2 : vector<16x16x2xbf16>, vector<16x16x2xbf16>, vector<16x16x2xbf16>, vector<16x16x2xbf16>, vector<16x16x2xbf16> -> vector<16x16x10xbf16>
    %102 = vector.shape_cast %101 : vector<16x16x10xbf16> to vector<256x10xbf16>
    %c3 = arith.constant 3 : index
    %c0_44 = arith.constant 0 : index
    %c0_45 = arith.constant 0 : index
    %103 = vector.load %arg6[%c3, %c0_44, %c0_45] : memref<5x10x4xbf16, #tpu.memory_space<vmem>>, vector<1x10x4xbf16>
    %104 = vector.shape_cast %103 : vector<1x10x4xbf16> to vector<10x4xbf16>
    %cst_46 = arith.constant dense<0.000000e+00> : vector<256x4xf32>
    %105 = tpu.matmul %102, %104, %cst_46 {dimension_numbers = #tpu.dot_dimension_numbers<[1], [0], [0], [1], [0, 0, 1, 1], [], []>} : vector<256x10xbf16>, vector<10x4xbf16>, vector<256x4xf32> -> vector<256x4xf32>
    %106 = arith.addf %95, %105 : vector<256x4xf32>
    %107 = vector.extract_strided_slice %63 {offsets = [4, 0, 0], sizes = [16, 16, 2], strides = [1, 1, 1]} : vector<20x20x2xbf16> to vector<16x16x2xbf16>
    %108 = vector.extract_strided_slice %63 {offsets = [4, 1, 0], sizes = [16, 16, 2], strides = [1, 1, 1]} : vector<20x20x2xbf16> to vector<16x16x2xbf16>
    %109 = vector.extract_strided_slice %63 {offsets = [4, 2, 0], sizes = [16, 16, 2], strides = [1, 1, 1]} : vector<20x20x2xbf16> to vector<16x16x2xbf16>
    %110 = vector.extract_strided_slice %63 {offsets = [4, 3, 0], sizes = [16, 16, 2], strides = [1, 1, 1]} : vector<20x20x2xbf16> to vector<16x16x2xbf16>
    %111 = vector.extract_strided_slice %63 {offsets = [4, 4, 0], sizes = [16, 16, 2], strides = [1, 1, 1]} : vector<20x20x2xbf16> to vector<16x16x2xbf16>
    %112 = tpu.concatenate %107, %108, %109, %110, %111 in 2 : vector<16x16x2xbf16>, vector<16x16x2xbf16>, vector<16x16x2xbf16>, vector<16x16x2xbf16>, vector<16x16x2xbf16> -> vector<16x16x10xbf16>
    %113 = vector.shape_cast %112 : vector<16x16x10xbf16> to vector<256x10xbf16>
    %c4 = arith.constant 4 : index
    %c0_47 = arith.constant 0 : index
    %c0_48 = arith.constant 0 : index
    %114 = vector.load %arg6[%c4, %c0_47, %c0_48] : memref<5x10x4xbf16, #tpu.memory_space<vmem>>, vector<1x10x4xbf16>
    %115 = vector.shape_cast %114 : vector<1x10x4xbf16> to vector<10x4xbf16>
    %cst_49 = arith.constant dense<0.000000e+00> : vector<256x4xf32>
    %116 = tpu.matmul %113, %115, %cst_49 {dimension_numbers = #tpu.dot_dimension_numbers<[1], [0], [0], [1], [0, 0, 1, 1], [], []>} : vector<256x10xbf16>, vector<10x4xbf16>, vector<256x4xf32> -> vector<256x4xf32>
    %117 = arith.addf %106, %116 : vector<256x4xf32>
    %c0_50 = arith.constant 0 : index
    %c0_51 = arith.constant 0 : index
    %118 = vector.load %arg7[%c0_50, %c0_51] : memref<1x4xf32, #tpu.memory_space<vmem>>, vector<1x4xf32>
    %119 = vector.broadcast %118 : vector<1x4xf32> to vector<256x4xf32>
    %120 = arith.addf %117, %119 : vector<256x4xf32>
    %cst_52 = arith.constant 0.000000e+00 : f32
    %121 = vector.broadcast %cst_52 : f32 to vector<256x4xf32>
    %122 = arith.maximumf %120, %121 : vector<256x4xf32>
    %123 = vector.shape_cast %122 : vector<256x4xf32> to vector<16x16x4xf32>
    %c0_53 = arith.constant 0 : index
    %c0_54 = arith.constant 0 : index
    %c0_55 = arith.constant 0 : index
    %c16 = arith.constant 16 : index
    %124 = vector.load %arg10[%c0_53, %c0_54, %c0_55, %c16] : memref<1x16x16x24xf32, #tpu.memory_space<vmem>>, vector<1x16x16x4xf32>
    %125 = vector.shape_cast %124 : vector<1x16x16x4xf32> to vector<16x16x4xf32>
    %126 = vector.shape_cast %123 : vector<16x16x4xf32> to vector<1x16x16x4xf32>
    tpu.vector_store %arg10[%c0_53, %c0_54, %c0_55, %c16], %126 {strides = array<i32>} : memref<1x16x16x24xf32, #tpu.memory_space<vmem>>, vector<1x16x16x4xf32>,
    %cst_56 = arith.constant -3.389530e+38 : bf16
    %127 = vector.broadcast %cst_56 : bf16 to vector<16x1x4xbf16>
    %128 = tpu.concatenate %127, %1, %127 in 1 : vector<16x1x4xbf16>, vector<16x16x4xbf16>, vector<16x1x4xbf16> -> vector<16x18x4xbf16>
    %129 = vector.extract_strided_slice %128 {offsets = [0, 0, 0], sizes = [16, 16, 4], strides = [1, 1, 1]} : vector<16x18x4xbf16> to vector<16x16x4xbf16>
    %130 = vector.extract_strided_slice %128 {offsets = [0, 1, 0], sizes = [16, 16, 4], strides = [1, 1, 1]} : vector<16x18x4xbf16> to vector<16x16x4xbf16>
    %131 = arith.maximumf %129, %130 : vector<16x16x4xbf16>
    %132 = vector.extract_strided_slice %128 {offsets = [0, 2, 0], sizes = [16, 16, 4], strides = [1, 1, 1]} : vector<16x18x4xbf16> to vector<16x16x4xbf16>
    %133 = arith.maximumf %131, %132 : vector<16x16x4xbf16>
    %cst_57 = arith.constant -3.389530e+38 : bf16
    %134 = vector.broadcast %cst_57 : bf16 to vector<1x16x4xbf16>
    %135 = tpu.concatenate %134, %133, %134 in 0 : vector<1x16x4xbf16>, vector<16x16x4xbf16>, vector<1x16x4xbf16> -> vector<18x16x4xbf16>
    %136 = vector.extract_strided_slice %135 {offsets = [0, 0, 0], sizes = [16, 16, 4], strides = [1, 1, 1]} : vector<18x16x4xbf16> to vector<16x16x4xbf16>
    %137 = vector.extract_strided_slice %135 {offsets = [1, 0, 0], sizes = [16, 16, 4], strides = [1, 1, 1]} : vector<18x16x4xbf16> to vector<16x16x4xbf16>
    %138 = arith.maximumf %136, %137 : vector<16x16x4xbf16>
    %139 = vector.extract_strided_slice %135 {offsets = [2, 0, 0], sizes = [16, 16, 4], strides = [1, 1, 1]} : vector<18x16x4xbf16> to vector<16x16x4xbf16>
    %140 = arith.maximumf %138, %139 : vector<16x16x4xbf16>
    %141 = vector.shape_cast %140 : vector<16x16x4xbf16> to vector<256x4xbf16>
    %c0_58 = arith.constant 0 : index
    %c0_59 = arith.constant 0 : index
    %142 = vector.load %arg8[%c0_58, %c0_59] : memref<4x4xbf16, #tpu.memory_space<vmem>>, vector<4x4xbf16>
    %cst_60 = arith.constant dense<0.000000e+00> : vector<256x4xf32>
    %143 = tpu.matmul %141, %142, %cst_60 {dimension_numbers = #tpu.dot_dimension_numbers<[1], [0], [0], [1], [0, 0, 1, 1], [], []>} : vector<256x4xbf16>, vector<4x4xbf16>, vector<256x4xf32> -> vector<256x4xf32>
    %c0_61 = arith.constant 0 : index
    %c0_62 = arith.constant 0 : index
    %144 = vector.load %arg9[%c0_61, %c0_62] : memref<1x4xf32, #tpu.memory_space<vmem>>, vector<1x4xf32>
    %145 = vector.broadcast %144 : vector<1x4xf32> to vector<256x4xf32>
    %146 = arith.addf %143, %145 : vector<256x4xf32>
    %cst_63 = arith.constant 0.000000e+00 : f32
    %147 = vector.broadcast %cst_63 : f32 to vector<256x4xf32>
    %148 = arith.maximumf %146, %147 : vector<256x4xf32>
    %149 = vector.shape_cast %148 : vector<256x4xf32> to vector<16x16x4xf32>
    %c0_64 = arith.constant 0 : index
    %c0_65 = arith.constant 0 : index
    %c0_66 = arith.constant 0 : index
    %c20 = arith.constant 20 : index
    %150 = vector.load %arg10[%c0_64, %c0_65, %c0_66, %c20] : memref<1x16x16x24xf32, #tpu.memory_space<vmem>>, vector<1x16x16x4xf32>
    %151 = vector.shape_cast %150 : vector<1x16x16x4xf32> to vector<16x16x4xf32>
    %152 = vector.shape_cast %149 : vector<16x16x4xf32> to vector<1x16x16x4xf32>
    tpu.vector_store %arg10[%c0_64, %c0_65, %c0_66, %c20], %152 {strides = array<i32>} : memref<1x16x16x24xf32, #tpu.memory_space<vmem>>, vector<1x16x16x4xf32>,
    return
  }
  func.func @transform_0(%arg0: i32) -> (i32, i32, i32, i32) {
    %c0_i32 = arith.constant 0 : i32
    %c0_i32_0 = arith.constant 0 : i32
    %c0_i32_1 = arith.constant 0 : i32
    %c0_i32_2 = arith.constant 0 : i32
    return %arg0, %c0_i32, %c0_i32_0, %c0_i32_1 : i32, i32, i32, i32
  }
  func.func @transform_1(%arg0: i32) -> (i32, i32) {
    %c0_i32 = arith.constant 0 : i32
    %c0_i32_0 = arith.constant 0 : i32
    %c0_i32_1 = arith.constant 0 : i32
    return %c0_i32, %c0_i32_0 : i32, i32
  }
  func.func @transform_2(%arg0: i32) -> (i32, i32) {
    %c0_i32 = arith.constant 0 : i32
    %c0_i32_0 = arith.constant 0 : i32
    %c0_i32_1 = arith.constant 0 : i32
    return %c0_i32, %c0_i32_0 : i32, i32
  }
  func.func @transform_3(%arg0: i32) -> (i32, i32, i32) {
    %c0_i32 = arith.constant 0 : i32
    %c0_i32_0 = arith.constant 0 : i32
    %c0_i32_1 = arith.constant 0 : i32
    %c0_i32_2 = arith.constant 0 : i32
    return %c0_i32, %c0_i32_0, %c0_i32_1 : i32, i32, i32
  }
  func.func @transform_4(%arg0: i32) -> (i32, i32) {
    %c0_i32 = arith.constant 0 : i32
    %c0_i32_0 = arith.constant 0 : i32
    %c0_i32_1 = arith.constant 0 : i32
    return %c0_i32, %c0_i32_0 : i32, i32
  }
  func.func @transform_5(%arg0: i32) -> (i32, i32, i32) {
    %c0_i32 = arith.constant 0 : i32
    %c0_i32_0 = arith.constant 0 : i32
    %c0_i32_1 = arith.constant 0 : i32
    %c0_i32_2 = arith.constant 0 : i32
    return %c0_i32, %c0_i32_0, %c0_i32_1 : i32, i32, i32
  }
  func.func @transform_6(%arg0: i32) -> (i32, i32) {
    %c0_i32 = arith.constant 0 : i32
    %c0_i32_0 = arith.constant 0 : i32
    %c0_i32_1 = arith.constant 0 : i32
    return %c0_i32, %c0_i32_0 : i32, i32
  }
  func.func @transform_7(%arg0: i32) -> (i32, i32) {
    %c0_i32 = arith.constant 0 : i32
    %c0_i32_0 = arith.constant 0 : i32
    %c0_i32_1 = arith.constant 0 : i32
    return %c0_i32, %c0_i32_0 : i32, i32
  }
  func.func @transform_8(%arg0: i32) -> (i32, i32) {
    %c0_i32 = arith.constant 0 : i32
    %c0_i32_0 = arith.constant 0 : i32
    %c0_i32_1 = arith.constant 0 : i32
    return %c0_i32, %c0_i32_0 : i32, i32
  }
  func.func @transform_9(%arg0: i32) -> (i32, i32, i32, i32) {
    %c0_i32 = arith.constant 0 : i32
    %c0_i32_0 = arith.constant 0 : i32
    %c0_i32_1 = arith.constant 0 : i32
    %c0_i32_2 = arith.constant 0 : i32
    return %arg0, %c0_i32, %c0_i32_0, %c0_i32_1 : i32, i32, i32, i32
  }
}

</mosaic_0001>

<bundles_post_ra>
// kernel: inception_forward.1
= control target key start
LH: loop header
LB: loop body
LE: loop exit
PB: predicated region body
PF: predicated region fallthrough
CT: control target
= control target key end

     0   :  { %14 = vsyncpa [#allocation3], 0  ;;  %s9337_s0 = inlined_call_operand.vmem [shape: bf16[2,16,16,4], index: 0, kind: input, shape index: {}]   ;;  %s9338_s1 = inlined_call_operand.vmem [shape: bf16[4,14], index: 1, kind: input, shape index: {}]   ;;  %s9339_s2 = inlined_call_operand.vmem [shape: f32[1,14], index: 2, kind: input, shape index: {}]   ;;  %s9340_s3 = inlined_call_operand.vmem [shape: bf16[3,12,8], index: 3, kind: input, shape index: {}]   ;;  %s9341_s4 = inlined_call_operand.vmem [shape: f32[1,8], index: 4, kind: input, shape index: {}]   ;;  %s9342_s5 = inlined_call_operand.vmem [shape: bf16[5,10,4], index: 5, kind: input, shape index: {}]   ;;  %s9343_s6 = inlined_call_operand.vmem [shape: f32[1,4], index: 6, kind: input, shape index: {}]   ;;  %s9344_s7 = inlined_call_operand.vmem [shape: bf16[4,4], index: 7, kind: input, shape index: {}]   ;;  %s9345_s8 = inlined_call_operand.vmem [shape: f32[1,4], index: 8, kind: input, shape index: {}]   ;;  %s9346_s9 = inlined_call_operand.hbm [shape: f32[2,16,16,24], index: 9, kind: output, shape index: {}]  }
   0x1   :  { %16 = vsyncpa [#allocation3 + $0x1], 0  ;;  %s6247_s30 = smov 0   ;;  %s6249_s10 = smov 0  }
   0x2   :  { %s6251_s11 = smov 0   ;;  %s6253_s12 = smov 0  }
   0x3 LB: > { %s6268_s13 = sadd.s32 4294967295, %s6183_s12   ;;  %s5294_s14 = sadd.s32 4294967294, %s6183_s12   ;;  %s6183_s12 = sphi %s6253_s12, %s9691_s12   ;;  %s6179_s11 = sphi %s6251_s11, %s9690_s11   ;;  %s6175_s10 = sphi %s6249_s10, %s9689_s10   ;;  %s6171_s30 = sphi %s6247_s30, %s9688_s30  }
   0x4   : > { %s6272_s15 = sadd.s32 1, %s6183_s12   ;;  %s223_s16 = sadd.s32 1, %s6179_s11 }
   0x5   : > { %s220_s17 = ssub.s32 %s6183_s12, %s6272_s15  ;;  %p233_p0 = scmp.ne.s32.totalorder %s6179_s11, %s6175_s10 }
   0x6   : > { %p221_p1 = scmp.eq.s32.totalorder %s220_s17, 0  ;;  %p234_p2 = scmp.eq.s32.totalorder %s6268_s13, 1 }
   0x7   : > { %p239_p3 = scmp.ne.s32.totalorder %s6175_s10, %s6171_s30  ;;  %p240_p4 = scmp.eq.s32.totalorder %s5294_s14, 1 }
   0x8   : > { %s6283_s18 = scalar_select %p221_p1, %s6179_s11, %s223_s16  }
   0x9   : > { %p6285_p5 = por %p234_p2, %p233_p0  ;;  %p6289_p6 = por %p240_p4, %p239_p3 }
   0xa   : > { %p5297_p7 = scmp.ge.s32.totalorder %s6183_s12, 1  ;;  %p290_p8 = scmp.lt.s32.totalorder %s6183_s12, 3 }
   0xc   : > { %p291_p9 = pnand %p5297_p7, %p290_p8 }
   0xe   : > { %294 = sbr.rel (%p291_p9) target bundleno = 1269 (0x4f5), region = 56 }
  0x13   : > { %v365_v0 = vld [vmem:[%s9338_s1] sm:$0x3]  ;;  %vm502_vm0 = vcmask 1041408   ;;  %p326_p10 = scmp.lt.s32.totalorder %s6268_s13, 1  ;;  %vm453_vm1 = vcmask 31744   ;;  %v6185_v18 = vmov 0  }
  0x14   : > { %6018 = vmatprep.subr.msk.bf16.mxu0 %vm502_vm0, %v365_v0  ;;  %v504_v1 = vsel %vm502_vm0, %v365_v0, 0  ;;  %v6340_v19 = vrot.slane %v6185_v18, 1  ;;  %s6186_s28 = smov 4   ;;  %s6187_s29 = smov 8   ;;  %v6354_v24 = vld [vmem:[%s9339_s2] ss:$0 sm:$0xff] }
  0x15   : > { %5679 = vmatpush3.bf16.msra.mxu0 %v504_v1  ;;  %s327_s23 = scalar_select %p326_p10, %s6268_s13, 1  ;;  %vm715_vm2 = vcmask 64512   ;;  %vm1422_vm3 = vcmask 97280   ;;  %vm957_vm4 = vsmask.f32 256  ;;  %vm956_vm5 = vcmask 1040384  }
  0x16   : > { %v6078_v20 = vpack.i.bf16 %v6340_v19, %v6340_v19  ;;  %1291 = vrot.lane.b32.xlu0 %v6340_v19, %s6187_s29  ;;  %s323_s14 = sand.u32 1, %s6175_s10   ;;  %vm6568_vm6 = vmand %vm956_vm5, %vm957_vm4  ;;  %vm1455_vm7 = vcmask 1045504   ;;  %vm1243_vm8 = vcmask 1046528   ;;  %vm991_vm9 = vsmask.f32 7424  ;;  %s6190_s25 = smov 2  }
  0x17   : > { %s5506_s24 = sshll.u32 %s327_s23, 7  ;;  %s5298_s21 = sshll.u32 %s323_s14, 8  ;;  %vm2610_vm10 = vsmask.f32 6400  ;;  %vm3054_vm11 = vcmask 1044480   ;;  %vm2846_vm12 = vcmask 15360  }
  0x18   : > { %s6305_s27 = scalar_lea.vmem %s9337_s0, %s5506_s24  ;;  %6079 = vrot.lane.b32.xlu1 %v6078_v20, %s6186_s28  ;;  %s6366_s22 = scalar_lea.vmem [#allocation2], %s5298_s21  ;;  %vm2907_vm13 = vcmask 48128   ;;  %vm3021_vm14 = vcmask 80896   ;;  %vm2194_vm15 = vcmask 130112  }
  0x19   : > { %v6083_v2 = vld [vmem:[%s6305_s27] sm:$0xff]   ;;  %v6084_v3 = vld [vmem:[%s6305_s27 + $0x8] sm:$0xff]   ;;  %v6085_v4 = vld [vmem:[%s6305_s27 + $0x10] sm:$0xff]   ;;  %s6188_s23 = smov 116   ;;  %s6189_s24 = smov 120  }
  0x1a   : > { %5680 = vmatprep.mubr.msk.bf16.mxu0 %vm453_vm1, %v6083_v2  ;;  %v6086_v5 = vld [vmem:[%s6305_s27 + $0x18] sm:$0xff]   ;;  %v6087_v6 = vld [vmem:[%s6305_s27 + $0x20] sm:$0xff]   ;;  %v6088_v7 = vld [vmem:[%s6305_s27 + $0x28] sm:$0xff]   ;;  %s6191_s26 = smov 6   ;;  %s6193_s21 = smov 16  }
  0x1b   : > { %5681 = vmatmul.mubr.msk.bf16.vlgmr.msra.gmra.mxu0 %vm453_vm1, %v6084_v3  ;;  %v6089_v8 = vld [vmem:[%s6305_s27 + $0x30] sm:$0xff]   ;;  %v6090_v9 = vld [vmem:[%s6305_s27 + $0x38] sm:$0xff]   ;;  %v6091_v10 = vld [vmem:[%s6305_s27 + $0x40] sm:$0xff]  }
  0x1c   : > { %5684 = vmatprep.mubr.msk.bf16.mxu0 %vm453_vm1, %v6085_v4  ;;  %v6092_v11 = vld [vmem:[%s6305_s27 + $0x48] sm:$0xff]   ;;  %v6093_v12 = vld [vmem:[%s6305_s27 + $0x50] sm:$0xff]   ;;  %v6094_v13 = vld [vmem:[%s6305_s27 + $0x58] sm:$0xff]  }
  0x1d   : > { %v6095_v14 = vld [vmem:[%s6305_s27 + $0x60] sm:$0xff]   ;;  %v6096_v15 = vld [vmem:[%s6305_s27 + $0x68] sm:$0xff]   ;;  %v6097_v16 = vld [vmem:[%s6305_s27 + $0x70] sm:$0xff]  }
  0x1e   : > { %v6098_v17 = vld [vmem:[%s6305_s27 + $0x78] sm:$0xff]  }
  0x23   : > { %5685 = vmatmul.mubr.msk.bf16.gmra.mxu0 %vm453_vm1, %v6086_v5 }
  0x24   : > { %5688 = vmatprep.mubr.msk.bf16.mxu0 %vm453_vm1, %v6087_v6 }
  0x2b   : > { %5689 = vmatmul.mubr.msk.bf16.gmra.mxu0 %vm453_vm1, %v6088_v7 }
  0x2c   : > { %5692 = vmatprep.mubr.msk.bf16.mxu0 %vm453_vm1, %v6089_v8 }
  0x33   : > { %5693 = vmatmul.mubr.msk.bf16.gmra.mxu0 %vm453_vm1, %v6090_v9 }
  0x34   : > { %5696 = vmatprep.mubr.msk.bf16.mxu0 %vm453_vm1, %v6091_v10 }
  0x3b   : > { %5697 = vmatmul.mubr.msk.bf16.gmra.mxu0 %vm453_vm1, %v6092_v11 }
  0x3c   : > { %5700 = vmatprep.mubr.msk.bf16.mxu0 %vm453_vm1, %v6093_v12 }
  0x43   : > { %5701 = vmatmul.mubr.msk.bf16.gmra.mxu0 %vm453_vm1, %v6094_v13 }
  0x44   : > { %5704 = vmatprep.mubr.msk.bf16.mxu0 %vm453_vm1, %v6095_v14 }
  0x4b   : > { %5705 = vmatmul.mubr.msk.bf16.gmra.mxu0 %vm453_vm1, %v6096_v15 }
  0x4c   : > { %5708 = vmatprep.mubr.msk.bf16.mxu0 %vm453_vm1, %v6097_v16 }
  0x53   : > { %5709 = vmatmul.mubr.msk.bf16.gmra.mxu0 %vm453_vm1, %v6098_v17 }
  0x88   : > { %v1292_v23 = vpop.permute.xlu0 %1291 }
  0x8a   : > { %v6347_v21 = vpop.permute.xlu1 %6079 }
  0x8b   : > { %v6081_v22 = vunpack.i.l.bf16 %v6347_v21 }
  0x8d   : > { %v1324_v25 = vsel %vm453_vm1, 0, %v6081_v22 }
  0x8e   : > { %v6360_v26 = vsel %vm715_vm2, %v1324_v25, %v1292_v23 }
  0x8f   : > { %9372 = vst [vmem:[#allocation5_spill] sm:$0xff] %v6360_v26  ;;  %5748 = vmatprep.mubr.msk.bf16.mxu0 %vm1422_vm3, %v6360_v26 }
  0xdb   : > { %v5682_v27 = vpop.f32.mrf.mxu0 }
  0xdc   : > { %v549_v28 = vadd.f32 %v5682_v27, %v6354_v24 }
  0xdd   : > { %v540_v29 = vpop.f32.mrf.mxu0 }
  0xde   : > { %v669_v30 = vmax.f32 %v549_v28, 0.0  ;;  %v541_v31 = vadd.f32 %v6354_v24, %v540_v29 }
  0xdf   : > { %v5683_v32 = vpop.f32.mrf.mxu0 }
  0xe0   : > { %718 = vst.msk [vmem:[%s6366_s22 + $0x10] sm:$0xff] %vm715_vm2, %v669_v30  ;;  %v667_v33 = vmax.f32 %v541_v31, 0.0  ;;  %v552_v34 = vadd.f32 %v5683_v32, %v6354_v24 }
  0xe1   : > { %v543_v35 = vpop.f32.mrf.mxu0 }
  0xe2   : > { %716 = vst.msk [vmem:[%s6366_s22] sm:$0xff] %vm715_vm2, %v667_v33  ;;  %v670_v36 = vmax.f32 %v552_v34, 0.0  ;;  %v544_v37 = vadd.f32 %v6354_v24, %v543_v35 }
  0xe3   : > { %v5686_v38 = vpop.f32.mrf.mxu0 }
  0xe4   : > { %v700_v39 = vpack.c.bf16 %v670_v36, %v669_v30  ;;  %719 = vst.msk [vmem:[%s6366_s22 + $0x18] sm:$0xff] %vm715_vm2, %v670_v36  ;;  %v668_v40 = vmax.f32 %v544_v37, 0.0  ;;  %v565_v41 = vadd.f32 %v5686_v38, %v6354_v24 }
  0xe5   : > { %v556_v42 = vpop.f32.mrf.mxu0 }
  0xe6   : > { %v699_v43 = vpack.c.bf16 %v668_v40, %v667_v33  ;;  %717 = vst.msk [vmem:[%s6366_s22 + $0x8] sm:$0xff] %vm715_vm2, %v668_v40  ;;  %v673_v44 = vmax.f32 %v565_v41, 0.0  ;;  %v557_v45 = vadd.f32 %v6354_v24, %v556_v42  ;;  %v2244_v46 = vrot.slane %v700_v39, 7 }
  0xe7   : > { %v5687_v47 = vpop.f32.mrf.mxu0  ;;  %v756_v48 = vshrl.u32 %v700_v39, 16  ;;  %v759_v57 = vshll.u32 %v700_v39, 16 }
  0xe8   : > { %722 = vst.msk [vmem:[%s6366_s22 + $0x30] sm:$0xff] %vm715_vm2, %v673_v44  ;;  %v671_v49 = vmax.f32 %v557_v45, 0.0  ;;  %v568_v50 = vadd.f32 %v5687_v47, %v6354_v24  ;;  %2261 = vrot.lane.b32.xlu1 %v2244_v46, %s6188_s23  ;;  %v2243_v51 = vrot.slane %v699_v43, 7  ;;  %v749_v52 = vshrl.u32 %v699_v43, 16 }
  0xe9   : > { %v559_v53 = vpop.f32.mrf.mxu0  ;;  %v758_v54 = vrot.slane %v756_v48, 7  ;;  %v752_v3 = vshll.u32 %v699_v43, 16 }
  0xea   : > { %720 = vst.msk [vmem:[%s6366_s22 + $0x20] sm:$0xff] %vm715_vm2, %v671_v49  ;;  %v674_v55 = vmax.f32 %v568_v50, 0.0  ;;  %v560_v56 = vadd.f32 %v6354_v24, %v559_v53  ;;  %2259 = vrot.lane.b32.xlu0 %v2243_v51, %s6188_s23  ;;  %v751_v62 = vrot.slane %v749_v52, 7 }
  0xeb   : > { %v5690_v58 = vpop.f32.mrf.mxu0  ;;  %v761_v61 = vor.u32 %v759_v57, %v758_v54 }
  0xec   : > { %723 = vst.msk [vmem:[%s6366_s22 + $0x38] sm:$0xff] %vm715_vm2, %v674_v55  ;;  %v672_v59 = vmax.f32 %v560_v56, 0.0  ;;  %v581_v60 = vadd.f32 %v5690_v58, %v6354_v24  ;;  %866 = vrot.lane.b32.xlu1 %v758_v54, %s6189_s24  ;;  %v702_v0 = vpack.c.bf16 %v674_v55, %v673_v44  ;;  %v754_v8 = vor.u32 %v752_v3, %v751_v62 }
  0xed   : > { %v572_v63 = vpop.f32.mrf.mxu0 }
  0xee   : > { %721 = vst.msk [vmem:[%s6366_s22 + $0x28] sm:$0xff] %vm715_vm2, %v672_v59  ;;  %v677_v1 = vmax.f32 %v581_v60, 0.0  ;;  %v573_v2 = vadd.f32 %v6354_v24, %v572_v63  ;;  %864 = vrot.lane.b32.xlu0 %v761_v61, %s6189_s24  ;;  %v701_v5 = vpack.c.bf16 %v672_v59, %v671_v49  ;;  %v2246_v12 = vrot.slane %v702_v0, 7 }
  0xef   : > { %v5691_v4 = vpop.f32.mrf.mxu0  ;;  %v770_v13 = vshrl.u32 %v702_v0, 16  ;;  %v773_v32 = vshll.u32 %v702_v0, 16 }
  0xf0   : > { %726 = vst.msk [vmem:[%s6366_s22 + $0x50] sm:$0xff] %vm715_vm2, %v677_v1  ;;  %v675_v6 = vmax.f32 %v573_v2, 0.0  ;;  %v584_v7 = vadd.f32 %v5691_v4, %v6354_v24  ;;  %862 = vrot.lane.b32.xlu1 %v751_v62, %s6189_s24  ;;  %v2245_v16 = vrot.slane %v701_v5, 7  ;;  %v763_v20 = vshrl.u32 %v701_v5, 16 }
  0xf1   : > { %v575_v9 = vpop.f32.mrf.mxu0  ;;  %v772_v25 = vrot.slane %v770_v13, 7  ;;  %v766_v34 = vshll.u32 %v701_v5, 16 }
  0xf2   : > { %724 = vst.msk [vmem:[%s6366_s22 + $0x40] sm:$0xff] %vm715_vm2, %v675_v6  ;;  %v678_v10 = vmax.f32 %v584_v7, 0.0  ;;  %v576_v11 = vadd.f32 %v6354_v24, %v575_v9  ;;  %860 = vrot.lane.b32.xlu0 %v754_v8, %s6189_s24  ;;  %v765_v30 = vrot.slane %v763_v20, 7 }
  0xf3   : > { %v5694_v14 = vpop.f32.mrf.mxu0  ;;  %v775_v37 = vor.u32 %v773_v32, %v772_v25 }
  0xf4   : > { %727 = vst.msk [vmem:[%s6366_s22 + $0x58] sm:$0xff] %vm715_vm2, %v678_v10  ;;  %v676_v15 = vmax.f32 %v576_v11, 0.0  ;;  %2265 = vrot.lane.b32.xlu1 %v2246_v12, %s6188_s23  ;;  %v597_v17 = vadd.f32 %v5694_v14, %v6354_v24  ;;  %v704_v35 = vpack.c.bf16 %v678_v10, %v677_v1  ;;  %v768_v42 = vor.u32 %v766_v34, %v765_v30 }
  0xf5   : > { %v588_v22 = vpop.f32.mrf.mxu0 }
  0xf6   : > { %725 = vst.msk [vmem:[%s6366_s22 + $0x48] sm:$0xff] %vm715_vm2, %v676_v15  ;;  %2263 = vrot.lane.b32.xlu0 %v2245_v16, %s6188_s23  ;;  %v681_v23 = vmax.f32 %v597_v17, 0.0  ;;  %v589_v27 = vadd.f32 %v6354_v24, %v588_v22  ;;  %v703_v40 = vpack.c.bf16 %v676_v15, %v675_v6  ;;  %v2248_v45 = vrot.slane %v704_v35, 7 }
  0xf7   : > { %v5695_v28 = vpop.f32.mrf.mxu0  ;;  %v784_v47 = vshrl.u32 %v704_v35, 16  ;;  %v787_v57 = vshll.u32 %v704_v35, 16 }
  0xf8   : > { %730 = vst.msk [vmem:[%s6366_s22 + $0x70] sm:$0xff] %vm715_vm2, %v681_v23  ;;  %874 = vrot.lane.b32.xlu1 %v772_v25, %s6189_s24  ;;  %v679_v29 = vmax.f32 %v589_v27, 0.0  ;;  %v600_v31 = vadd.f32 %v5695_v28, %v6354_v24  ;;  %v2247_v50 = vrot.slane %v703_v40, 7  ;;  %v777_v52 = vshrl.u32 %v703_v40, 16 }
  0xf9   : > { %v591_v33 = vpop.f32.mrf.mxu0  ;;  %v786_v55 = vrot.slane %v784_v47, 7  ;;  %v780_v62 = vshll.u32 %v703_v40, 16 }
  0xfa   : > { %728 = vst.msk [vmem:[%s6366_s22 + $0x60] sm:$0xff] %vm715_vm2, %v679_v29  ;;  %870 = vrot.lane.b32.xlu0 %v765_v30, %s6189_s24  ;;  %v682_v36 = vmax.f32 %v600_v31, 0.0  ;;  %v592_v38 = vadd.f32 %v6354_v24, %v591_v33  ;;  %v779_v60 = vrot.slane %v777_v52, 7 }
  0xfb   : > { %v5698_v39 = vpop.f32.mrf.mxu0  ;;  %v789_v2 = vor.u32 %v787_v57, %v786_v55 }
  0xfc   : > { %731 = vst.msk [vmem:[%s6366_s22 + $0x78] sm:$0xff] %vm715_vm2, %v682_v36  ;;  %872 = vrot.lane.b32.xlu1 %v775_v37, %s6189_s24  ;;  %v680_v41 = vmax.f32 %v592_v38, 0.0  ;;  %v6424_v43 = vadd.f32 %v5698_v39, %v6354_v24  ;;  %v706_v1 = vpack.c.bf16 %v682_v36, %v681_v23  ;;  %v782_v7 = vor.u32 %v780_v62, %v779_v60 }
  0xfd   : > { %v604_v44 = vpop.f32.mrf.mxu0 }
  0xfe   : > { %729 = vst.msk [vmem:[%s6366_s22 + $0x68] sm:$0xff] %vm715_vm2, %v680_v41  ;;  %868 = vrot.lane.b32.xlu0 %v768_v42, %s6189_s24  ;;  %v685_v46 = vmax.f32 %v6424_v43, 0.0  ;;  %v6431_v48 = vadd.f32 %v6354_v24, %v604_v44  ;;  %v705_v6 = vpack.c.bf16 %v680_v41, %v679_v29  ;;  %v2250_v11 = vrot.slane %v706_v1, 7 }
  0xff   : > { %v5699_v49 = vpop.f32.mrf.mxu0  ;;  %v798_v12 = vshrl.u32 %v706_v1, 16  ;;  %v801_v27 = vshll.u32 %v706_v1, 16 }
 0x100   : > { %2269 = vrot.lane.b32.xlu1 %v2248_v45, %s6188_s23  ;;  %734 = vst.msk [vmem:[%s6366_s22 + $0x90] sm:$0xff] %vm715_vm2, %v685_v46  ;;  %v683_v51 = vmax.f32 %v6431_v48, 0.0  ;;  %v616_v53 = vadd.f32 %v5699_v49, %v6354_v24  ;;  %v2249_v16 = vrot.slane %v705_v6, 7  ;;  %v791_v17 = vshrl.u32 %v705_v6, 16 }
 0x101   : > { %v607_v54 = vpop.f32.mrf.mxu0  ;;  %v800_v25 = vrot.slane %v798_v12, 7  ;;  %v794_v32 = vshll.u32 %v705_v6, 16 }
 0x102   : > { %2267 = vrot.lane.b32.xlu0 %v2247_v50, %s6188_s23  ;;  %732 = vst.msk [vmem:[%s6366_s22 + $0x80] sm:$0xff] %vm715_vm2, %v683_v51  ;;  %v686_v56 = vmax.f32 %v616_v53, 0.0  ;;  %v608_v58 = vadd.f32 %v6354_v24, %v607_v54  ;;  %v793_v31 = vrot.slane %v791_v17, 7 }
 0x103   : > { %v5702_v59 = vpop.f32.mrf.mxu0  ;;  %v803_v37 = vor.u32 %v801_v27, %v800_v25 }
 0x104   : > { %882 = vrot.lane.b32.xlu1 %v786_v55, %s6189_s24  ;;  %735 = vst.msk [vmem:[%s6366_s22 + $0x98] sm:$0xff] %vm715_vm2, %v686_v56  ;;  %v684_v61 = vmax.f32 %v608_v58, 0.0  ;;  %v6450_v63 = vadd.f32 %v5702_v59, %v6354_v24  ;;  %v708_v36 = vpack.c.bf16 %v686_v56, %v685_v46  ;;  %v796_v42 = vor.u32 %v794_v32, %v793_v31 }
 0x105   : > { %v620_v0 = vpop.f32.mrf.mxu0 }
 0x106   : > { %878 = vrot.lane.b32.xlu0 %v779_v60, %s6189_s24  ;;  %733 = vst.msk [vmem:[%s6366_s22 + $0x88] sm:$0xff] %vm715_vm2, %v684_v61  ;;  %v689_v3 = vmax.f32 %v6450_v63, 0.0  ;;  %v6457_v4 = vadd.f32 %v6354_v24, %v620_v0  ;;  %v707_v41 = vpack.c.bf16 %v684_v61, %v683_v51  ;;  %v2252_v46 = vrot.slane %v708_v36, 7 }
 0x107   : > { %v5703_v5 = vpop.f32.mrf.mxu0  ;;  %v812_v47 = vshrl.u32 %v708_v36, 16  ;;  %v815_v57 = vshll.u32 %v708_v36, 16 }
 0x108   : > { %880 = vrot.lane.b32.xlu1 %v789_v2, %s6189_s24  ;;  %738 = vst.msk [vmem:[%s6366_s22 + $0xb0] sm:$0xff] %vm715_vm2, %v689_v3  ;;  %v687_v8 = vmax.f32 %v6457_v4, 0.0  ;;  %v6466_v9 = vadd.f32 %v5703_v5, %v6354_v24  ;;  %v2251_v51 = vrot.slane %v707_v41, 7  ;;  %v805_v52 = vshrl.u32 %v707_v41, 16 }
 0x109   : > { %v623_v10 = vpop.f32.mrf.mxu0  ;;  %v814_v56 = vrot.slane %v812_v47, 7  ;;  %v808_v61 = vshll.u32 %v707_v41, 16  ;;  %v9373_v41 = vmov 0  ;;  %v6584_v47 = vld [vmem:[%s9340_s3 + $0x8] sm:$0x3f]  }
 0x10a   : > { %876 = vrot.lane.b32.xlu0 %v782_v7, %s6189_s24  ;;  %736 = vst.msk [vmem:[%s6366_s22 + $0xa0] sm:$0xff] %vm715_vm2, %v687_v8  ;;  %v690_v13 = vmax.f32 %v6466_v9, 0.0  ;;  %v6475_v14 = vadd.f32 %v6354_v24, %v623_v10  ;;  %v807_v60 = vrot.slane %v805_v52, 7  ;;  %v9374_v41 = vsel %vm6568_vm6, 4294967295, %v9373_v41  ;;  %6019 = vmatprep.subr.msk.bf16.mxu1 %vm1455_vm7, %v6584_v47 }
 0x10b   : > { %v5706_v15 = vpop.f32.mrf.mxu0  ;;  %v817_v1 = vor.u32 %v815_v57, %v814_v56  ;;  %9375 = vst [vmem:[#allocation6_spill] sm:$0xff] %v9374_v41 }
 0x10c   : > { %2273 = vrot.lane.b32.xlu1 %v2250_v11, %s6188_s23  ;;  %739 = vst.msk [vmem:[%s6366_s22 + $0xb8] sm:$0xff] %vm715_vm2, %v690_v13  ;;  %v688_v20 = vmax.f32 %v6475_v14, 0.0  ;;  %v6484_v22 = vadd.f32 %v5706_v15, %v6354_v24  ;;  %v710_v0 = vpack.c.bf16 %v690_v13, %v689_v3  ;;  %v810_v2 = vor.u32 %v808_v61, %v807_v60 }
 0x10d   : > { %v636_v23 = vpop.f32.mrf.mxu0 }
 0x10e   : > { %2271 = vrot.lane.b32.xlu0 %v2249_v16, %s6188_s23  ;;  %737 = vst.msk [vmem:[%s6366_s22 + $0xa8] sm:$0xff] %vm715_vm2, %v688_v20  ;;  %v693_v28 = vmax.f32 %v6484_v22, 0.0  ;;  %v6491_v29 = vadd.f32 %v6354_v24, %v636_v23  ;;  %v2254_v5 = vrot.slane %v710_v0, 7  ;;  %v826_v6 = vshrl.u32 %v710_v0, 16 }
 0x10f   : > { %v5707_v30 = vpop.f32.mrf.mxu0  ;;  %v829_v9 = vshll.u32 %v710_v0, 16 }
 0x110   : > { %890 = vrot.lane.b32.xlu1 %v800_v25, %s6189_s24  ;;  %742 = vst.msk [vmem:[%s6366_s22 + $0xd0] sm:$0xff] %vm715_vm2, %v693_v28  ;;  %v691_v33 = vmax.f32 %v6491_v29, 0.0  ;;  %v648_v34 = vadd.f32 %v5707_v30, %v6354_v24  ;;  %v828_v3 = vrot.slane %v826_v6, 7 }
 0x111   : > { %v639_v35 = vpop.f32.mrf.mxu0 }
 0x112   : > { %886 = vrot.lane.b32.xlu0 %v793_v31, %s6189_s24  ;;  %740 = vst.msk [vmem:[%s6366_s22 + $0xc0] sm:$0xff] %vm715_vm2, %v691_v33  ;;  %v694_v38 = vmax.f32 %v648_v34, 0.0  ;;  %v640_v39 = vadd.f32 %v6354_v24, %v639_v35  ;;  %v831_v11 = vor.u32 %v829_v9, %v828_v3 }
 0x113   : > { %v5710_v40 = vpop.f32.mrf.mxu0 }
 0x114   : > { %888 = vrot.lane.b32.xlu1 %v803_v37, %s6189_s24  ;;  %743 = vst.msk [vmem:[%s6366_s22 + $0xd8] sm:$0xff] %vm715_vm2, %v694_v38  ;;  %v692_v43 = vmax.f32 %v640_v39, 0.0  ;;  %v661_v44 = vadd.f32 %v5710_v40, %v6354_v24 }
 0x115   : > { %v652_v45 = vpop.f32.mrf.mxu0 }
 0x116   : > { %884 = vrot.lane.b32.xlu0 %v796_v42, %s6189_s24  ;;  %741 = vst.msk [vmem:[%s6366_s22 + $0xc8] sm:$0xff] %vm715_vm2, %v692_v43  ;;  %v697_v49 = vmax.f32 %v661_v44, 0.0  ;;  %v653_v48 = vadd.f32 %v6354_v24, %v652_v45  ;;  %v711_v12 = vpack.c.bf16 %v692_v43, %v691_v33  ;;  %v6579_v45 = vld [vmem:[%s9340_s3] sm:$0x3f]  }
 0x117   : > { %v5711_v50 = vpop.f32.mrf.mxu0  ;;  %6020 = vmatprep.subr.msk.bf16.mxu0 %vm1455_vm7, %v6579_v45 }
 0x118   : > { %2277 = vrot.lane.b32.xlu1 %v2252_v46, %s6188_s23  ;;  %746 = vst.msk [vmem:[%s6366_s22 + $0xf0] sm:$0xff] %vm715_vm2, %v697_v49  ;;  %v695_v53 = vmax.f32 %v653_v48, 0.0  ;;  %v664_v54 = vadd.f32 %v5711_v50, %v6354_v24  ;;  %v2255_v16 = vrot.slane %v711_v12, 7  ;;  %v833_v17 = vshrl.u32 %v711_v12, 16 }
 0x119   : > { %v655_v55 = vpop.f32.mrf.mxu0 }
 0x11a   : > { %2275 = vrot.lane.b32.xlu0 %v2251_v51, %s6188_s23  ;;  %744 = vst.msk [vmem:[%s6366_s22 + $0xe0] sm:$0xff] %vm715_vm2, %v695_v53  ;;  %v698_v58 = vmax.f32 %v664_v54, 0.0  ;;  %v656_v59 = vadd.f32 %v6354_v24, %v655_v55  ;;  %v709_v24 = vpack.c.bf16 %v688_v20, %v687_v8  ;;  %v712_v8 = vpack.c.bf16 %v694_v38, %v693_v28 }
 0x11b   : > { %v835_v27 = vrot.slane %v833_v17, 7  ;;  %v836_v28 = vshll.u32 %v711_v12, 16 }
 0x11c   : > { %898 = vrot.lane.b32.xlu1 %v814_v56, %s6189_s24  ;;  %747 = vst.msk [vmem:[%s6366_s22 + $0xf8] sm:$0xff] %vm715_vm2, %v698_v58  ;;  %v696_v62 = vmax.f32 %v656_v59, 0.0  ;;  %v2253_v63 = vrot.slane %v709_v24, 7  ;;  %v819_v7 = vshrl.u32 %v709_v24, 16  ;;  %v822_v4 = vshll.u32 %v709_v24, 16 }
 0x11d   : > { %v2256_v14 = vrot.slane %v712_v8, 7  ;;  %v840_v15 = vshrl.u32 %v712_v8, 16  ;;  %v6551_v20 = vpack.c.bf16 %v698_v58, %v697_v49  ;;  %v843_v23 = vshll.u32 %v712_v8, 16 }
 0x11e   : > { %894 = vrot.lane.b32.xlu0 %v807_v60, %s6189_s24  ;;  %745 = vst.msk [vmem:[%s6366_s22 + $0xe8] sm:$0xff] %vm715_vm2, %v696_v62  ;;  %v821_v10 = vrot.slane %v819_v7, 7  ;;  %v713_v25 = vpack.c.bf16 %v696_v62, %v695_v53  ;;  %v838_v31 = vor.u32 %v836_v28, %v835_v27 }
 0x11f   : > { %v842_v22 = vrot.slane %v840_v15, 7  ;;  %v854_v30 = vshrl.u32 %v6551_v20, 16  ;;  %v857_v34 = vshll.u32 %v6551_v20, 16 }
 0x120   : > { %896 = vrot.lane.b32.xlu1 %v817_v1, %s6189_s24  ;;  %v824_v13 = vor.u32 %v822_v4, %v821_v10  ;;  %v847_v32 = vshrl.u32 %v713_v25, 16  ;;  %v850_v36 = vshll.u32 %v713_v25, 16  ;;  %v2257_v39 = vrot.slane %v713_v25, 7 }
 0x121   : > { %v845_v29 = vor.u32 %v843_v23, %v842_v22  ;;  %v856_v33 = vrot.slane %v854_v30, 7 }
 0x122   : > { %892 = vrot.lane.b32.xlu0 %v810_v2, %s6189_s24  ;;  %v849_v35 = vrot.slane %v847_v32, 7 }
 0x123   : > { %v859_v37 = vor.u32 %v857_v34, %v856_v33 }
 0x124   : > { %2281 = vrot.lane.b32.xlu1 %v2254_v5, %s6188_s23  ;;  %v852_v38 = vor.u32 %v850_v36, %v849_v35 }
 0x126   : > { %2279 = vrot.lane.b32.xlu0 %v2253_v63, %s6188_s23 }
 0x128   : > { %906 = vrot.lane.b32.xlu1 %v828_v3, %s6189_s24 }
 0x12a   : > { %902 = vrot.lane.b32.xlu0 %v821_v10, %s6189_s24 }
 0x12c   : > { %904 = vrot.lane.b32.xlu1 %v831_v11, %s6189_s24 }
 0x12e   : > { %900 = vrot.lane.b32.xlu0 %v824_v13, %s6189_s24 }
 0x130   : > { %2285 = vrot.lane.b32.xlu1 %v2256_v14, %s6188_s23 }
 0x132   : > { %2283 = vrot.lane.b32.xlu0 %v2255_v16, %s6188_s23 }
 0x134   : > { %914 = vrot.lane.b32.xlu1 %v842_v22, %s6189_s24 }
 0x136   : > { %910 = vrot.lane.b32.xlu0 %v835_v27, %s6189_s24 }
 0x138   : > { %912 = vrot.lane.b32.xlu1 %v845_v29, %s6189_s24 }
 0x13a   : > { %908 = vrot.lane.b32.xlu0 %v838_v31, %s6189_s24 }
 0x13c   : > { %922 = vrot.lane.b32.xlu1 %v856_v33, %s6189_s24 }
 0x13e   : > { %918 = vrot.lane.b32.xlu0 %v849_v35, %s6189_s24 }
 0x140   : > { %920 = vrot.lane.b32.xlu1 %v859_v37, %s6189_s24 }
 0x142   : > { %916 = vrot.lane.b32.xlu0 %v852_v38, %s6189_s24  ;;  %s6195_s24 = smov [#allocation2]  }
 0x143   : > { %s6127_s16 = sshll.u32 %s6195_s24, 4  ;;  %s6128_s16 = int_to_ptr.vmem [resolvable:$false] %s6127_s16 }
 0x146   : > { %2287 = vrot.lane.b32.xlu0 %v2257_v39, %s6188_s23 }
 0x15a   : > { %v6565_v40 = vpop.permute.xlu1 %2261 }
 0x15c   : > { %v6572_v42 = vpop.permute.xlu0 %2259 }
 0x15e   : > { %v867_v43 = vpop.permute.xlu1 %866 }
 0x15f   : > { %v976_v44 = vsel %vm6568_vm6, %v867_v43, 0 }
 0x160   : > { %v865_v46 = vpop.permute.xlu0 %864  ;;  %v1250_v48 = vrot.slane %v976_v44, 1  ;;  %v1020_v56 = vshll.u32 %v976_v44, 16 }
 0x161   : > { %v6588_v49 = vsel %vm6568_vm6, 0, %v865_v46 }
 0x162   : > { %v1015_v50 = vshll.u32 %v6588_v49, 16  ;;  %v1249_v51 = vrot.slane %v6588_v49, 1  ;;  %v863_v52 = vpop.permute.xlu1 %862  ;;  %v1013_v57 = vshrl.u32 %v6588_v49, 16  ;;  %v1022_v5 = vrot.slane %v1020_v56, 1 }
 0x163   : > { %v975_v58 = vsel %vm6568_vm6, %v863_v52, 0 }
 0x164   : > { %v1017_v53 = vrot.slane %v1015_v50, 1  ;;  %v861_v54 = vpop.permute.xlu0 %860  ;;  %v1251_v55 = vsel %vm1243_vm8, %v1249_v51, %v1250_v48  ;;  %v1008_v1 = vshll.u32 %v975_v58, 16  ;;  %v1247_v6 = vrot.slane %v975_v58, 1 }
 0x165   : > { %v6602_v59 = vsel %vm6568_vm6, 0, %v861_v54  ;;  %1295 = vrot.lane.b32.xlu1 %v1251_v55, %s6187_s29 }
 0x166   : > { %v1003_v60 = vshll.u32 %v6602_v59, 16  ;;  %v6606_v61 = vpop.permute.xlu1 %2265  ;;  %v1246_v62 = vrot.slane %v6602_v59, 1  ;;  %v1018_v0 = vor.u32 %v1017_v53, %v1013_v57  ;;  %v1001_v63 = vshrl.u32 %v6602_v59, 16 }
 0x167   : > { %v1010_v10 = vrot.slane %v1008_v1, 1 }
 0x168   : > { %v1005_v24 = vrot.slane %v1003_v60, 1  ;;  %v6609_v2 = vpop.permute.xlu0 %2263  ;;  %v1023_v3 = vsel %vm991_vm9, %v1018_v0, %v1022_v5  ;;  %v1248_v9 = vsel %vm1243_vm8, %v1246_v62, %v1247_v6 }
 0x169   : > { %1184 = vrot.lane.b32.xlu1 %v1023_v3, %s6186_s28  ;;  %1293 = vrot.lane.b32.xlu0 %v1248_v9, %s6187_s29 }
 0x16a   : > { %v875_v7 = vpop.permute.xlu1 %874  ;;  %v1006_v8 = vor.u32 %v1005_v24, %v1001_v63 }
 0x16b   : > { %v978_v11 = vsel %vm6568_vm6, %v875_v7, 0 }
 0x16c   : > { %v871_v4 = vpop.permute.xlu0 %870  ;;  %v1011_v12 = vsel %vm991_vm9, %v1006_v8, %v1010_v10  ;;  %v1256_v22 = vrot.slane %v978_v11, 1  ;;  %v1044_v30 = vshll.u32 %v978_v11, 16 }
 0x16d   : > { %1182 = vrot.lane.b32.xlu0 %v1011_v12, %s6186_s28  ;;  %v977_v23 = vsel %vm6568_vm6, %v871_v4, 0 }
 0x16e   : > { %v873_v13 = vpop.permute.xlu1 %872  ;;  %v1032_v32 = vshll.u32 %v977_v23, 16  ;;  %v1253_v33 = vrot.slane %v977_v23, 1  ;;  %v1046_v44 = vrot.slane %v1044_v30, 1 }
 0x16f   : > { %v6621_v14 = vsel %vm6568_vm6, 0, %v873_v13 }
 0x170   : > { %v1039_v15 = vshll.u32 %v6621_v14, 16  ;;  %v1255_v16 = vrot.slane %v6621_v14, 1  ;;  %v869_v17 = vpop.permute.xlu0 %868  ;;  %v1037_v37 = vshrl.u32 %v6621_v14, 16  ;;  %v1034_v46 = vrot.slane %v1032_v32, 1 }
 0x171   : > { %v6630_v25 = vsel %vm6568_vm6, 0, %v869_v17 }
 0x172   : > { %v1027_v27 = vshll.u32 %v6630_v25, 16  ;;  %v1252_v28 = vrot.slane %v6630_v25, 1  ;;  %v6634_v29 = vpop.permute.xlu1 %2269  ;;  %v1257_v31 = vsel %vm1243_vm8, %v1255_v16, %v1256_v22  ;;  %v1041_v34 = vrot.slane %v1039_v15, 1 }
 0x173   : > { %1299 = vrot.lane.b32.xlu1 %v1257_v31, %s6187_s29  ;;  %v1025_v38 = vshrl.u32 %v6630_v25, 16 }
 0x174   : > { %v1029_v35 = vrot.slane %v1027_v27, 1  ;;  %v6638_v36 = vpop.permute.xlu0 %2267  ;;  %v1254_v39 = vsel %vm1243_vm8, %v1252_v28, %v1253_v33  ;;  %v1042_v48 = vor.u32 %v1041_v34, %v1037_v37 }
 0x175   : > { %1297 = vrot.lane.b32.xlu0 %v1254_v39, %s6187_s29 }
 0x176   : > { %v883_v43 = vpop.permute.xlu1 %882  ;;  %v1030_v51 = vor.u32 %v1029_v35, %v1025_v38  ;;  %v1047_v53 = vsel %vm991_vm9, %v1042_v48, %v1046_v44 }
 0x177   : > { %v980_v52 = vsel %vm6568_vm6, %v883_v43, 0  ;;  %1188 = vrot.lane.b32.xlu1 %v1047_v53, %s6186_s28 }
 0x178   : > { %v879_v50 = vpop.permute.xlu0 %878  ;;  %v1035_v54 = vsel %vm991_vm9, %v1030_v51, %v1034_v46  ;;  %v1262_v62 = vrot.slane %v980_v52, 1  ;;  %v1068_v63 = vshll.u32 %v980_v52, 16 }
 0x179   : > { %1186 = vrot.lane.b32.xlu0 %v1035_v54, %s6186_s28  ;;  %v979_v5 = vsel %vm6568_vm6, %v879_v50, 0 }
 0x17a   : > { %v881_v55 = vpop.permute.xlu1 %880  ;;  %v1056_v10 = vshll.u32 %v979_v5, 16  ;;  %v1259_v4 = vrot.slane %v979_v5, 1  ;;  %v1070_v13 = vrot.slane %v1068_v63, 1 }
 0x17b   : > { %v6652_v56 = vsel %vm6568_vm6, 0, %v881_v55 }
 0x17c   : > { %v1063_v57 = vshll.u32 %v6652_v56, 16  ;;  %v1261_v58 = vrot.slane %v6652_v56, 1  ;;  %v877_v60 = vpop.permute.xlu0 %876  ;;  %v1061_v8 = vshrl.u32 %v6652_v56, 16  ;;  %v1058_v23 = vrot.slane %v1056_v10, 1 }
 0x17d   : > { %v6658_v0 = vsel %vm6568_vm6, 0, %v877_v60 }
 0x17e   : > { %v1051_v1 = vshll.u32 %v6658_v0, 16  ;;  %v6661_v24 = vpop.permute.xlu1 %2273  ;;  %v1263_v6 = vsel %vm1243_vm8, %v1261_v58, %v1262_v62  ;;  %v1065_v7 = vrot.slane %v1063_v57, 1  ;;  %v1258_v3 = vrot.slane %v6658_v0, 1 }
 0x17f   : > { %1303 = vrot.lane.b32.xlu1 %v1263_v6, %s6187_s29  ;;  %v1049_v15 = vshrl.u32 %v6658_v0, 16 }
 0x180   : > { %v6668_v9 = vpop.permute.xlu0 %2271  ;;  %v1053_v11 = vrot.slane %v1051_v1, 1  ;;  %v1260_v16 = vsel %vm1243_vm8, %v1258_v3, %v1259_v4  ;;  %v1066_v17 = vor.u32 %v1065_v7, %v1061_v8 }
 0x181   : > { %1301 = vrot.lane.b32.xlu0 %v1260_v16, %s6187_s29 }
 0x182   : > { %v891_v12 = vpop.permute.xlu1 %890  ;;  %v1071_v28 = vsel %vm991_vm9, %v1066_v17, %v1070_v13  ;;  %v1054_v30 = vor.u32 %v1053_v11, %v1049_v15 }
 0x183   : > { %v982_v27 = vsel %vm6568_vm6, %v891_v12, 0  ;;  %1192 = vrot.lane.b32.xlu1 %v1071_v28, %s6186_s28 }
 0x184   : > { %v887_v22 = vpop.permute.xlu0 %886  ;;  %v1059_v33 = vsel %vm991_vm9, %v1054_v30, %v1058_v23  ;;  %v1268_v38 = vrot.slane %v982_v27, 1  ;;  %v1092_v50 = vshll.u32 %v982_v27, 16 }
 0x185   : > { %1190 = vrot.lane.b32.xlu0 %v1059_v33, %s6186_s28  ;;  %v981_v46 = vsel %vm6568_vm6, %v887_v22, 0 }
 0x186   : > { %v889_v31 = vpop.permute.xlu1 %888  ;;  %v1080_v54 = vshll.u32 %v981_v46, 16  ;;  %v1265_v55 = vrot.slane %v981_v46, 1  ;;  %v1094_v62 = vrot.slane %v1092_v50, 1 }
 0x187   : > { %v6680_v32 = vsel %vm6568_vm6, 0, %v889_v31 }
 0x188   : > { %v1087_v34 = vshll.u32 %v6680_v32, 16  ;;  %v1267_v35 = vrot.slane %v6680_v32, 1  ;;  %v885_v37 = vpop.permute.xlu0 %884  ;;  %v1085_v57 = vshrl.u32 %v6680_v32, 16  ;;  %v1082_v7 = vrot.slane %v1080_v54, 1 }
 0x189   : > { %v6688_v39 = vsel %vm6568_vm6, 0, %v885_v37 }
 0x18a   : > { %v1075_v43 = vshll.u32 %v6688_v39, 16  ;;  %v6691_v44 = vpop.permute.xlu1 %2277  ;;  %v1269_v48 = vsel %vm1243_vm8, %v1267_v35, %v1268_v38  ;;  %v1089_v51 = vrot.slane %v1087_v34, 1  ;;  %v1264_v52 = vrot.slane %v6688_v39, 1 }
 0x18b   : > { %1307 = vrot.lane.b32.xlu1 %v1269_v48, %s6187_s29  ;;  %v1073_v1 = vshrl.u32 %v6688_v39, 16 }
 0x18c   : > { %v6698_v53 = vpop.permute.xlu0 %2275  ;;  %v1077_v58 = vrot.slane %v1075_v43, 1  ;;  %v1266_v5 = vsel %vm1243_vm8, %v1264_v52, %v1265_v55  ;;  %v1090_v6 = vor.u32 %v1089_v51, %v1085_v57 }
 0x18d   : > { %1305 = vrot.lane.b32.xlu0 %v1266_v5, %s6187_s29 }
 0x18e   : > { %v899_v60 = vpop.permute.xlu1 %898  ;;  %v1095_v10 = vsel %vm991_vm9, %v1090_v6, %v1094_v62  ;;  %v1078_v4 = vor.u32 %v1077_v58, %v1073_v1 }
 0x18f   : > { %v984_v3 = vsel %vm6568_vm6, %v899_v60, 0  ;;  %1196 = vrot.lane.b32.xlu1 %v1095_v10, %s6186_s28 }
 0x190   : > { %v895_v63 = vpop.permute.xlu0 %894  ;;  %v1083_v12 = vsel %vm991_vm9, %v1078_v4, %v1082_v7  ;;  %v1274_v17 = vrot.slane %v984_v3, 1  ;;  %v1116_v31 = vshll.u32 %v984_v3, 16 }
 0x191   : > { %1194 = vrot.lane.b32.xlu0 %v1083_v12, %s6186_s28  ;;  %v983_v28 = vsel %vm6568_vm6, %v895_v63, 0 }
 0x192   : > { %v897_v8 = vpop.permute.xlu1 %896  ;;  %v1104_v37 = vshll.u32 %v983_v28, 16  ;;  %v1271_v38 = vrot.slane %v983_v28, 1  ;;  %v1118_v50 = vrot.slane %v1116_v31, 1 }
 0x193   : > { %v6710_v11 = vsel %vm6568_vm6, 0, %v897_v8 }
 0x194   : > { %v1111_v13 = vshll.u32 %v6710_v11, 16  ;;  %v1273_v15 = vrot.slane %v6710_v11, 1  ;;  %v893_v16 = vpop.permute.xlu0 %892  ;;  %v1109_v43 = vshrl.u32 %v6710_v11, 16  ;;  %v1106_v57 = vrot.slane %v1104_v37, 1 }
 0x195   : > { %v6718_v22 = vsel %vm6568_vm6, 0, %v893_v16 }
 0x196   : > { %v1099_v23 = vshll.u32 %v6718_v22, 16  ;;  %v6721_v27 = vpop.permute.xlu1 %2281  ;;  %v1275_v30 = vsel %vm1243_vm8, %v1273_v15, %v1274_v17  ;;  %v1113_v33 = vrot.slane %v1111_v13, 1  ;;  %v1270_v34 = vrot.slane %v6718_v22, 1 }
 0x197   : > { %1311 = vrot.lane.b32.xlu1 %v1275_v30, %s6187_s29  ;;  %v1097_v51 = vshrl.u32 %v6718_v22, 16 }
 0x198   : > { %v6728_v35 = vpop.permute.xlu0 %2279  ;;  %v1101_v46 = vrot.slane %v1099_v23, 1  ;;  %v1272_v52 = vsel %vm1243_vm8, %v1270_v34, %v1271_v38  ;;  %v1114_v54 = vor.u32 %v1113_v33, %v1109_v43 }
 0x199   : > { %1309 = vrot.lane.b32.xlu0 %v1272_v52, %s6187_s29 }
 0x19a   : > { %v907_v48 = vpop.permute.xlu1 %906  ;;  %v1119_v60 = vsel %vm991_vm9, %v1114_v54, %v1118_v50  ;;  %v1102_v62 = vor.u32 %v1101_v46, %v1097_v51 }
 0x19b   : > { %v986_v58 = vsel %vm6568_vm6, %v907_v48, 0  ;;  %1200 = vrot.lane.b32.xlu1 %v1119_v60, %s6186_s28 }
 0x19c   : > { %v903_v55 = vpop.permute.xlu0 %902  ;;  %v1107_v6 = vsel %vm991_vm9, %v1102_v62, %v1106_v57  ;;  %v1280_v10 = vrot.slane %v986_v58, 1  ;;  %v1140_v16 = vshll.u32 %v986_v58, 16 }
 0x19d   : > { %1198 = vrot.lane.b32.xlu0 %v1107_v6, %s6186_s28  ;;  %v985_v13 = vsel %vm6568_vm6, %v903_v55, 0 }
 0x19e   : > { %v905_v1 = vpop.permute.xlu1 %904  ;;  %v1128_v30 = vshll.u32 %v985_v13, 16  ;;  %v1277_v31 = vrot.slane %v985_v13, 1  ;;  %v1142_v38 = vrot.slane %v1140_v16, 1 }
 0x19f   : > { %v6740_v5 = vsel %vm6568_vm6, 0, %v905_v1 }
 0x1a0   : > { %v1135_v63 = vshll.u32 %v6740_v5, 16  ;;  %v1279_v7 = vrot.slane %v6740_v5, 1  ;;  %v901_v3 = vpop.permute.xlu0 %900  ;;  %v1133_v33 = vshrl.u32 %v6740_v5, 16  ;;  %v1130_v51 = vrot.slane %v1128_v30, 1 }
 0x1a1   : > { %v6748_v4 = vsel %vm6568_vm6, 0, %v901_v3 }
 0x1a2   : > { %v1123_v8 = vshll.u32 %v6748_v4, 16  ;;  %v6751_v12 = vpop.permute.xlu1 %2285  ;;  %v1281_v15 = vsel %vm1243_vm8, %v1279_v7, %v1280_v10  ;;  %v1137_v17 = vrot.slane %v1135_v63, 1  ;;  %v1276_v23 = vrot.slane %v6748_v4, 1 }
 0x1a3   : > { %1315 = vrot.lane.b32.xlu1 %v1281_v15, %s6187_s29  ;;  %v1121_v43 = vshrl.u32 %v6748_v4, 16 }
 0x1a4   : > { %v6758_v28 = vpop.permute.xlu0 %2283  ;;  %v1125_v34 = vrot.slane %v1123_v8, 1  ;;  %v1278_v46 = vsel %vm1243_vm8, %v1276_v23, %v1277_v31  ;;  %v1138_v48 = vor.u32 %v1137_v17, %v1133_v33 }
 0x1a5   : > { %1313 = vrot.lane.b32.xlu0 %v1278_v46, %s6187_s29 }
 0x1a6   : > { %v915_v37 = vpop.permute.xlu1 %914  ;;  %v1143_v54 = vsel %vm991_vm9, %v1138_v48, %v1142_v38  ;;  %v1126_v55 = vor.u32 %v1125_v34, %v1121_v43  ;;  %v1628_v48 = vsel %vm1455_vm7, %v6579_v45, 0 }
 0x1a7   : > { %v988_v52 = vsel %vm6568_vm6, %v915_v37, 0  ;;  %1204 = vrot.lane.b32.xlu1 %v1143_v54, %s6186_s28  ;;  %5747 = vmatpush3.bf16.msra.mxu0 %v1628_v48 }
 0x1a8   : > { %v911_v50 = vpop.permute.xlu0 %910  ;;  %v1131_v62 = vsel %vm991_vm9, %v1126_v55, %v1130_v51  ;;  %v1164_v7 = vshll.u32 %v988_v52, 16  ;;  %v1286_v3 = vrot.slane %v988_v52, 1 }
 0x1a9   : > { %v987_v58 = vsel %vm6568_vm6, %v911_v50, 0  ;;  %1202 = vrot.lane.b32.xlu0 %v1131_v62, %s6186_s28 }
 0x1aa   : > { %v913_v57 = vpop.permute.xlu1 %912  ;;  %v1283_v8 = vrot.slane %v987_v58, 1  ;;  %v1152_v23 = vshll.u32 %v987_v58, 16  ;;  %v1166_v43 = vrot.slane %v1164_v7, 1  ;;  %v6801_v58 = vsel %vm956_vm5, 0, %v6572_v42 }
 0x1ab   : > { %v6772_v60 = vsel %vm6568_vm6, 0, %v913_v57 }
 0x1ac   : > { %v1159_v1 = vshll.u32 %v6772_v60, 16  ;;  %v1285_v6 = vrot.slane %v6772_v60, 1  ;;  %v909_v63 = vpop.permute.xlu0 %908  ;;  %v1157_v30 = vshrl.u32 %v6772_v60, 16  ;;  %v1154_v54 = vrot.slane %v1152_v23, 1 }
 0x1ad   : > { %v6780_v10 = vsel %vm6568_vm6, 0, %v909_v63  ;;  %v2342_v23 = vshll.u32 %v6801_v58, 16 }
 0x1ae   : > { %v1161_v13 = vrot.slane %v1159_v1, 1  ;;  %v1147_v15 = vshll.u32 %v6780_v10, 16  ;;  %v1282_v16 = vrot.slane %v6780_v10, 1  ;;  %v923_v17 = vpop.permute.xlu1 %922  ;;  %v1287_v31 = vsel %vm1243_vm8, %v1285_v6, %v1286_v3 }
 0x1af   : > { %v1145_v33 = vshrl.u32 %v6780_v10, 16  ;;  %1319 = vrot.lane.b32.xlu1 %v1287_v31, %s6187_s29  ;;  %v990_v50 = vsel %vm6568_vm6, %v923_v17, 0  ;;  %v6818_v17 = vsel %vm956_vm5, %v6572_v42, 0 }
 0x1b0   : > { %v1149_v34 = vrot.slane %v1147_v15, 1  ;;  %v919_v37 = vpop.permute.xlu0 %918  ;;  %v1284_v38 = vsel %vm1243_vm8, %v1282_v16, %v1283_v8  ;;  %v1162_v46 = vor.u32 %v1161_v13, %v1157_v30  ;;  %v1397_v6 = vshll.u32 %v990_v50, 16 }
 0x1b1   : > { %1317 = vrot.lane.b32.xlu0 %v1284_v38, %s6187_s29  ;;  %v1406_v63 = vrot.slane %v990_v50, 1  ;;  %v989_v8 = vsel %vm6568_vm6, %v919_v37, 0  ;;  %v2346_v48 = vshll.u32 %v6818_v17, 16  ;;  %v2618_v42 = vshrl.u32 %v6818_v17, 16 }
 0x1b2   : > { %v921_v51 = vpop.permute.xlu1 %920  ;;  %v1150_v52 = vor.u32 %v1149_v34, %v1145_v33  ;;  %v1167_v57 = vsel %vm991_vm9, %v1162_v46, %v1166_v43  ;;  %v1399_v37 = vrot.slane %v1397_v6, 1  ;;  %v1176_v38 = vshll.u32 %v989_v8, 16 }
 0x1b3   : > { %v6796_v55 = vsel %vm6568_vm6, 0, %v921_v51  ;;  %1208 = vrot.lane.b32.xlu1 %v1167_v57, %s6186_s28  ;;  %v1289_v43 = vrot.slane %v989_v8, 1  ;;  %v2340_v50 = vshrl.u32 %v6801_v58, 16  ;;  %v6831_v51 = vld [vmem:[%s9340_s3 + $0x10] sm:$0x3f]   ;;  %v2620_v6 = vrot.slane %v2618_v42, 1 }
 0x1b4   : > { %v1392_v62 = vshll.u32 %v6796_v55, 16  ;;  %v1405_v45 = vrot.slane %v6796_v55, 1  ;;  %v917_v1 = vpop.permute.xlu0 %916  ;;  %v1155_v3 = vsel %vm991_vm9, %v1150_v52, %v1154_v54  ;;  %v1390_v13 = vshrl.u32 %v6796_v55, 16 }
 0x1b5   : > { %v6808_v7 = vsel %vm6568_vm6, 0, %v917_v1  ;;  %1206 = vrot.lane.b32.xlu0 %v1155_v3, %s6186_s28  ;;  %v1178_v1 = vrot.slane %v1176_v38, 1  ;;  %v2616_v3 = vrot.slane %v2342_v23, 2  ;;  %v2621_v8 = vrot.slane %v2346_v48, 2 }
 0x1b6   : > { %v1394_v15 = vrot.slane %v1392_v62, 1  ;;  %v1171_v16 = vshll.u32 %v6808_v7, 16  ;;  %v1288_v30 = vrot.slane %v6808_v7, 1  ;;  %v1407_v31 = vsel %vm1243_vm8, %v1405_v45, %v1406_v63 }
 0x1b7   : > { %1408 = vrot.lane.b32.xlu1 %v1407_v31, %s6187_s29  ;;  %v1169_v46 = vshrl.u32 %v6808_v7, 16  ;;  %v2344_v62 = vrot.slane %v2342_v23, 1  ;;  %v1457_v45 = vsel %vm1455_vm7, %v6584_v47, 0  ;;  %v2615_v63 = vrot.slane %v2340_v50, 1 }
 0x1b8   : > { %v1173_v33 = vrot.slane %v1171_v16, 1  ;;  %v1395_v34 = vor.u32 %v1394_v15, %v1390_v13  ;;  %v1290_v54 = vsel %vm1243_vm8, %v1288_v30, %v1289_v43  ;;  %5713 = vmatpush3.bf16.msra.mxu1 %v1457_v45  ;;  %v2538_v15 = vrot.slane %v6801_v58, 1 }
 0x1b9   : > { %6021 = vmatprep.subr.msk.bf16.mxu1 %vm1455_vm7, %v6831_v51  ;;  %v2539_v16 = vrot.slane %v6818_v17, 1  ;;  %v2345_v30 = vor.u32 %v2344_v62, %v2340_v50  ;;  %v6846_v31 = vsel %vm956_vm5, 0, %v6565_v40  ;;  %v6850_v47 = vsel %vm956_vm5, 0, %v6609_v2 }
 0x1ba   : > { %v1400_v52 = vsel %vm991_vm9, %v1395_v34, %v1399_v37  ;;  %v1174_v57 = vor.u32 %v1173_v33, %v1169_v46  ;;  %9376 = vst [vmem:[#allocation7_spill] sm:$0xff] %v6846_v31  ;;  %v2612_v23 = vrot.slane %v6185_v18, 2  ;;  %v2348_v33 = vrot.slane %v2346_v48, 1 }
 0x1bb   : > { %1401 = vrot.lane.b32.xlu0 %v1400_v52, %s6186_s28  ;;  %1321 = vrot.lane.b32.xlu1 %v1290_v54, %s6187_s29  ;;  %v2617_v34 = vor.u32 %v2616_v3, %v2615_v63  ;;  %v2622_v37 = vor.u32 %v2621_v8, %v2620_v6  ;;  %v2352_v38 = vshll.u32 %v6846_v31, 16  ;;  %v2362_v43 = vshll.u32 %v6850_v47, 16 }
 0x1bc   : > { %v1179_v13 = vsel %vm991_vm9, %v1174_v57, %v1178_v1  ;;  %v2540_v46 = vsel %vm1243_vm8, %v2538_v15, %v2539_v16  ;;  %v2349_v42 = vsel %vm991_vm9, %v2345_v30, %v2348_v33  ;;  %v2613_v50 = vor.u32 %v2612_v23, %v6340_v19 }
 0x1bd   : > { %v6865_v18 = vsel %vm956_vm5, %v6565_v40, 0  ;;  %v6869_v48 = vsel %vm956_vm5, %v6609_v2, 0  ;;  %v2623_v52 = vsel %vm2610_vm10, %v2617_v34, %v2622_v37  ;;  %v2774_v54 = vrot.slane %v6801_v58, 2 }
 0x1be   : > { %v2775_v57 = vrot.slane %v6818_v17, 2  ;;  %v2364_v62 = vrot.slane %v2362_v43, 1  ;;  %v2354_v45 = vrot.slane %v2352_v38, 1  ;;  %v2627_v1 = vshrl.u32 %v6865_v18, 16 }
 0x1bf   : > { %2480 = vrot.lane.b32.xlu1 %v6340_v19, %s6190_s25  ;;  %1210 = vrot.lane.b32.xlu0 %v1179_v13, %s6186_s28  ;;  %v2366_v19 = vshll.u32 %v6869_v48, 16  ;;  %v2636_v40 = vshrl.u32 %v6869_v48, 16  ;;  %v2356_v2 = vshll.u32 %v6865_v18, 16  ;;  %v2360_v6 = vshrl.u32 %v6850_v47, 16 }
 0x1c0   : > { %v2350_v63 = vshrl.u32 %v6846_v31, 16  ;;  %v2541_v17 = vrot.slane %v6846_v31, 1  ;;  %v2776_v3 = vsel %vm1455_vm7, %v2774_v54, %v2775_v57  ;;  %v2542_v15 = vrot.slane %v6865_v18, 1 }
 0x1c1   : > { %v2365_v8 = vor.u32 %v2364_v62, %v2360_v6  ;;  %v2629_v16 = vrot.slane %v2627_v1, 1  ;;  %v6887_v30 = vsel %vm956_vm5, 0, %v6606_v61  ;;  %v2638_v33 = vrot.slane %v2636_v40, 1 }
 0x1c2   : > { %v2355_v13 = vor.u32 %v2354_v45, %v2350_v63  ;;  %v2368_v34 = vrot.slane %v2366_v19, 1  ;;  %v6893_v37 = vsel %vm956_vm5, 0, %v6638_v36  ;;  %v2624_v54 = vrot.slane %v2350_v63, 1 }
 0x1c3   : > { %2582 = vrot.lane.b32.xlu1 %v2540_v46, %s6186_s28  ;;  %2482 = vrot.lane.b32.xlu0 %v2349_v42, %s6190_s25  ;;  %v2358_v46 = vrot.slane %v2356_v2, 1  ;;  %v2633_v42 = vrot.slane %v2360_v6, 1  ;;  %v2625_v57 = vrot.slane %v2352_v38, 2  ;;  %v2630_v62 = vrot.slane %v2356_v2, 2 }
 0x1c4   : > { %v2369_v45 = vsel %vm991_vm9, %v2365_v8, %v2368_v34  ;;  %v2544_v40 = vrot.slane %v6850_v47, 1  ;;  %v6903_v6 = vsel %vm956_vm5, %v6606_v61, 0  ;;  %v2382_v38 = vshll.u32 %v6893_v37, 16 }
 0x1c5   : > { %v2359_v1 = vsel %vm991_vm9, %v2355_v13, %v2358_v46  ;;  %v2626_v63 = vor.u32 %v2625_v57, %v2624_v54  ;;  %v2543_v13 = vsel %vm1243_vm8, %v2541_v17, %v2542_v15  ;;  %v2376_v34 = vshll.u32 %v6903_v6, 16 }
 0x1c6   : > { %v6914_v61 = vsel %vm956_vm5, %v6638_v36, 0  ;;  %v2781_v17 = vrot.slane %v6869_v48, 2  ;;  %v2777_v15 = vrot.slane %v6846_v31, 2  ;;  %v2645_v54 = vshrl.u32 %v6903_v6, 16 }
 0x1c7   : > { %2743 = vrot.lane.b32.xlu1 %v2623_v52, %s6191_s26  ;;  %2741 = vrot.lane.b32.xlu0 %v2613_v50, %s6191_s26  ;;  %v2634_v50 = vrot.slane %v2362_v43, 2  ;;  %v2639_v52 = vrot.slane %v2366_v19, 2  ;;  %v2372_v43 = vshll.u32 %v6887_v30, 16  ;;  %v2386_v57 = vshll.u32 %v6914_v61, 16 }
 0x1c8   : > { %v2380_v36 = vshrl.u32 %v6893_v37, 16 }
 0x1c9   : > { %v2635_v19 = vor.u32 %v2634_v50, %v2633_v42  ;;  %v2640_v2 = vor.u32 %v2639_v52, %v2638_v33  ;;  %v2384_v42 = vrot.slane %v2382_v38, 1  ;;  %v2780_v50 = vrot.slane %v6850_v47, 2 }
 0x1ca   : > { %v2778_v52 = vrot.slane %v6865_v18, 2  ;;  %v2548_v18 = vrot.slane %v6903_v6, 1  ;;  %v2657_v41 = vrot.slane %v2386_v57, 2  ;;  %v2643_v26 = vrot.slane %v2372_v43, 2 }
 0x1cb   : > { %2818 = vrot.lane.b32.xlu1 %v2776_v3, %s6187_s29  ;;  %2816 = vrot.lane.b32.xlu0 %v2612_v23, %s6187_s29  ;;  %v2545_v23 = vrot.slane %v6869_v48, 1  ;;  %v2631_v3 = vor.u32 %v2630_v62, %v2629_v16  ;;  %v2641_v46 = vsel %vm2610_vm10, %v2635_v19, %v2640_v2  ;;  %v2374_v16 = vrot.slane %v2372_v43, 1  ;;  %v6929_v48 = vpop.permute.xlu0 %2287 }
 0x1cc   : > { %v2370_v62 = vshrl.u32 %v6887_v30, 16  ;;  %v2782_v19 = vsel %vm1455_vm7, %v2780_v50, %v2781_v17  ;;  %v2779_v2 = vsel %vm1455_vm7, %v2777_v15, %v2778_v52  ;;  %v2547_v52 = vrot.slane %v6887_v30, 1 }
 0x1cd   : > { %v2546_v8 = vsel %vm1243_vm8, %v2544_v40, %v2545_v23  ;;  %v2632_v33 = vsel %vm2610_vm10, %v2626_v63, %v2631_v3  ;;  %v2385_v40 = vor.u32 %v2384_v42, %v2380_v36  ;;  %v2647_v63 = vrot.slane %v2645_v54, 1 }
 0x1ce   : > { %v2375_v23 = vor.u32 %v2374_v16, %v2370_v62  ;;  %v2648_v3 = vrot.slane %v2376_v34, 2  ;;  %v2550_v42 = vrot.slane %v6893_v37, 1  ;;  %v6940_v16 = vsel %vm956_vm5, 0, %v6668_v9 }
 0x1cf   : > { %2486 = vrot.lane.b32.xlu1 %v2369_v45, %s6190_s25  ;;  %2484 = vrot.lane.b32.xlu0 %v2359_v1, %s6190_s25  ;;  %v2654_v45 = vshrl.u32 %v6914_v61, 16 }
 0x1d0   : > { %v2649_v31 = vor.u32 %v2648_v3, %v2647_v63  ;;  %v2787_v63 = vrot.slane %v6914_v61, 2  ;;  %v6983_v3 = vsel %vm956_vm5, %v6668_v9, 0 }
 0x1d3   : > { %2586 = vrot.lane.b32.xlu1 %v2546_v8, %s6186_s28  ;;  %2584 = vrot.lane.b32.xlu0 %v2543_v13, %s6186_s28  ;;  %v2388_v8 = vrot.slane %v2386_v57, 1  ;;  %v2378_v13 = vrot.slane %v2376_v34, 1  ;;  %v2652_v34 = vrot.slane %v2382_v38, 2  ;;  %v6102_v57 = vld [vmem:[%s9342_s5 + $0x8] sm:$0x1f]   ;;  %v2402_v38 = vshll.u32 %v6940_v16, 16 }
 0x1d4   : > { %6022 = vmatprep.subr.msk.bf16.mxu0 %vm3054_vm11, %v6102_v57 }
 0x1d5   : > { %v2389_v17 = vsel %vm991_vm9, %v2385_v40, %v2388_v8  ;;  %v2379_v15 = vsel %vm991_vm9, %v2375_v23, %v2378_v13  ;;  %v6956_v40 = vsel %vm956_vm5, %v6634_v29, 0  ;;  %v2549_v23 = vsel %vm1243_vm8, %v2547_v52, %v2548_v18 }
 0x1d6   : > { %v2396_v18 = vshll.u32 %v6956_v40, 16  ;;  %v2663_v9 = vshrl.u32 %v6956_v40, 16  ;;  %v2400_v52 = vshrl.u32 %v6940_v16, 16 }
 0x1d7   : > { %2747 = vrot.lane.b32.xlu1 %v2641_v46, %s6191_s26  ;;  %2745 = vrot.lane.b32.xlu0 %v2632_v33, %s6191_s26  ;;  %v1296_v1 = vpop.permute.xlu1 %1295  ;;  %v2551_v46 = vrot.slane %v6914_v61, 1  ;;  %v2656_v33 = vrot.slane %v2654_v45, 1  ;;  %v6952_v45 = vsel %vm956_vm5, 0, %v6634_v29  ;;  %v2404_v61 = vrot.slane %v2402_v38, 1 }
 0x1d8   : > { %v2392_v29 = vshll.u32 %v6952_v45, 16 }
 0x1d9   : > { %v2552_v43 = vsel %vm1243_vm8, %v2550_v42, %v2551_v46  ;;  %v2658_v8 = vor.u32 %v2657_v41, %v2656_v33  ;;  %v1800_v41 = vsel %vm1455_vm7, %v6831_v51, 0  ;;  %v2786_v51 = vrot.slane %v6893_v37, 2 }
 0x1da   : > { %v2783_v42 = vrot.slane %v6887_v30, 2 }
 0x1db   : > { %2822 = vrot.lane.b32.xlu1 %v2782_v19, %s6187_s29  ;;  %2820 = vrot.lane.b32.xlu0 %v2779_v2, %s6187_s29  ;;  %v1294_v50 = vpop.permute.xlu0 %1293  ;;  %v1185_v54 = vpop.permute.xlu1 %1184  ;;  %v2651_v19 = vrot.slane %v2380_v36, 1  ;;  %v2642_v2 = vrot.slane %v2370_v62, 1 }
 0x1dc   : > { %v1328_v36 = vsel %vm453_vm1, %v6588_v49, %v1185_v54  ;;  %v3056_v49 = vsel %vm3054_vm11, %v6102_v57, 0  ;;  %v2406_v54 = vshll.u32 %v6983_v3, 16  ;;  %v2666_v57 = vrot.slane %v2396_v18, 2 }
 0x1df   : > { %2490 = vrot.lane.b32.xlu1 %v2389_v17, %s6190_s25  ;;  %2488 = vrot.lane.b32.xlu0 %v2379_v15, %s6190_s25  ;;  %v1183_v62 = vpop.permute.xlu0 %1182  ;;  %v2653_v17 = vor.u32 %v2652_v34, %v2651_v19  ;;  %v2644_v15 = vor.u32 %v2643_v26, %v2642_v2  ;;  %v6977_v26 = vsel %vm715_vm2, %v1328_v36, %v1296_v1  ;;  %v2390_v34 = vshrl.u32 %v6952_v45, 16 }
 0x1e0   : > { %v1326_v13 = vsel %vm453_vm1, %v6602_v59, %v1183_v62  ;;  %v2784_v59 = vrot.slane %v6903_v6, 2  ;;  %v2554_v2 = vrot.slane %v6956_v40, 1  ;;  %v2405_v62 = vor.u32 %v2404_v61, %v2400_v52 }
 0x1e1   : > { %v1358_v46 = vsel %vm715_vm2, %v1326_v13, %v1294_v50  ;;  %v2659_v1 = vsel %vm2610_vm10, %v2653_v17, %v2658_v8  ;;  %v2650_v33 = vsel %vm2610_vm10, %v2644_v15, %v2649_v31  ;;  %v2394_v50 = vrot.slane %v2392_v29, 1 }
 0x1e2   : > { %5714 = vmatprep.mubr.msk.bf16.mxu1 %vm1422_vm3, %v1358_v46  ;;  %5749 = vmatmul.mubr.msk.bf16.vlgmr.msra.gmra.mxu0 %vm1422_vm3, %v1358_v46  ;;  %v2672_v31 = vshrl.u32 %v6983_v3, 16  ;;  %v2785_v36 = vsel %vm1455_vm7, %v2783_v42, %v2784_v59  ;;  %v7007_v8 = vsel %vm956_vm5, 0, %v6661_v24  ;;  %v2557_v13 = vrot.slane %v6983_v3, 1 }
 0x1e3   : > { %2590 = vrot.lane.b32.xlu1 %v2552_v43, %s6186_s28  ;;  %2588 = vrot.lane.b32.xlu0 %v2549_v23, %s6186_s28  ;;  %v2788_v43 = vsel %vm1455_vm7, %v2786_v51, %v2787_v63  ;;  %v2665_v23 = vrot.slane %v2663_v9, 1  ;;  %v2395_v17 = vor.u32 %v2394_v50, %v2390_v34  ;;  %v2675_v46 = vrot.slane %v2406_v54, 2 }
 0x1e4   : > { %5715 = vmatmul.mubr.msk.bf16.vlgmr.msra.gmra.mxu1 %vm1422_vm3, %v6977_v26  ;;  %5752 = vmatprep.mubr.msk.bf16.mxu0 %vm1422_vm3, %v6977_v26  ;;  %v2674_v15 = vrot.slane %v2672_v31, 1  ;;  %v2408_v63 = vrot.slane %v2406_v54, 1  ;;  %v2556_v42 = vrot.slane %v6940_v16, 1  ;;  %v2553_v50 = vrot.slane %v6952_v45, 1 }
 0x1e5   : > { %v1300_v6 = vpop.permute.xlu1 %1299  ;;  %5781 = vmatpush3.bf16.msra.mxu1 %v1800_v41  ;;  %5815 = vmatpush3.bf16.msra.mxu0 %v3056_v49  ;;  %v7014_v41 = vsel %vm956_vm5, 0, %v6698_v53  ;;  %v2669_v31 = vrot.slane %v2400_v52, 1  ;;  %v2661_v54 = vrot.slane %v2392_v29, 2  ;;  %v7040_v52 = vsel %vm956_vm5, %v6661_v24, 0 }
 0x1e6   : > { %v2409_v9 = vsel %vm991_vm9, %v2405_v62, %v2408_v63  ;;  %v2422_v29 = vshll.u32 %v7014_v41, 16  ;;  %v2667_v24 = vor.u32 %v2666_v57, %v2665_v23  ;;  %v7056_v63 = vsel %vm956_vm5, %v6698_v53, 0 }
 0x1e7   : > { %2751 = vrot.lane.b32.xlu1 %v2659_v1, %s6191_s26  ;;  %2749 = vrot.lane.b32.xlu0 %v2650_v33, %s6191_s26  ;;  %v1298_v19 = vpop.permute.xlu0 %1297  ;;  %v2398_v33 = vrot.slane %v2396_v18, 1  ;;  %v2660_v18 = vrot.slane %v2390_v34, 1  ;;  %v2789_v57 = vrot.slane %v6952_v45, 2  ;;  %v2426_v53 = vshll.u32 %v7056_v63, 16 }
 0x1e9   : > { %v1189_v49 = vpop.permute.xlu1 %1188 }
 0x1ea   : > { %v1332_v51 = vsel %vm453_vm1, %v6621_v14, %v1189_v49  ;;  %v2399_v14 = vsel %vm991_vm9, %v2395_v17, %v2398_v33  ;;  %v2662_v17 = vor.u32 %v2661_v54, %v2660_v18  ;;  %v2790_v49 = vrot.slane %v6956_v40, 2 }
 0x1eb   : > { %2826 = vrot.lane.b32.xlu1 %v2788_v43, %s6187_s29  ;;  %2824 = vrot.lane.b32.xlu0 %v2785_v36, %s6187_s29  ;;  %v1187_v59 = vpop.permute.xlu0 %1186  ;;  %v2558_v43 = vsel %vm1243_vm8, %v2556_v42, %v2557_v13  ;;  %v2676_v36 = vor.u32 %v2675_v46, %v2674_v15  ;;  %v2681_v13 = vshrl.u32 %v7040_v52, 16  ;;  %v2793_v15 = vrot.slane %v6983_v3, 2 }
 0x1ec   : > { %v1330_v1 = vsel %vm453_vm1, %v6630_v25, %v1187_v59  ;;  %v2670_v25 = vrot.slane %v2402_v38, 2  ;;  %v2412_v38 = vshll.u32 %v7007_v8, 16  ;;  %v2416_v59 = vshll.u32 %v7040_v52, 16 }
 0x1ed   : > { %v7022_v61 = vsel %vm715_vm2, %v1330_v1, %v1298_v19  ;;  %v7036_v19 = vsel %vm715_vm2, %v1332_v51, %v1300_v6  ;;  %v2555_v6 = vsel %vm1243_vm8, %v2553_v50, %v2554_v2  ;;  %v2792_v46 = vrot.slane %v6940_v16, 2 }
 0x1ee   : > { %5718 = vmatprep.mubr.msk.bf16.mxu1 %vm1422_vm3, %v7022_v61  ;;  %5753 = vmatmul.mubr.msk.bf16.gmra.mxu0 %vm1422_vm3, %v7022_v61  ;;  %v2671_v62 = vor.u32 %v2670_v25, %v2669_v31  ;;  %v2668_v51 = vsel %vm2610_vm10, %v2662_v17, %v2667_v24  ;;  %v2424_v40 = vrot.slane %v2422_v29, 1  ;;  %v2414_v1 = vrot.slane %v2412_v38, 1  ;;  %v7088_v24 = vld [vmem:[%s9342_s5] sm:$0x1f]  }
 0x1ef   : > { %2494 = vrot.lane.b32.xlu1 %v2409_v9, %s6190_s25  ;;  %2492 = vrot.lane.b32.xlu0 %v2399_v14, %s6190_s25  ;;  %v2690_v33 = vshrl.u32 %v7056_v63, 16  ;;  %v2410_v3 = vshrl.u32 %v7007_v8, 16  ;;  %v2560_v9 = vrot.slane %v7040_v52, 1  ;;  %v7072_v50 = vrot.slane %v2416_v59, 2 }
 0x1f0   : > { %5719 = vmatmul.mubr.msk.bf16.gmra.mxu1 %vm1422_vm3, %v7036_v19  ;;  %5756 = vmatprep.mubr.msk.bf16.mxu0 %vm1422_vm3, %v7036_v19  ;;  %v2677_v23 = vsel %vm2610_vm10, %v2671_v62, %v2676_v36  ;;  %v2420_v31 = vshrl.u32 %v7014_v41, 16  ;;  %v2683_v14 = vrot.slane %v2681_v13, 1  ;;  %v7077_v25 = vsel %vm956_vm5, 0, %v6691_v44 }
 0x1f1   : > { %v1304_v34 = vpop.permute.xlu1 %1303  ;;  %v2415_v17 = vor.u32 %v2414_v1, %v2410_v3  ;;  %v2563_v13 = vrot.slane %v7056_v63, 1  ;;  %6023 = vmatprep.subr.msk.bf16.mxu1 %vm3054_vm11, %v7088_v24 }
 0x1f2   : > { %v2425_v62 = vor.u32 %v2424_v40, %v2420_v31  ;;  %v2559_v40 = vrot.slane %v7007_v8, 1  ;;  %v2687_v1 = vrot.slane %v2420_v31, 1 }
 0x1f3   : > { %2594 = vrot.lane.b32.xlu1 %v2558_v43, %s6186_s28  ;;  %2592 = vrot.lane.b32.xlu0 %v2555_v6, %s6186_s28  ;;  %v1302_v2 = vpop.permute.xlu0 %1301  ;;  %v2794_v43 = vsel %vm1455_vm7, %v2792_v46, %v2793_v15  ;;  %v2791_v6 = vsel %vm1455_vm7, %v2789_v57, %v2790_v49  ;;  %v2428_v15 = vrot.slane %v2426_v53, 1  ;;  %v2562_v57 = vrot.slane %v7014_v41, 1 }
 0x1f5   : > { %v1193_v42 = vpop.permute.xlu1 %1192 }
 0x1f6   : > { %v1336_v18 = vsel %vm453_vm1, %v6652_v56, %v1193_v42  ;;  %v2429_v42 = vsel %vm991_vm9, %v2425_v62, %v2428_v15  ;;  %v2685_v62 = vor.u32 %v7072_v50, %v2683_v14  ;;  %v2798_v50 = vrot.slane %v7014_v41, 2 }
 0x1f7   : > { %2755 = vrot.lane.b32.xlu1 %v2677_v23, %s6191_s26  ;;  %2753 = vrot.lane.b32.xlu0 %v2668_v51, %s6191_s26  ;;  %v1191_v54 = vpop.permute.xlu0 %1190  ;;  %v2692_v23 = vrot.slane %v2690_v33, 1  ;;  %v2693_v51 = vrot.slane %v2426_v53, 2  ;;  %v7105_v49 = vsel %vm715_vm2, %v1336_v18, %v1304_v34  ;;  %v2688_v33 = vrot.slane %v2422_v29, 2 }
 0x1f8   : > { %v1334_v36 = vsel %vm453_vm1, %v6658_v0, %v1191_v54  ;;  %v7098_v0 = vsel %vm956_vm5, 0, %v6728_v35  ;;  %v2678_v18 = vrot.slane %v2410_v3, 1  ;;  %v7123_v53 = vsel %vm956_vm5, %v6691_v44, 0 }
 0x1f9   : > { %v7092_v56 = vsel %vm715_vm2, %v1334_v36, %v1302_v2  ;;  %v2418_v2 = vrot.slane %v2416_v59, 1  ;;  %v2679_v59 = vrot.slane %v2412_v38, 2  ;;  %v2432_v29 = vshll.u32 %v7077_v25, 16 }
 0x1fa   : > { %5722 = vmatprep.mubr.msk.bf16.mxu1 %vm1422_vm3, %v7092_v56  ;;  %5757 = vmatmul.mubr.msk.bf16.gmra.mxu0 %vm1422_vm3, %v7092_v56  ;;  %v2442_v31 = vshll.u32 %v7098_v0, 16  ;;  %v2564_v3 = vsel %vm1243_vm8, %v2562_v57, %v2563_v13  ;;  %v2561_v38 = vsel %vm1243_vm8, %v2559_v40, %v2560_v9  ;;  %v2689_v36 = vor.u32 %v2688_v33, %v2687_v1 }
 0x1fb   : > { %2830 = vrot.lane.b32.xlu1 %v2794_v43, %s6187_s29  ;;  %2828 = vrot.lane.b32.xlu0 %v2791_v6, %s6187_s29  ;;  %v2419_v34 = vsel %vm991_vm9, %v2415_v17, %v2418_v2  ;;  %v2694_v43 = vor.u32 %v2693_v51, %v2692_v23  ;;  %v2680_v6 = vor.u32 %v2679_v59, %v2678_v18  ;;  %v2796_v44 = vrot.slane %v7040_v52, 2 }
 0x1fc   : > { %5723 = vmatmul.mubr.msk.bf16.gmra.mxu1 %vm1422_vm3, %v7105_v49  ;;  %5760 = vmatprep.mubr.msk.bf16.mxu0 %vm1422_vm3, %v7105_v49  ;;  %v2436_v15 = vshll.u32 %v7123_v53, 16  ;;  %v2799_v2 = vrot.slane %v7056_v63, 2  ;;  %v7137_v13 = vsel %vm956_vm5, %v6728_v35, 0  ;;  %v2795_v14 = vrot.slane %v7007_v8, 2 }
 0x1fd   : > { %v1308_v46 = vpop.permute.xlu1 %1307  ;;  %v2444_v51 = vrot.slane %v2442_v31, 1  ;;  %v2695_v57 = vsel %vm2610_vm10, %v2689_v36, %v2694_v43  ;;  %v2686_v63 = vsel %vm2610_vm10, %v2680_v6, %v2685_v62  ;;  %v2434_v40 = vrot.slane %v2432_v29, 1 }
 0x1fe   : > { %v2699_v35 = vshrl.u32 %v7123_v53, 16  ;;  %v2440_v1 = vshrl.u32 %v7098_v0, 16  ;;  %v2566_v18 = vrot.slane %v7123_v53, 1  ;;  %v2800_v43 = vsel %vm1455_vm7, %v2798_v50, %v2799_v2 }
 0x1ff   : > { %2498 = vrot.lane.b32.xlu1 %v2429_v42, %s6190_s25  ;;  %2496 = vrot.lane.b32.xlu0 %v2419_v34, %s6190_s25  ;;  %v1306_v54 = vpop.permute.xlu0 %1305  ;;  %v2708_v42 = vshrl.u32 %v7137_v13, 16  ;;  %v2569_v62 = vrot.slane %v7137_v13, 1  ;;  %v7180_v2 = vsel %vm956_vm5, 0, %v6758_v28 }
 0x200   : > { %v2701_v6 = vrot.slane %v2699_v35, 1 }
 0x201   : > { %v1197_v17 = vpop.permute.xlu1 %1196 }
 0x202   : > { %v1340_v9 = vsel %vm453_vm1, %v6680_v32, %v1197_v17  ;;  %v2446_v32 = vshll.u32 %v7137_v13, 16 }
 0x203   : > { %2598 = vrot.lane.b32.xlu1 %v2564_v3, %s6186_s28  ;;  %2596 = vrot.lane.b32.xlu0 %v2561_v38, %s6186_s28  ;;  %v1195_v23 = vpop.permute.xlu0 %1194  ;;  %v7162_v34 = vsel %vm715_vm2, %v1340_v9, %v1308_v46  ;;  %v2702_v3 = vrot.slane %v2436_v15, 2  ;;  %v2797_v38 = vsel %vm1455_vm7, %v2795_v14, %v2796_v44  ;;  %v7173_v46 = vsel %vm956_vm5, 0, %v6721_v27 }
 0x204   : > { %v1338_v52 = vsel %vm453_vm1, %v6688_v39, %v1195_v23  ;;  %v2430_v39 = vshrl.u32 %v7077_v25, 16  ;;  %v2448_v17 = vrot.slane %v2446_v32, 1  ;;  %v2710_v9 = vrot.slane %v2708_v42, 1 }
 0x205   : > { %v7151_v33 = vsel %vm715_vm2, %v1338_v52, %v1306_v54  ;;  %v2445_v54 = vor.u32 %v2444_v51, %v2440_v1  ;;  %v2711_v23 = vrot.slane %v2446_v32, 2  ;;  %v2438_v44 = vrot.slane %v2436_v15, 1 }
 0x206   : > { %5726 = vmatprep.mubr.msk.bf16.mxu1 %vm1422_vm3, %v7151_v33  ;;  %5761 = vmatmul.mubr.msk.bf16.gmra.mxu0 %vm1422_vm3, %v7151_v33  ;;  %v2435_v36 = vor.u32 %v2434_v40, %v2430_v39  ;;  %v2568_v51 = vrot.slane %v7098_v0, 1  ;;  %v2565_v52 = vrot.slane %v7077_v25, 1  ;;  %v2706_v40 = vrot.slane %v2442_v31, 2 }
 0x207   : > { %2759 = vrot.lane.b32.xlu1 %v2695_v57, %s6191_s26  ;;  %2757 = vrot.lane.b32.xlu0 %v2686_v63, %s6191_s26  ;;  %v2449_v14 = vsel %vm991_vm9, %v2445_v54, %v2448_v17  ;;  %v2705_v57 = vrot.slane %v2440_v1, 1  ;;  %v2696_v35 = vrot.slane %v2430_v39, 1  ;;  %v7190_v15 = vsel %vm956_vm5, %v6721_v27, 0 }
 0x208   : > { %5727 = vmatmul.mubr.msk.bf16.gmra.mxu1 %vm1422_vm3, %v7162_v34  ;;  %5764 = vmatprep.mubr.msk.bf16.mxu0 %vm1422_vm3, %v7162_v34  ;;  %v2439_v63 = vsel %vm991_vm9, %v2435_v36, %v2438_v44  ;;  %v2452_v32 = vshll.u32 %v7173_v46, 16  ;;  %v2462_v54 = vshll.u32 %v7180_v2, 16  ;;  %v2570_v31 = vsel %vm1243_vm8, %v2568_v51, %v2569_v62 }
 0x209   : > { %v1312_v59 = vpop.permute.xlu1 %1311  ;;  %v2712_v39 = vor.u32 %v2711_v23, %v2710_v9  ;;  %v2707_v17 = vor.u32 %v2706_v40, %v2705_v57  ;;  %v2703_v27 = vor.u32 %v2702_v3, %v2701_v6  ;;  %v2456_v62 = vshll.u32 %v7190_v15, 16 }
 0x20a   : > { %v2717_v3 = vshrl.u32 %v7190_v15, 16  ;;  %v2805_v6 = vrot.slane %v7137_v13, 2  ;;  %v2464_v9 = vrot.slane %v2462_v54, 1  ;;  %v2454_v51 = vrot.slane %v2452_v32, 1 }
 0x20b   : > { %2834 = vrot.lane.b32.xlu1 %v2800_v43, %s6187_s29  ;;  %2832 = vrot.lane.b32.xlu0 %v2797_v38, %s6187_s29  ;;  %v1310_v50 = vpop.permute.xlu0 %1309  ;;  %v2697_v43 = vrot.slane %v2432_v29, 2  ;;  %v2567_v29 = vsel %vm1243_vm8, %v2565_v52, %v2566_v18  ;;  %v7209_v18 = vsel %vm956_vm5, %v6758_v28, 0  ;;  %v2713_v23 = vsel %vm2610_vm10, %v2707_v17, %v2712_v39 }
 0x20c   : > { %v2460_v13 = vshrl.u32 %v7180_v2, 16  ;;  %v2466_v52 = vshll.u32 %v7209_v18, 16  ;;  %v2726_v57 = vshrl.u32 %v7209_v18, 16  ;;  %v2572_v40 = vrot.slane %v7190_v15, 1 }
 0x20d   : > { %v1201_v42 = vpop.permute.xlu1 %1200  ;;  %v2698_v44 = vor.u32 %v2697_v43, %v2696_v35  ;;  %v2720_v35 = vrot.slane %v2456_v62, 2  ;;  %v7241_v39 = vsel %vm956_vm5, 0, %v6751_v12 }
 0x20e   : > { %v1344_v1 = vsel %vm453_vm1, %v6710_v11, %v1201_v42  ;;  %v2802_v11 = vrot.slane %v7123_v53, 2  ;;  %v2804_v53 = vrot.slane %v7098_v0, 2  ;;  %v2465_v42 = vor.u32 %v2464_v9, %v2460_v13 }
 0x20f   : > { %2502 = vrot.lane.b32.xlu1 %v2449_v14, %s6190_s25  ;;  %2500 = vrot.lane.b32.xlu0 %v2439_v63, %s6190_s25  ;;  %v1199_v38 = vpop.permute.xlu0 %1198  ;;  %v2450_v63 = vshrl.u32 %v7173_v46, 16  ;;  %v2728_v17 = vrot.slane %v2726_v57, 1  ;;  %v2729_v9 = vrot.slane %v2466_v52, 2 }
 0x210   : > { %v1342_v36 = vsel %vm453_vm1, %v6718_v22, %v1199_v38  ;;  %v7216_v22 = vsel %vm715_vm2, %v1344_v1, %v1312_v59  ;;  %v2801_v59 = vrot.slane %v7077_v25, 2  ;;  %v2719_v1 = vrot.slane %v2717_v3, 1 }
 0x211   : > { %v7201_v14 = vsel %vm715_vm2, %v1342_v36, %v1310_v50  ;;  %v2704_v50 = vsel %vm2610_vm10, %v2698_v44, %v2703_v27  ;;  %v2806_v38 = vsel %vm1455_vm7, %v2804_v53, %v2805_v6  ;;  %v2575_v36 = vrot.slane %v7209_v18, 1 }
 0x212   : > { %5730 = vmatprep.mubr.msk.bf16.mxu1 %vm1422_vm3, %v7201_v14  ;;  %5765 = vmatmul.mubr.msk.bf16.gmra.mxu0 %vm1422_vm3, %v7201_v14  ;;  %v2468_v27 = vrot.slane %v2466_v52, 1  ;;  %v2458_v3 = vrot.slane %v2456_v62, 1  ;;  %v2574_v6 = vrot.slane %v7180_v2, 1  ;;  %v2715_v62 = vrot.slane %v2452_v32, 2 }
 0x213   : > { %2602 = vrot.lane.b32.xlu1 %v2570_v31, %s6186_s28  ;;  %2600 = vrot.lane.b32.xlu0 %v2567_v29, %s6186_s28  ;;  %v2803_v31 = vsel %vm1455_vm7, %v2801_v59, %v2802_v11  ;;  %v2455_v29 = vor.u32 %v2454_v51, %v2450_v63  ;;  %v2571_v11 = vrot.slane %v7173_v46, 1  ;;  %v2723_v59 = vrot.slane %v2460_v13, 1 }
 0x214   : > { %5731 = vmatmul.mubr.msk.bf16.gmra.mxu1 %vm1422_vm3, %v7216_v22  ;;  %5768 = vmatprep.mubr.msk.bf16.mxu0 %vm1422_vm3, %v7216_v22  ;;  %v2724_v51 = vrot.slane %v2462_v54, 2  ;;  %v2472_v54 = vshll.u32 %v7241_v39, 16  ;;  %v7271_v32 = vsel %vm956_vm5, 0, %v6929_v48  ;;  %v2576_v13 = vsel %vm1243_vm8, %v2574_v6, %v2575_v36 }
 0x215   : > { %v1316_v28 = vpop.permute.xlu1 %1315  ;;  %v2811_v36 = vrot.slane %v7209_v18, 2 }
 0x217   : > { %2763 = vrot.lane.b32.xlu1 %v2713_v23, %s6191_s26  ;;  %2761 = vrot.lane.b32.xlu0 %v2704_v50, %s6191_s26  ;;  %v1314_v43 = vpop.permute.xlu0 %1313  ;;  %v2469_v50 = vsel %vm991_vm9, %v2465_v42, %v2468_v27  ;;  %v2725_v42 = vor.u32 %v2724_v51, %v2723_v59  ;;  %v2808_v27 = vrot.slane %v7190_v15, 2 }
 0x219   : > { %v1205_v44 = vpop.permute.xlu1 %1204 }
 0x21a   : > { %v1348_v53 = vsel %vm453_vm1, %v6740_v5, %v1205_v44  ;;  %v2721_v44 = vor.u32 %v2720_v35, %v2719_v1 }
 0x21b   : > { %2838 = vrot.lane.b32.xlu1 %v2806_v38, %s6187_s29  ;;  %2836 = vrot.lane.b32.xlu0 %v2803_v31, %s6187_s29  ;;  %v1203_v23 = vpop.permute.xlu0 %1202  ;;  %v2459_v38 = vsel %vm991_vm9, %v2455_v29, %v2458_v3  ;;  %v2714_v31 = vrot.slane %v2450_v63, 1  ;;  %v7266_v5 = vsel %vm715_vm2, %v1348_v53, %v1316_v28  ;;  %v2573_v28 = vsel %vm1243_vm8, %v2571_v11, %v2572_v40 }
 0x21c   : > { %v1346_v57 = vsel %vm453_vm1, %v6748_v4, %v1203_v23  ;;  %v7284_v3 = vsel %vm956_vm5, %v6751_v12, 0  ;;  %v2810_v40 = vrot.slane %v7180_v2, 2  ;;  %v2474_v11 = vrot.slane %v2472_v54, 1 }
 0x21d   : > { %v7257_v52 = vsel %vm715_vm2, %v1346_v57, %v1314_v43  ;;  %v2730_v43 = vor.u32 %v2729_v9, %v2728_v17  ;;  %v2716_v29 = vor.u32 %v2715_v62, %v2714_v31  ;;  %v2972_v17 = vshll.u32 %v7271_v32, 16 }
 0x21e   : > { %5734 = vmatprep.mubr.msk.bf16.mxu1 %vm1422_vm3, %v7257_v52  ;;  %5769 = vmatmul.mubr.msk.bf16.gmra.mxu0 %vm1422_vm3, %v7257_v52  ;;  %v2807_v9 = vrot.slane %v7173_v46, 2  ;;  %v2476_v12 = vshll.u32 %v7284_v3, 16  ;;  %v2470_v23 = vshrl.u32 %v7241_v39, 16  ;;  %v2578_v62 = vrot.slane %v7284_v3, 1 }
 0x21f   : > { %2506 = vrot.lane.b32.xlu1 %v2469_v50, %s6190_s25  ;;  %2504 = vrot.lane.b32.xlu0 %v2459_v38, %s6190_s25  ;;  %v2731_v1 = vsel %vm2610_vm10, %v2725_v42, %v2730_v43  ;;  %v2722_v15 = vsel %vm2610_vm10, %v2716_v29, %v2721_v44  ;;  %v2735_v50 = vshrl.u32 %v7284_v3, 16  ;;  %v2974_v57 = vrot.slane %v2972_v17, 1  ;;  %v7329_v43 = vld [vmem:[%s9342_s5 + $0x10] sm:$0x1f]  }
 0x220   : > { %5735 = vmatmul.mubr.msk.bf16.gmra.mxu1 %vm1422_vm3, %v7266_v5  ;;  %5772 = vmatprep.mubr.msk.bf16.mxu0 %vm1422_vm3, %v7266_v5  ;;  %v2812_v38 = vsel %vm1455_vm7, %v2810_v40, %v2811_v36  ;;  %v2809_v31 = vsel %vm1455_vm7, %v2807_v9, %v2808_v27  ;;  %v2478_v27 = vrot.slane %v2476_v12, 1  ;;  %v2258_v36 = vrot.slane %v6551_v20, 7 }
 0x221   : > { %v1320_v4 = vpop.permute.xlu1 %1319  ;;  %6024 = vmatprep.subr.msk.bf16.mxu0 %vm3054_vm11, %v7329_v43 }
 0x223   : > { %v1318_v63 = vpop.permute.xlu0 %1317  ;;  %2606 = vrot.lane.b32.xlu1 %v2576_v13, %s6186_s28  ;;  %2604 = vrot.lane.b32.xlu0 %v2573_v28, %s6186_s28  ;;  %v2738_v13 = vrot.slane %v2476_v12, 2  ;;  %v2737_v28 = vrot.slane %v2735_v50, 1 }
 0x225   : > { %v1209_v53 = vpop.permute.xlu1 %1208 }
 0x226   : > { %v1352_v35 = vsel %vm453_vm1, %v6772_v60, %v1209_v53  ;;  %v7303_v60 = vsel %vm956_vm5, %v6929_v48, 0  ;;  %v2475_v48 = vor.u32 %v2474_v11, %v2470_v23  ;;  %v2577_v53 = vrot.slane %v7241_v39, 1 }
 0x227   : > { %v1207_v6 = vpop.permute.xlu0 %1206  ;;  %2767 = vrot.lane.b32.xlu1 %v2731_v1, %s6191_s26  ;;  %2765 = vrot.lane.b32.xlu0 %v2722_v15, %s6191_s26  ;;  %v2992_v42 = vshrl.u32 %v7303_v60, 16  ;;  %v2733_v1 = vrot.slane %v2472_v54, 2  ;;  %v2985_v15 = vrot.slane %v7303_v60, 1 }
 0x228   : > { %v1350_v18 = vsel %vm453_vm1, %v6780_v10, %v1207_v6  ;;  %v7313_v10 = vsel %vm715_vm2, %v1352_v35, %v1320_v4  ;;  %v2976_v4 = vshll.u32 %v7303_v60, 16  ;;  %v2479_v9 = vsel %vm991_vm9, %v2475_v48, %v2478_v27 }
 0x229   : > { %v1409_v59 = vpop.permute.xlu1 %1408  ;;  %v7306_v51 = vsel %vm715_vm2, %v1350_v18, %v1318_v63  ;;  %v2970_v63 = vshrl.u32 %v7271_v32, 16  ;;  %v2732_v35 = vrot.slane %v2470_v23, 1  ;;  %v2994_v11 = vrot.slane %v2992_v42, 1 }
 0x22a   : > { %5738 = vmatprep.mubr.msk.bf16.mxu1 %vm1422_vm3, %v7306_v51  ;;  %5773 = vmatmul.mubr.msk.bf16.gmra.mxu0 %vm1422_vm3, %v7306_v51  ;;  %v2978_v6 = vrot.slane %v2976_v4, 1  ;;  %v2995_v12 = vrot.slane %v2976_v4, 2  ;;  %v2579_v20 = vsel %vm1243_vm8, %v2577_v53, %v2578_v62  ;;  %v2990_v27 = vrot.slane %v2972_v17, 2 }
 0x22b   : > { %5739 = vmatmul.mubr.msk.bf16.gmra.mxu1 %vm1422_vm3, %v7313_v10  ;;  %5776 = vmatprep.mubr.msk.bf16.mxu0 %vm1422_vm3, %v7313_v10  ;;  %v2975_v40 = vor.u32 %v2974_v57, %v2970_v63  ;;  %v2739_v57 = vor.u32 %v2738_v13, %v2737_v28  ;;  %v2734_v42 = vor.u32 %v2733_v1, %v2732_v35  ;;  %v2989_v4 = vrot.slane %v2970_v63, 1 }
 0x22c   : > { %2842 = vrot.lane.b32.xlu1 %v2812_v38, %s6187_s29  ;;  %2840 = vrot.lane.b32.xlu0 %v2809_v31, %s6187_s29  ;;  %v2984_v31 = vrot.slane %v7271_v32, 1  ;;  %v2814_v13 = vrot.slane %v7284_v3, 2  ;;  %v2813_v17 = vrot.slane %v7241_v39, 2  ;;  %v3000_v1 = vrot.slane %v7271_v32, 2 }
 0x22d   : > { %v1322_v29 = vpop.permute.xlu1 %1321  ;;  %v1402_v44 = vpop.permute.xlu0 %1401  ;;  %v2979_v23 = vsel %vm991_vm9, %v2975_v40, %v2978_v6  ;;  %v2740_v63 = vsel %vm2610_vm10, %v2734_v42, %v2739_v57  ;;  %v6082_v40 = vunpack.i.h.bf16 %v6347_v21  ;;  %v7398_v57 = vld [vmem:[%s9342_s5 + $0x18] sm:$0x1f]   ;;  %v9378_v42 = vld [vmem:[#allocation7_spill] sm:$0xff] }
 0x22e   : > { %v1411_v38 = vsel %vm453_vm1, %v6796_v55, %v1402_v44  ;;  %v2986_v28 = vsel %vm1243_vm8, %v2984_v31, %v2985_v15  ;;  %v2996_v44 = vor.u32 %v2995_v12, %v2994_v11 }
 0x230   : > { %2508 = vrot.lane.b32.xlu1 %v2479_v9, %s6190_s25  ;;  %2289 = vrot.lane.b32.xlu0 %v2258_v36, %s6188_s23  ;;  %v2815_v9 = vsel %vm1455_vm7, %v2813_v17, %v2814_v13 }
 0x231   : > { %v2481_v18 = vpop.permute.xlu1 %2480  ;;  %v1211_v50 = vpop.permute.xlu0 %1210 }
 0x232   : > { %v1354_v54 = vsel %vm453_vm1, %v6808_v7, %v1211_v50  ;;  %v7357_v7 = vsel %vm715_vm2, %v1411_v38, %v1409_v59  ;;  %v2848_v3 = vsel %vm2846_vm12, 0, %v2481_v18  ;;  %v3225_v50 = vsel %vm3054_vm11, %v7088_v24, 0 }
 0x233   : > { %v7348_v48 = vsel %vm715_vm2, %v1354_v54, %v1322_v29  ;;  %v2991_v29 = vor.u32 %v2990_v27, %v2989_v4  ;;  %v2878_v6 = vsel %vm453_vm1, %v2848_v3, %v6082_v40 }
 0x234   : > { %2608 = vrot.lane.b32.xlu0 %v2579_v20, %s6186_s28  ;;  %2980 = vrot.lane.b32.xlu1 %v2979_v23, %s6190_s25  ;;  %v3442_v20 = vsel %vm3054_vm11, %v7329_v43, 0 }
 0x235   : > { %5742 = vmatprep.mubr.msk.bf16.mxu1 %vm1422_vm3, %v7348_v48  ;;  %5777 = vmatmul.mubr.msk.bf16.gmra.mxu0 %vm1422_vm3, %v7348_v48  ;;  %v2583_v55 = vpop.permute.xlu1 %2582  ;;  %v2483_v62 = vpop.permute.xlu0 %2482  ;;  %v2997_v35 = vsel %vm2610_vm10, %v2991_v29, %v2996_v44 }
 0x236   : > { %5743 = vmatmul.mubr.msk.bf16.gmra.mxu1 %vm1422_vm3, %v7357_v7  ;;  %v2850_v59 = vsel %vm2846_vm12, %v6801_v58, %v2483_v62 }
 0x237   : > { %5782 = vmatprep.mubr.msk.bf16.mxu1 %vm1422_vm3, %v6977_v26  ;;  %v3001_v26 = vrot.slane %v7303_v60, 2  ;;  %v2880_v15 = vsel %vm453_vm1, %v2850_v59, %v2583_v55 }
 0x238   : > { %2769 = vrot.lane.b32.xlu0 %v2740_v63, %s6191_s26  ;;  %2987 = vrot.lane.b32.xlu1 %v2986_v28, %s6186_s28 }
 0x239   : > { %v2744_v53 = vpop.permute.xlu1 %2743  ;;  %v2742_v36 = vpop.permute.xlu0 %2741  ;;  %v3002_v38 = vsel %vm1455_vm7, %v3000_v1, %v3001_v26 }
 0x23a   : > { %v2911_v21 = vsel %vm2907_vm13, %v2880_v15, %v2744_v53  ;;  %v2909_v58 = vsel %vm2907_vm13, %v2878_v6, %v2742_v36 }
 0x23c   : > { %2844 = vrot.lane.b32.xlu0 %v2815_v9, %s6187_s29  ;;  %2998 = vrot.lane.b32.xlu1 %v2997_v35, %s6191_s26 }
 0x23d   : > { %v2819_v60 = vpop.permute.xlu1 %2818  ;;  %v2817_v11 = vpop.permute.xlu0 %2816 }
 0x23e   : > { %v7384_v12 = vsel %vm715_vm2, %v2911_v21, %v2819_v60  ;;  %5783 = vmatmul.mubr.msk.bf16.vlgmr.msra.gmra.mxu1 %vm1422_vm3, %v7022_v61  ;;  %v7389_v18 = vsel %vm715_vm2, %v2909_v58, %v2817_v11 }
 0x23f   : > { %9377 = vst [vmem:[#allocation8_spill] sm:$0xff] %v7389_v18  ;;  %5786 = vmatprep.mubr.msk.bf16.mxu1 %vm1422_vm3, %v7036_v19  ;;  %5816 = vmatprep.mubr.msk.bf16.mxu0 %vm3021_vm14, %v7389_v18 }
 0x240   : > { %3003 = vrot.lane.b32.xlu0 %v3002_v38, %s6187_s29  ;;  %5817 = vmatmul.mubr.msk.bf16.vlgmr.msra.gmra.mxu0 %vm3021_vm14, %v7384_v12 }
 0x241   : > { %v2487_v61 = vpop.permute.xlu1 %2486  ;;  %v2485_v24 = vpop.permute.xlu0 %2484  ;;  %5849 = vmatpush3.bf16.msra.mxu1 %v3225_v50  ;;  %5883 = vmatpush3.bf16.msra.mxu0 %v3442_v20 }
 0x242   : > { %6025 = vmatprep.subr.msk.bf16.mxu1 %vm3054_vm11, %v7398_v57  ;;  %v2854_v31 = vsel %vm2846_vm12, %v6850_v47, %v2487_v61  ;;  %v2852_v4 = vsel %vm2846_vm12, %v9378_v42, %v2485_v24 }
 0x245   : > { %v2587_v43 = vpop.permute.xlu1 %2586  ;;  %v2585_v54 = vpop.permute.xlu0 %2584 }
 0x246   : > { %5787 = vmatmul.mubr.msk.bf16.gmra.mxu1 %vm1422_vm3, %v7092_v56  ;;  %v2884_v27 = vsel %vm453_vm1, %v2854_v31, %v2587_v43  ;;  %v2882_v55 = vsel %vm453_vm1, %v2852_v4, %v2585_v54  ;;  %v3646_v31 = vsel %vm3054_vm11, %v7398_v57, 0 }
 0x247   : > { %5790 = vmatprep.mubr.msk.bf16.mxu1 %vm1422_vm3, %v7105_v49 }
 0x249   : > { %v2748_v19 = vpop.permute.xlu1 %2747  ;;  %v2746_v23 = vpop.permute.xlu0 %2745 }
 0x24a   : > { %v2915_v62 = vsel %vm2907_vm13, %v2884_v27, %v2748_v19  ;;  %v2913_v13 = vsel %vm2907_vm13, %v2882_v55, %v2746_v23 }
 0x24d   : > { %v2823_v56 = vpop.permute.xlu1 %2822  ;;  %v2821_v17 = vpop.permute.xlu0 %2820 }
 0x24e   : > { %v7423_v49 = vsel %vm715_vm2, %v2915_v62, %v2823_v56  ;;  %5791 = vmatmul.mubr.msk.bf16.gmra.mxu1 %vm1422_vm3, %v7151_v33  ;;  %v7428_v47 = vsel %vm715_vm2, %v2913_v13, %v2821_v17 }
 0x24f   : > { %9379 = vst [vmem:[#allocation7_spill] sm:$0xff] %v7423_v49  ;;  %5794 = vmatprep.mubr.msk.bf16.mxu1 %vm1422_vm3, %v7162_v34  ;;  %5820 = vmatprep.mubr.msk.bf16.mxu0 %vm3021_vm14, %v7428_v47 }
 0x250   : > { %5821 = vmatmul.mubr.msk.bf16.gmra.mxu0 %vm3021_vm14, %v7423_v49 }
 0x251   : > { %v2491_v63 = vpop.permute.xlu1 %2490  ;;  %v2489_v28 = vpop.permute.xlu0 %2488 }
 0x252   : > { %v2858_v34 = vsel %vm2846_vm12, %v6893_v37, %v2491_v63  ;;  %v2856_v59 = vsel %vm2846_vm12, %v6887_v30, %v2489_v28 }
 0x255   : > { %v2591_v29 = vpop.permute.xlu1 %2590  ;;  %v2589_v44 = vpop.permute.xlu0 %2588 }
 0x256   : > { %5795 = vmatmul.mubr.msk.bf16.gmra.mxu1 %vm1422_vm3, %v7201_v14  ;;  %v2888_v53 = vsel %vm453_vm1, %v2858_v34, %v2591_v29  ;;  %v2886_v36 = vsel %vm453_vm1, %v2856_v59, %v2589_v44 }
 0x257   : > { %5798 = vmatprep.mubr.msk.bf16.mxu1 %vm1422_vm3, %v7216_v22 }
 0x259   : > { %v2752_v33 = vpop.permute.xlu1 %2751  ;;  %v2750_v3 = vpop.permute.xlu0 %2749 }
 0x25a   : > { %v2919_v40 = vsel %vm2907_vm13, %v2888_v53, %v2752_v33  ;;  %v2917_v26 = vsel %vm2907_vm13, %v2886_v36, %v2750_v3 }
 0x25d   : > { %v2827_v14 = vpop.permute.xlu1 %2826  ;;  %v2825_v9 = vpop.permute.xlu0 %2824 }
 0x25e   : > { %v7449_v22 = vsel %vm715_vm2, %v2919_v40, %v2827_v14  ;;  %5799 = vmatmul.mubr.msk.bf16.gmra.mxu1 %vm1422_vm3, %v7257_v52  ;;  %v7454_v37 = vsel %vm715_vm2, %v2917_v26, %v2825_v9 }
 0x25f   : > { %9380 = vst [vmem:[#allocation9_spill] sm:$0xff] %v7449_v22  ;;  %9381 = vst [vmem:[#allocation10_spill] sm:$0xff] %v7454_v37  ;;  %5802 = vmatprep.mubr.msk.bf16.mxu1 %vm1422_vm3, %v7266_v5  ;;  %5824 = vmatprep.mubr.msk.bf16.mxu0 %vm3021_vm14, %v7454_v37  ;;  %v7469_v5 = vld [vmem:[%s9342_s5 + $0x20] sm:$0x1f]  }
 0x260   : > { %5825 = vmatmul.mubr.msk.bf16.gmra.mxu0 %vm3021_vm14, %v7449_v22  ;;  %6026 = vmatprep.subr.msk.bf16.mxu0 %vm3054_vm11, %v7469_v5 }
 0x261   : > { %v2495_v30 = vpop.permute.xlu1 %2494  ;;  %v2493_v35 = vpop.permute.xlu0 %2492 }
 0x262   : > { %v2862_v21 = vsel %vm2846_vm12, %v6940_v16, %v2495_v30  ;;  %v2860_v58 = vsel %vm2846_vm12, %v6952_v45, %v2493_v35 }
 0x265   : > { %v2595_v1 = vpop.permute.xlu1 %2594  ;;  %v2593_v15 = vpop.permute.xlu0 %2592 }
 0x266   : > { %5803 = vmatmul.mubr.msk.bf16.gmra.mxu1 %vm1422_vm3, %v7306_v51  ;;  %v2892_v51 = vsel %vm453_vm1, %v2862_v21, %v2595_v1 }
 0x267   : > { %5806 = vmatprep.mubr.msk.bf16.mxu1 %vm1422_vm3, %v7313_v10  ;;  %v2890_v10 = vsel %vm453_vm1, %v2860_v58, %v2593_v15 }
 0x269   : > { %v2756_v52 = vpop.permute.xlu1 %2755  ;;  %v2754_v6 = vpop.permute.xlu0 %2753 }
 0x26a   : > { %v2923_v60 = vsel %vm2907_vm13, %v2892_v51, %v2756_v52  ;;  %v2921_v11 = vsel %vm2907_vm13, %v2890_v10, %v2754_v6 }
 0x26d   : > { %v2831_v50 = vpop.permute.xlu1 %2830  ;;  %v2829_v20 = vpop.permute.xlu0 %2828 }
 0x26e   : > { %5807 = vmatmul.mubr.msk.bf16.gmra.mxu1 %vm1422_vm3, %v7348_v48  ;;  %v7484_v16 = vsel %vm715_vm2, %v2923_v60, %v2831_v50  ;;  %v7487_v45 = vsel %vm715_vm2, %v2921_v11, %v2829_v20  ;;  %v9384_v48 = vld [vmem:[#allocation5_spill] sm:$0xff] }
 0x26f   : > { %9382 = vst [vmem:[#allocation11_spill] sm:$0xff] %v7484_v16  ;;  %9383 = vst [vmem:[#allocation12_spill] sm:$0xff] %v7487_v45  ;;  %5810 = vmatprep.mubr.msk.bf16.mxu1 %vm1422_vm3, %v7357_v7  ;;  %5828 = vmatprep.mubr.msk.bf16.mxu0 %vm3021_vm14, %v7487_v45 }
 0x270   : > { %5829 = vmatmul.mubr.msk.bf16.gmra.mxu0 %vm3021_vm14, %v7484_v16 }
 0x271   : > { %v2499_v38 = vpop.permute.xlu1 %2498  ;;  %v2497_v61 = vpop.permute.xlu0 %2496 }
 0x272   : > { %v2866_v7 = vsel %vm2846_vm12, %v7014_v41, %v2499_v38  ;;  %v2864_v23 = vsel %vm2846_vm12, %v7007_v8, %v2497_v61 }
 0x275   : > { %v2599_v24 = vpop.permute.xlu1 %2598  ;;  %v2597_v43 = vpop.permute.xlu0 %2596 }
 0x276   : > { %5811 = vmatmul.mubr.msk.bf16.gmra.mxu1 %vm1422_vm3, %v9384_v48  ;;  %v2896_v42 = vsel %vm453_vm1, %v2866_v7, %v2599_v24  ;;  %v2894_v4 = vsel %vm453_vm1, %v2864_v23, %v2597_v43 }
 0x277   : > { %5850 = vmatprep.mubr.msk.bf16.mxu1 %vm3021_vm14, %v7389_v18 }
 0x279   : > { %v2760_v54 = vpop.permute.xlu1 %2759  ;;  %v2758_v19 = vpop.permute.xlu0 %2757 }
 0x27a   : > { %v2927_v27 = vsel %vm2907_vm13, %v2896_v42, %v2760_v54  ;;  %v2925_v55 = vsel %vm2907_vm13, %v2894_v4, %v2758_v19 }
 0x27d   : > { %v2835_v62 = vpop.permute.xlu1 %2834  ;;  %v2833_v13 = vpop.permute.xlu0 %2832 }
 0x27e   : > { %5851 = vmatmul.mubr.msk.bf16.vlgmr.msra.gmra.mxu1 %vm3021_vm14, %v7389_v18  ;;  %v7512_v41 = vsel %vm715_vm2, %v2927_v27, %v2835_v62  ;;  %v7515_v8 = vsel %vm715_vm2, %v2925_v55, %v2833_v13 }
 0x27f   : > { %9385 = vst [vmem:[#allocation5_spill] sm:$0xff] %v7512_v41  ;;  %9386 = vst [vmem:[#allocation13_spill] sm:$0xff] %v7515_v8  ;;  %5854 = vmatprep.mubr.msk.bf16.mxu1 %vm3021_vm14, %v7384_v12  ;;  %5917 = vmatpush3.bf16.msra.mxu1 %v3646_v31 }
 0x280   : > { %5832 = vmatprep.mubr.msk.bf16.mxu0 %vm3021_vm14, %v7515_v8 }
 0x281   : > { %5833 = vmatmul.mubr.msk.bf16.gmra.mxu0 %vm3021_vm14, %v7512_v41  ;;  %v2503_v57 = vpop.permute.xlu1 %2502  ;;  %v2501_v56 = vpop.permute.xlu0 %2500 }
 0x282   : > { %v2870_v44 = vsel %vm2846_vm12, %v7098_v0, %v2503_v57  ;;  %v2868_v33 = vsel %vm2846_vm12, %v7077_v25, %v2501_v56 }
 0x285   : > { %v2603_v17 = vpop.permute.xlu1 %2602  ;;  %v2601_v63 = vpop.permute.xlu0 %2600 }
 0x286   : > { %5855 = vmatmul.mubr.msk.bf16.gmra.mxu1 %vm3021_vm14, %v7428_v47  ;;  %v2900_v3 = vsel %vm453_vm1, %v2870_v44, %v2603_v17  ;;  %v2898_v34 = vsel %vm453_vm1, %v2868_v33, %v2601_v63 }
 0x287   : > { %5858 = vmatprep.mubr.msk.bf16.mxu1 %vm3021_vm14, %v7423_v49 }
 0x289   : > { %v2764_v28 = vpop.permute.xlu1 %2763  ;;  %v2762_v29 = vpop.permute.xlu0 %2761 }
 0x28a   : > { %v2931_v59 = vsel %vm2907_vm13, %v2900_v3, %v2764_v28  ;;  %v2929_v53 = vsel %vm2907_vm13, %v2898_v34, %v2762_v29 }
 0x28d   : > { %v2839_v36 = vpop.permute.xlu1 %2838  ;;  %v2837_v40 = vpop.permute.xlu0 %2836 }
 0x28e   : > { %5859 = vmatmul.mubr.msk.bf16.gmra.mxu1 %vm3021_vm14, %v7454_v37  ;;  %v7538_v26 = vsel %vm715_vm2, %v2931_v59, %v2839_v36  ;;  %v7541_v0 = vsel %vm715_vm2, %v2929_v53, %v2837_v40 }
 0x28f   : > { %9387 = vst [vmem:[#allocation14_spill] sm:$0xff] %v7538_v26  ;;  %9388 = vst [vmem:[#allocation15_spill] sm:$0xff] %v7541_v0  ;;  %5862 = vmatprep.mubr.msk.bf16.mxu1 %vm3021_vm14, %v7449_v22  ;;  %5836 = vmatprep.mubr.msk.bf16.mxu0 %vm3021_vm14, %v7541_v0 }
 0x290   : > { %5837 = vmatmul.mubr.msk.bf16.gmra.mxu0 %vm3021_vm14, %v7538_v26 }
 0x291   : > { %v2507_v25 = vpop.permute.xlu1 %2506  ;;  %v2505_v14 = vpop.permute.xlu0 %2504 }
 0x292   : > { %v2874_v15 = vsel %vm2846_vm12, %v7180_v2, %v2507_v25  ;;  %v2872_v52 = vsel %vm2846_vm12, %v7173_v46, %v2505_v14 }
 0x295   : > { %v2607_v9 = vpop.permute.xlu1 %2606  ;;  %v2605_v30 = vpop.permute.xlu0 %2604 }
 0x296   : > { %5863 = vmatmul.mubr.msk.bf16.gmra.mxu1 %vm3021_vm14, %v7487_v45  ;;  %v2904_v6 = vsel %vm453_vm1, %v2874_v15, %v2607_v9  ;;  %v2902_v21 = vsel %vm453_vm1, %v2872_v52, %v2605_v30 }
 0x297   : > { %5866 = vmatprep.mubr.msk.bf16.mxu1 %vm3021_vm14, %v7484_v16 }
 0x299   : > { %v2768_v35 = vpop.permute.xlu1 %2767  ;;  %v2766_v1 = vpop.permute.xlu0 %2765 }
 0x29a   : > { %v2935_v58 = vsel %vm2907_vm13, %v2904_v6, %v2768_v35  ;;  %v2933_v51 = vsel %vm2907_vm13, %v2902_v21, %v2766_v1 }
 0x29e   : > { %v2843_v10 = vpop.permute.xlu1 %2842  ;;  %5867 = vmatmul.mubr.msk.bf16.gmra.mxu1 %vm3021_vm14, %v7515_v8  ;;  %v2841_v60 = vpop.permute.xlu0 %2840 }
 0x29f   : > { %v7564_v11 = vsel %vm715_vm2, %v2935_v58, %v2843_v10  ;;  %v7567_v2 = vsel %vm715_vm2, %v2933_v51, %v2841_v60  ;;  %5870 = vmatprep.mubr.msk.bf16.mxu1 %vm3021_vm14, %v7512_v41 }
 0x2a0   : > { %9389 = vst [vmem:[#allocation16_spill] sm:$0xff] %v7564_v11  ;;  %9390 = vst [vmem:[#allocation17_spill] sm:$0xff] %v7567_v2  ;;  %5840 = vmatprep.mubr.msk.bf16.mxu0 %vm3021_vm14, %v7567_v2 }
 0x2a1   : > { %5841 = vmatmul.mubr.msk.bf16.gmra.mxu0 %vm3021_vm14, %v7564_v11 }
 0x2a2   : > { %v2509_v46 = vpop.permute.xlu1 %2508  ;;  %v2290_v50 = vpop.permute.xlu0 %2289 }
 0x2a3   : > { %v7576_v20 = vsel %vm956_vm5, 0, %v2290_v50  ;;  %v2339_v38 = vsel %vm956_vm5, %v2290_v50, 0  ;;  %v7581_v54 = vpop.f32.mrf.mxu0  ;;  %v2876_v14 = vsel %vm2846_vm12, %v7241_v39, %v2509_v46  ;;  %v4805_v39 = vld [vmem:[%s9344_s7] sm:$0x3] }
 0x2a4   : > { %9391 = vst [vmem:[#allocation18_spill] sm:$0xff] %v7576_v20  ;;  %v3388_v61 = vshrl.u32 %v7576_v20, 16  ;;  %v3390_v24 = vshll.u32 %v7576_v20, 16  ;;  %v3394_v48 = vshll.u32 %v2339_v38, 16  ;;  %v3403_v43 = vrot.slane %v2339_v38, 1  ;;  %v7583_v7 = vpop.f32.mrf.mxu1  ;;  %6027 = vmatprep.subr.msk.bf16.mxu1 %vm502_vm0, %v4805_v39 }
 0x2a5   : > { %v3410_v19 = vshrl.u32 %v2339_v38, 16  ;;  %v3402_v23 = vrot.slane %v7576_v20, 1  ;;  %v7586_v42 = vpop.f32.mrf.mxu0  ;;  %v3419_v62 = vrot.slane %v2339_v38, 2  ;;  %v3418_v17 = vrot.slane %v7576_v20, 2 }
 0x2a6   : > { %v3413_v31 = vrot.slane %v3394_v48, 2  ;;  %v2981_v4 = vpop.permute.xlu1 %2980  ;;  %5871 = vmatmul.mubr.msk.bf16.gmra.mxu1 %vm3021_vm14, %v7541_v0  ;;  %v3392_v27 = vrot.slane %v3390_v24, 1  ;;  %v7590_v13 = vpop.f32.mrf.mxu1  ;;  %v3396_v28 = vrot.slane %v3394_v48, 1  ;;  %v3407_v29 = vrot.slane %v3388_v61, 1  ;;  %v6107_v48 = vld [vmem:[%s6305_s27] sm:$0xff]  }
 0x2a7   : > { %v3412_v55 = vrot.slane %v3410_v19, 1  ;;  %v2609_v57 = vpop.permute.xlu0 %2608  ;;  %5874 = vmatprep.mubr.msk.bf16.mxu1 %vm3021_vm14, %v7538_v26  ;;  %v3404_v56 = vsel %vm1243_vm8, %v3402_v23, %v3403_v43  ;;  %v3408_v44 = vrot.slane %v3390_v24, 2  ;;  %v7597_v33 = vpop.f32.mrf.mxu0  ;;  %v3420_v40 = vsel %vm1455_vm7, %v3418_v17, %v3419_v62  ;;  %v6108_v19 = vld [vmem:[%s6305_s27 + $0x10] sm:$0xff]  }
 0x2a8   : > { %3405 = vrot.lane.b32.xlu0 %v3404_v56, %s6186_s28  ;;  %v3393_v63 = vor.u32 %v3392_v27, %v3388_v61  ;;  %9392 = vst [vmem:[#allocation19_spill] sm:$0xff] %v7597_v33  ;;  %v7600_v53 = vpop.f32.mrf.mxu1  ;;  %v2906_v9 = vsel %vm453_vm1, %v2876_v14, %v2609_v57  ;;  %v3006_v58 = vsel %vm2846_vm12, %v7271_v32, %v2981_v4  ;;  %v4277_v43 = vshrl.u32 %v6107_v48, 16  ;;  %v6109_v27 = vld [vmem:[%s6305_s27 + $0x8] sm:$0xff]   ;;  %v6110_v14 = vld [vmem:[%s6305_s27 + $0x18] sm:$0xff]   ;;  %v6119_v33 = vld [vmem:[%s6305_s27 + $0x60] sm:$0xff]   ;;  %s6194_s28 = smov 20  }
 0x2a9   : > { %v3414_v59 = vor.u32 %v3413_v31, %v3412_v55  ;;  %9393 = vst [vmem:[#allocation20_spill] sm:$0xff] %v7600_v53  ;;  %v3409_v25 = vor.u32 %v3408_v44, %v3407_v29  ;;  %v7608_v30 = vpop.f32.mrf.mxu0  ;;  %v4289_v23 = vshrl.u32 %v6108_v19, 16  ;;  %v4280_v4 = vshll.u32 %v6107_v48, 16 }
 0x2aa   : > { %v2988_v3 = vpop.permute.xlu1 %2987  ;;  %v3397_v34 = vsel %vm991_vm9, %v3393_v63, %v3396_v28  ;;  %9394 = vst [vmem:[#allocation21_spill] sm:$0xff] %v7608_v30  ;;  %v7613_v1 = vpop.f32.mrf.mxu1  ;;  %v4283_v55 = vshrl.u32 %v6109_v27, 16  ;;  %v4279_v57 = vrot.slane %v4277_v43, 7  ;;  %v4292_v17 = vshll.u32 %v6108_v19, 16 }
 0x2ab   : > { %v2770_v36 = vpop.permute.xlu0 %2769  ;;  %3398 = vrot.lane.b32.xlu1 %v3397_v34, %s6190_s25  ;;  %v3415_v35 = vsel %vm2610_vm10, %v3409_v25, %v3414_v59  ;;  %9395 = vst [vmem:[#allocation22_spill] sm:$0xff] %v7613_v1  ;;  %v3008_v60 = vsel %vm453_vm1, %v3006_v58, %v2988_v3  ;;  %v4291_v56 = vrot.slane %v4289_v23, 7  ;;  %v4862_v28 = vsel %vm502_vm0, %v4805_v39, 0  ;;  %s5507_s25 = sshll.u32 %s6268_s13, 12  ;;  %s9296_s13 = scalar_lea.sflag [#allocation3], %s323_s14 }
 0x2ac   : > { %3421 = vrot.lane.b32.xlu0 %v3420_v40, %s6187_s29  ;;  %v2937_v15 = vsel %vm2907_vm13, %v2906_v9, %v2770_v36  ;;  %v4285_v3 = vrot.slane %v4283_v55, 7  ;;  %v4286_v59 = vshll.u32 %v6109_v27, 16  ;;  %v7681_v40 = vsel %vm6568_vm6, %v4279_v57, 4286578559  ;;  %s9288_s23 = scalar_lea.hbm %s9346_s9, %s5507_s25 }
 0x2ad   : > { %v4294_v34 = vor.u32 %v4292_v17, %v4291_v56  ;;  %v4295_v9 = vshrl.u32 %v6110_v14, 16  ;;  %v4298_v48 = vshll.u32 %v6110_v14, 16  ;;  %v7711_v43 = vsel %vm6568_vm6, %v4291_v56, 4286578559 }
 0x2ae   : > { %5875 = vmatmul.mubr.msk.bf16.gmra.mxu1 %vm3021_vm14, %v7567_v2  ;;  %v2999_v6 = vpop.permute.xlu1 %2998  ;;  %v7628_v51 = vpop.f32.mrf.mxu0  ;;  %v7685_v25 = vsel %vm6568_vm6, %v4285_v3, 4286578559  ;;  %v4469_v14 = vshll.u32 %v7711_v43, 16  ;;  %vm4244_vm0 = vcmask 162944  }
 0x2af   : > { %v2845_v52 = vpop.permute.xlu0 %2844  ;;  %5878 = vmatprep.mubr.msk.bf16.mxu1 %vm3021_vm14, %v7564_v11  ;;  %3416 = vrot.lane.b32.xlu1 %v3415_v35, %s6191_s26  ;;  %9397 = vst [vmem:[#allocation24_spill] sm:$0xff] %v7628_v51  ;;  %v3010_v46 = vsel %vm2907_vm13, %v3008_v60, %v2999_v6  ;;  %v6111_v35 = vld [vmem:[%s6305_s27 + $0x20] sm:$0xff]   ;;  %v7699_v58 = vsel %vm6568_vm6, 4286578559, %v4294_v34  ;;  %v4445_v60 = vshll.u32 %v7681_v40, 16  ;;  %v4297_v19 = vrot.slane %v4295_v9, 7 }
 0x2b0   : > { %v7623_v21 = vsel %vm715_vm2, %v2937_v15, %v2845_v52  ;;  %v7630_v10 = vpop.f32.mrf.mxu1  ;;  %v7641_v32 = vpop.f32.mrf.mxu0  ;;  %v4301_v15 = vshrl.u32 %v6111_v35, 16  ;;  %v6113_v9 = vld [vmem:[%s6305_s27 + $0x28] sm:$0xff]   ;;  %v4462_v18 = vshrl.u32 %v7699_v58, 16 }
 0x2b1   : > { %9396 = vst [vmem:[#allocation23_spill] sm:$0xff] %v7623_v21  ;;  %9398 = vst [vmem:[#allocation25_spill] sm:$0xff] %v7630_v10  ;;  %5844 = vmatprep.mubr.msk.bf16.mxu0 %vm3021_vm14, %v7623_v21  ;;  %v7725_v34 = vrot.slane %v4445_v60, 1 }
 0x2b2   : > { %v7636_v38 = vpop.f32.mrf.mxu1  ;;  %9401 = vst [vmem:[#allocation28_spill] sm:$0xff] %v7641_v32  ;;  %v7655_v31 = vpop.f32.mrf.mxu0  ;;  %v4303_v23 = vrot.slane %v4301_v15, 7 }
 0x2b3   : > { %v3004_v50 = vpop.permute.xlu0 %3003  ;;  %9399 = vst [vmem:[#allocation26_spill] sm:$0xff] %v7636_v38  ;;  %9403 = vst [vmem:[#allocation30_spill] sm:$0xff] %v7655_v31  ;;  %v6118_v38 = vld [vmem:[%s6305_s27 + $0x58] sm:$0xff]  }
 0x2b4   : > { %v7639_v61 = vsel %vm715_vm2, %v3010_v46, %v3004_v50  ;;  %v7651_v24 = vpop.f32.mrf.mxu1  ;;  %v7662_v63 = vpop.f32.mrf.mxu0  ;;  %v4288_v46 = vor.u32 %v4286_v59, %v4285_v3  ;;  %v4457_v50 = vshll.u32 %v7685_v25, 16  ;;  %v4343_v51 = vshrl.u32 %v6118_v38, 16 }
 0x2b5   : > { %9400 = vst [vmem:[#allocation27_spill] sm:$0xff] %v7639_v61  ;;  %5845 = vmatmul.mubr.msk.bf16.gmra.mxu0 %vm3021_vm14, %v7639_v61  ;;  %9402 = vst [vmem:[#allocation29_spill] sm:$0xff] %v7651_v24 }
 0x2b6   : > { %5884 = vmatprep.mubr.msk.bf16.mxu0 %vm3021_vm14, %v7384_v12  ;;  %5879 = vmatmul.mubr.msk.bf16.gmra.mxu1 %vm3021_vm14, %v7623_v21  ;;  %v7658_v62 = vpop.f32.mrf.mxu1  ;;  %v3850_v12 = vsel %vm3054_vm11, %v7469_v5, 0  ;;  %9405 = vst [vmem:[#allocation32_spill] sm:$0xff] %v7662_v63  ;;  %v7729_v59 = vsel %vm6568_vm6, 4286578559, %v4288_v46  ;;  %v7736_v56 = vrot.slane %v4457_v50, 1  ;;  %v6114_v46 = vld [vmem:[%s6305_s27 + $0x40] sm:$0xff]  }
 0x2b7   : > { %5918 = vmatprep.mubr.msk.bf16.mxu1 %vm3021_vm14, %v7428_v47  ;;  %9404 = vst [vmem:[#allocation31_spill] sm:$0xff] %v7658_v62  ;;  %v4345_v30 = vrot.slane %v4343_v51, 7 }
 0x2ba   : > { %v7673_v5 = vpop.f32.mrf.mxu0 }
 0x2bb   : > { %9407 = vst [vmem:[#allocation34_spill] sm:$0xff] %v7673_v5 }
 0x2bc   : > { %v7667_v29 = vpop.f32.mrf.mxu1  ;;  %v7689_v52 = vpop.f32.mrf.mxu0 }
 0x2bd   : > { %5885 = vmatmul.mubr.msk.bf16.vlgmr.msra.gmra.mxu0 %vm3021_vm14, %v7428_v47  ;;  %9406 = vst [vmem:[#allocation33_spill] sm:$0xff] %v7667_v29  ;;  %v4282_v47 = vor.u32 %v4280_v4, %v4279_v57  ;;  %9410 = vst [vmem:[#allocation6_spill] sm:$0xff] %v7689_v52  ;;  %v4304_v4 = vshll.u32 %v6111_v35, 16  ;;  %v4307_v35 = vshrl.u32 %v6113_v9, 16 }
 0x2be   : > { %5888 = vmatprep.mubr.msk.bf16.mxu0 %vm3021_vm14, %v7423_v49  ;;  %5919 = vmatmul.mubr.msk.bf16.vlgmr.msra.gmra.mxu1 %vm3021_vm14, %v7423_v49  ;;  %v7677_v44 = vpop.f32.mrf.mxu1  ;;  %v7713_v27 = vpop.f32.mrf.mxu0 }
 0x2bf   : > { %5922 = vmatprep.mubr.msk.bf16.mxu1 %vm3021_vm14, %v7454_v37  ;;  %5951 = vmatpush3.bf16.msra.mxu0 %v3850_v12  ;;  %9408 = vst [vmem:[#allocation35_spill] sm:$0xff] %v7677_v44  ;;  %v7695_v6 = vsel %vm6568_vm6, 4286578559, %v4282_v47  ;;  %9412 = vst [vmem:[#allocation37_spill] sm:$0xff] %v7713_v27  ;;  %v4464_v12 = vshll.u32 %v7699_v58, 16  ;;  %v6112_v47 = vld [vmem:[%s6305_s27 + $0x30] sm:$0xff]  }
 0x2c0   : > { %5985 = vmatpush3.bf16.msra.mxu1 %v4862_v28  ;;  %v7691_v39 = vpop.f32.mrf.mxu1  ;;  %v4440_v55 = vshll.u32 %v7695_v6, 16  ;;  %v4438_v17 = vshrl.u32 %v7695_v6, 16  ;;  %v4313_v3 = vshrl.u32 %v6112_v47, 16  ;;  %v4300_v28 = vor.u32 %v4298_v48, %v4297_v19  ;;  %v7738_v49 = vpop.f32.mrf.mxu0 }
 0x2c1   : > { %9411 = vst [vmem:[#allocation36_spill] sm:$0xff] %v7691_v39  ;;  %9415 = vst [vmem:[#allocation40_spill] sm:$0xff] %v7738_v49  ;;  %v4466_v20 = vrot.slane %v4464_v12, 1  ;;  %v4452_v39 = vshll.u32 %v7729_v59, 16  ;;  %v4316_v50 = vshll.u32 %v6112_v47, 16  ;;  %v4471_v48 = vrot.slane %v4469_v14, 1 }
 0x2c2   : > { %v7719_v57 = vpop.f32.mrf.mxu1  ;;  %v4442_v60 = vrot.slane %v4440_v55, 1  ;;  %v4309_v55 = vrot.slane %v4307_v35, 7  ;;  %v4310_v12 = vshll.u32 %v6113_v9, 16  ;;  %v7761_v47 = vsel %vm6568_vm6, 4286578559, %v4300_v28 }
 0x2c3   : > { %9413 = vst [vmem:[#allocation38_spill] sm:$0xff] %v7719_v57  ;;  %v4325_v57 = vshrl.u32 %v6114_v46, 16  ;;  %v4467_v9 = vor.u32 %v4466_v20, %v4462_v18  ;;  %v7772_v35 = vsel %vm6568_vm6, %v4303_v23, 4286578559  ;;  %v7782_v5 = vrot.slane %v4452_v39, 1 }
 0x2c4   : > { %v7776_v28 = vor.u32 %v4442_v60, %v4438_v17  ;;  %v4476_v18 = vshll.u32 %v7761_v47, 16  ;;  %v7789_v17 = vsel %vm6568_vm6, %v4309_v55, 4286578559 }
 0x2c5   : > { %5889 = vmatmul.mubr.msk.bf16.gmra.mxu0 %vm3021_vm14, %v7454_v37  ;;  %v4306_v37 = vor.u32 %v4304_v4, %v4303_v23  ;;  %v7752_v4 = vsel %vm6568_vm6, %v4297_v19, 4286578559  ;;  %v6115_v19 = vld [vmem:[%s6305_s27 + $0x38] sm:$0xff]   ;;  %v4312_v23 = vor.u32 %v4310_v12, %v4309_v55 }
 0x2c6   : > { %5892 = vmatprep.mubr.msk.bf16.mxu0 %vm3021_vm14, %v7449_v22  ;;  %5923 = vmatmul.mubr.msk.bf16.gmra.mxu1 %vm3021_vm14, %v7449_v22  ;;  %v4315_v22 = vrot.slane %v4313_v3, 7  ;;  %v7746_v52 = vpop.f32.mrf.mxu0  ;;  %v4319_v14 = vshrl.u32 %v6115_v19, 16 }
 0x2c7   : > { %5926 = vmatprep.mubr.msk.bf16.mxu1 %vm3021_vm14, %v7487_v45  ;;  %9417 = vst [vmem:[#allocation42_spill] sm:$0xff] %v7746_v52  ;;  %v7765_v3 = vsel %vm6568_vm6, 4286578559, %v4306_v37  ;;  %v4481_v37 = vshll.u32 %v7752_v4, 16  ;;  %v7792_v52 = vsel %vm991_vm9, %v4467_v9, %v4471_v48 }
 0x2c8   : > { %v7733_v15 = vpop.f32.mrf.mxu1  ;;  %v4318_v49 = vor.u32 %v4316_v50, %v4315_v22  ;;  %v7780_v44 = vpop.f32.mrf.mxu0  ;;  %v4488_v20 = vshll.u32 %v7765_v3, 16  ;;  %v4321_v60 = vrot.slane %v4319_v14, 7  ;;  %v4505_v14 = vshll.u32 %v7789_v17, 16 }
 0x2c9   : > { %9414 = vst [vmem:[#allocation39_spill] sm:$0xff] %v7733_v15  ;;  %v4700_v15 = vrot.slane %v7711_v43, 1  ;;  %v4699_v43 = vrot.slane %v7699_v58, 1  ;;  %9419 = vst [vmem:[#allocation44_spill] sm:$0xff] %v7780_v44  ;;  %v7801_v29 = vrot.slane %v4481_v37, 1  ;;  %v7826_v37 = vrot.slane %v4476_v18, 1 }
 0x2ca   : > { %v7742_v27 = vpop.f32.mrf.mxu1  ;;  %v7808_v48 = vpop.f32.mrf.mxu0 }
 0x2cb   : > { %9416 = vst [vmem:[#allocation41_spill] sm:$0xff] %v7742_v27  ;;  %v7795_v50 = vsel %vm1243_vm8, %v4699_v43, %v4700_v15  ;;  %9421 = vst [vmem:[#allocation46_spill] sm:$0xff] %v7808_v48  ;;  %v4490_v15 = vrot.slane %v4488_v20, 1  ;;  %v7815_v43 = vsel %vm6568_vm6, 4286578559, %v4312_v23  ;;  %v7852_v48 = vrot.slane %v4505_v14, 1 }
 0x2cc   : > { %v7774_v27 = vpop.f32.mrf.mxu1  ;;  %v7834_v23 = vsel %vm6568_vm6, %v4315_v22, 4286578559  ;;  %v7848_v22 = vpop.f32.mrf.mxu0 }
 0x2cd   : > { %5893 = vmatmul.mubr.msk.bf16.gmra.mxu0 %vm3021_vm14, %v7487_v45  ;;  %v4328_v45 = vshll.u32 %v6114_v46, 16  ;;  %9418 = vst [vmem:[#allocation43_spill] sm:$0xff] %v7774_v27  ;;  %v4322_v46 = vshll.u32 %v6115_v19, 16  ;;  %v7806_v19 = vsel %vm6568_vm6, 4286578559, %v4318_v49  ;;  %v6116_v49 = vld [vmem:[%s6305_s27 + $0x48] sm:$0xff]  }
 0x2ce   : > { %5896 = vmatprep.mubr.msk.bf16.mxu0 %vm3021_vm14, %v7484_v16  ;;  %5927 = vmatmul.mubr.msk.bf16.gmra.mxu1 %vm3021_vm14, %v7484_v16  ;;  %v4327_v16 = vrot.slane %v4325_v57, 7  ;;  %v4493_v57 = vshll.u32 %v7772_v35, 16  ;;  %v7798_v44 = vpop.f32.mrf.mxu1  ;;  %v4512_v39 = vshll.u32 %v7806_v19, 16  ;;  %v4331_v18 = vshrl.u32 %v6116_v49, 16  ;;  %9424 = vst [vmem:[#allocation49_spill] sm:$0xff] %v7848_v22 }
 0x2cf   : > { %5930 = vmatprep.mubr.msk.bf16.mxu1 %vm3021_vm14, %v7515_v8  ;;  %9420 = vst [vmem:[#allocation45_spill] sm:$0xff] %v7798_v44  ;;  %v4324_v55 = vor.u32 %v4322_v46, %v4321_v60  ;;  %v4517_v46 = vshll.u32 %v7834_v23, 16  ;;  %v4334_v62 = vshll.u32 %v6116_v49, 16 }
 0x2d0   : > { %v4330_v27 = vor.u32 %v4328_v45, %v4327_v16  ;;  %v4486_v45 = vshrl.u32 %v7765_v3, 16  ;;  %v7828_v20 = vrot.slane %v4493_v57, 1  ;;  %v4510_v57 = vshrl.u32 %v7806_v19, 16 }
 0x2d1   : > { %v4514_v14 = vrot.slane %v4512_v39, 1  ;;  %v4333_v22 = vrot.slane %v4331_v18, 7 }
 0x2d2   : > { %v7839_v12 = vsel %vm6568_vm6, 4286578559, %v4330_v27  ;;  %v7850_v44 = vor.u32 %v4490_v15, %v4486_v45  ;;  %v7856_v27 = vsel %vm6568_vm6, %v4321_v60, 4286578559  ;;  %v7866_v15 = vpop.f32.mrf.mxu0  ;;  %v7870_v60 = vsel %vm6568_vm6, %v4327_v16, 4286578559 }
 0x2d3   : > { %v4536_v45 = vshll.u32 %v7839_v12, 16  ;;  %9425 = vst [vmem:[#allocation50_spill] sm:$0xff] %v7866_v15  ;;  %v4534_v49 = vshrl.u32 %v7839_v12, 16 }
 0x2d4   : > { %v7818_v9 = vpop.f32.mrf.mxu1 }
 0x2d5   : > { %5897 = vmatmul.mubr.msk.bf16.gmra.mxu0 %vm3021_vm14, %v7515_v8  ;;  %9422 = vst [vmem:[#allocation47_spill] sm:$0xff] %v7818_v9  ;;  %v4500_v8 = vshll.u32 %v7815_v43, 16  ;;  %v7863_v9 = vsel %vm6568_vm6, 4286578559, %v4324_v55  ;;  %v4529_v55 = vshll.u32 %v7856_v27, 16  ;;  %v4538_v32 = vrot.slane %v4536_v45, 1 }
 0x2d6   : > { %5900 = vmatprep.mubr.msk.bf16.mxu0 %vm3021_vm14, %v7512_v41  ;;  %5931 = vmatmul.mubr.msk.bf16.gmra.mxu1 %vm3021_vm14, %v7512_v41  ;;  %v7842_v41 = vpop.f32.mrf.mxu1  ;;  %v4524_v16 = vshll.u32 %v7863_v9, 16  ;;  %v7905_v45 = vsel %vm6568_vm6, %v4333_v22, 4286578559 }
 0x2d7   : > { %5934 = vmatprep.mubr.msk.bf16.mxu1 %vm3021_vm14, %v7541_v0  ;;  %9423 = vst [vmem:[#allocation48_spill] sm:$0xff] %v7842_v41  ;;  %v6117_v41 = vld [vmem:[%s6305_s27 + $0x50] sm:$0xff]   ;;  %v7874_v24 = vrot.slane %v4500_v8, 1  ;;  %v7887_v8 = vrot.slane %v4517_v46, 1  ;;  %v7901_v10 = vrot.slane %v4529_v55, 1  ;;  %v9433_v55 = vrot.slane %v7695_v6, 1 }
 0x2d8   : > { %v4337_v63 = vshrl.u32 %v6117_v41, 16  ;;  %v7872_v31 = vpop.f32.mrf.mxu1  ;;  %v4340_v18 = vshll.u32 %v6117_v41, 16  ;;  %v7895_v41 = vor.u32 %v4514_v14, %v4510_v57  ;;  %v7907_v1 = vrot.slane %v4524_v16, 1 }
 0x2d9   : > { %9426 = vst [vmem:[#allocation51_spill] sm:$0xff] %v7872_v31  ;;  %v7891_v31 = vpop.f32.mrf.mxu0  ;;  %v9432_v16 = vrot.slane %v7681_v40, 1  ;;  %v4696_v40 = vrot.slane %v7729_v59, 1 }
 0x2da   : > { %v4339_v15 = vrot.slane %v4337_v63, 7  ;;  %9427 = vst [vmem:[#allocation52_spill] sm:$0xff] %v7891_v31  ;;  %v7899_v46 = vpop.f32.mrf.mxu1  ;;  %v4346_v31 = vshll.u32 %v6118_v38, 16  ;;  %v4349_v63 = vshrl.u32 %v6119_v33, 16  ;;  %v4553_v38 = vshll.u32 %v7905_v45, 16 }
 0x2db   : > { %9428 = vst [vmem:[#allocation53_spill] sm:$0xff] %v7899_v46  ;;  %v4352_v46 = vshll.u32 %v6119_v33, 16  ;;  %v4448_v33 = vsel %vm991_vm9, %v7776_v28, %v7725_v34 }
 0x2dc   : > { %v4342_v14 = vor.u32 %v4340_v18, %v4339_v15  ;;  %v7928_v18 = vsel %vm6568_vm6, %v4339_v15, 4286578559  ;;  %v4695_v15 = vsel %vm1243_vm8, %v9433_v55, %v9432_v16  ;;  %v7949_v57 = vrot.slane %v4349_v63, 7 }
 0x2dd   : > { %5901 = vmatmul.mubr.msk.bf16.gmra.mxu0 %vm3021_vm14, %v7541_v0  ;;  %v4541_v0 = vshll.u32 %v7870_v60, 16  ;;  %v4565_v28 = vshll.u32 %v7928_v18, 16  ;;  %v4702_v55 = vrot.slane %v7761_v47, 1 }
 0x2de   : > { %5904 = vmatprep.mubr.msk.bf16.mxu0 %vm3021_vm14, %v7538_v26  ;;  %5935 = vmatmul.mubr.msk.bf16.gmra.mxu1 %vm3021_vm14, %v7538_v26  ;;  %v4336_v26 = vor.u32 %v4334_v62, %v4333_v22  ;;  %v7913_v62 = vor.u32 %v4538_v32, %v4534_v49  ;;  %v7918_v22 = vpop.f32.mrf.mxu0 }
 0x2df   : > { %5938 = vmatprep.mubr.msk.bf16.mxu1 %vm3021_vm14, %v7567_v2  ;;  %v7915_v39 = vrot.slane %v4541_v0, 1  ;;  %v4348_v0 = vor.u32 %v4346_v31, %v4345_v30  ;;  %v7947_v31 = vsel %vm6568_vm6, 4286578559, %v4342_v14 }
 0x2e0   : > { %v7911_v53 = vpop.f32.mrf.mxu1  ;;  %v7922_v51 = vsel %vm6568_vm6, 4286578559, %v4336_v26  ;;  %v9431_v26 = vshrl.u32 %v7729_v59, 16  ;;  %v7961_v14 = vpop.f32.mrf.mxu0 }
 0x2e1   : > { %9429 = vst [vmem:[#allocation54_spill] sm:$0xff] %v7911_v53  ;;  %v4548_v34 = vshll.u32 %v7922_v51, 16  ;;  %v7978_v53 = vsel %vm6568_vm6, 4286578559, %v4348_v0 }
 0x2e2   : > { %v7930_v32 = vpop.f32.mrf.mxu1  ;;  %v4455_v49 = vor.u32 %v7782_v5, %v9431_v26  ;;  %v4645_v5 = vmax.bf16 %v4448_v33, %v7695_v6  ;;  %v9435_v6 = vrot.slane %v7685_v25, 1  ;;  %v4354_v25 = vor.u32 %v4352_v46, %v7949_v57 }
 0x2e3   : > { %9430 = vst [vmem:[#allocation55_spill] sm:$0xff] %v7930_v32  ;;  %v7996_v0 = vrot.slane %v4548_v34, 1  ;;  %v8003_v46 = vsel %vm6568_vm6, %v4345_v30, 4286578559  ;;  %v6121_v34 = vld [vmem:[%s6305_s27 + $0x68] sm:$0xff]  }
 0x2e4   : > { %v4460_v63 = vsel %vm991_vm9, %v4455_v49, %v7736_v56  ;;  %v4698_v33 = vsel %vm1243_vm8, %v4696_v40, %v9435_v6  ;;  %v4757_v26 = vmax.bf16 %v4695_v15, %v4645_v5  ;;  %v7980_v56 = vpop.f32.mrf.mxu0  ;;  %v9365_v5 = vmov 4286578559  }
 0x2e5   : > { %5905 = vmatmul.mubr.msk.bf16.gmra.mxu0 %vm3021_vm14, %v7567_v2  ;;  %v7951_v2 = vpop.f32.mrf.mxu1  ;;  %v4646_v16 = vmax.bf16 %v4460_v63, %v7729_v59  ;;  %v4558_v63 = vshrl.u32 %v7947_v31, 16  ;;  %v7999_v6 = vrot.slane %v4565_v28, 1  ;;  %v9443_v28 = vshrl.u32 %v7761_v47, 16 }
 0x2e6   : > { %9434 = vst [vmem:[#allocation56_spill] sm:$0xff] %v7951_v2  ;;  %5908 = vmatprep.mubr.msk.bf16.mxu0 %vm3021_vm14, %v7564_v11  ;;  %5939 = vmatmul.mubr.msk.bf16.gmra.mxu1 %vm3021_vm14, %v7564_v11  ;;  %v7972_v11 = vrot.slane %v4553_v38, 1  ;;  %v4560_v2 = vshll.u32 %v7947_v31, 16  ;;  %v9438_v38 = vmax.bf16 %v7792_v52, %v7699_v58  ;;  %v7994_v40 = vmax.bf16 %v9365_v5, %v4757_v26  ;;  %v6120_v58 = vld [vmem:[%s6305_s27 + $0x70] sm:$0xff]   ;;  %v8012_v5 = vpop.f32.mrf.mxu0 }
 0x2e7   : > { %5942 = vmatprep.mubr.msk.bf16.mxu1 %vm3021_vm14, %v7623_v21  ;;  %v7982_v49 = vpop.f32.mrf.mxu1  ;;  %v7985_v59 = vmax.bf16 %v4698_v33, %v4646_v16  ;;  %v4572_v52 = vshll.u32 %v7978_v53, 16  ;;  %9441 = vst [vmem:[#allocation61_spill] sm:$0xff] %v8012_v5  ;;  %v4479_v32 = vor.u32 %v7826_v37, %v9443_v28 }
 0x2e8   : > { %9436 = vst [vmem:[#allocation57_spill] sm:$0xff] %v7982_v49  ;;  %v7991_v15 = vmax.bf16 %v7795_v50, %v9438_v38  ;;  %9439 = vst [vmem:[#allocation59_spill] sm:$0xff] %v7994_v40  ;;  %v4361_v50 = vshrl.u32 %v6120_v58, 16  ;;  %v4562_v38 = vrot.slane %v4560_v2, 1  ;;  %v8027_v2 = vsel %vm6568_vm6, 4286578559, %v4354_v25 }
 0x2e9   : > { %9437 = vst [vmem:[#allocation58_spill] sm:$0xff] %v7985_v59  ;;  %v4774_v33 = vmax.bf16 %v7985_v59, %v4757_v26  ;;  %v4355_v49 = vshrl.u32 %v6121_v34, 16  ;;  %v4484_v28 = vsel %vm991_vm9, %v4479_v32, %v7801_v29  ;;  %v4496_v25 = vsel %vm991_vm9, %v7850_v44, %v7828_v20  ;;  %v8058_v20 = vpop.f32.mrf.mxu0 }
 0x2ea   : > { %v4775_v26 = vmax.bf16 %v7991_v15, %v7985_v59  ;;  %v9446_v59 = vrot.slane %v7772_v35, 1  ;;  %v9447_v40 = vrot.slane %v7765_v3, 1  ;;  %v4363_v5 = vrot.slane %v4361_v50, 7 }
 0x2eb   : > { %v8005_v16 = vpop.f32.mrf.mxu1  ;;  %v8035_v37 = vmax.bf16 %v4774_v33, %v7991_v15  ;;  %v4364_v33 = vshll.u32 %v6120_v58, 16  ;;  %v4648_v29 = vmax.bf16 %v4484_v28, %v7761_v47  ;;  %v4584_v35 = vshll.u32 %v8027_v2, 16 }
 0x2ec   : > { %9440 = vst [vmem:[#allocation60_spill] sm:$0xff] %v8005_v16  ;;  %v4577_v16 = vshll.u32 %v8003_v46, 16  ;;  %v8060_v50 = vor.u32 %v4562_v38, %v4558_v63  ;;  %v8062_v47 = vrot.slane %v4572_v52, 1  ;;  %v4582_v28 = vshrl.u32 %v8027_v2, 16  ;;  %v6122_v63 = vld [vmem:[%s6305_s27 + $0x78] sm:$0xff]   ;;  %v8078_v52 = vpop.f32.mrf.mxu0  ;;  %s5232_s27 = sshll.u32 %s6366_s22, 4  ;;  %s9290_s27 = int_to_ptr.vmem [resolvable:$true] %s5232_s27 }
 0x2ed   : > { %5909 = vmatmul.mubr.msk.bf16.gmra.mxu0 %vm3021_vm14, %v7623_v21  ;;  %v8016_v30 = vpop.f32.mrf.mxu1  ;;  %9444 = vst [vmem:[#allocation63_spill] sm:$0xff] %v8035_v37  ;;  %v9445_v21 = vrot.slane %v7752_v4, 1  ;;  %v4649_v4 = vmax.bf16 %v4496_v25, %v7765_v3  ;;  %v8067_v3 = vsel %vm6568_vm6, %v7949_v57, 4286578559  ;;  %v4366_v44 = vor.u32 %v4364_v33, %v4363_v5  ;;  %p6130_p0 = scmp.lt.s32.totalorder %s9290_s27, %s6128_s16 }
 0x2ee   : > { %9442 = vst [vmem:[#allocation62_spill] sm:$0xff] %v8016_v30  ;;  %5912 = vmatprep.mubr.msk.bf16.mxu0 %vm3021_vm14, %v7639_v61  ;;  %5943 = vmatmul.mubr.msk.bf16.gmra.mxu1 %vm3021_vm14, %v7639_v61  ;;  %v4707_v61 = vsel %vm1243_vm8, %v9447_v40, %v9446_v59  ;;  %v4358_v59 = vshll.u32 %v6121_v34, 16  ;;  %v8070_v25 = vrot.slane %v4577_v16, 1  ;;  %v4367_v34 = vshrl.u32 %v6122_v63, 16 }
 0x2ef   : > { %v4704_v30 = vsel %vm1243_vm8, %v4702_v55, %v9445_v21  ;;  %v8050_v37 = vpop.f32.mrf.mxu1  ;;  %v4357_v55 = vrot.slane %v4355_v49, 7  ;;  %v4761_v58 = vmax.bf16 %v4707_v61, %v4649_v4  ;;  %v9450_v38 = vshrl.u32 %v7815_v43, 16 }
 0x2f0   : > { %9448 = vst [vmem:[#allocation64_spill] sm:$0xff] %v8050_v37  ;;  %v4760_v40 = vmax.bf16 %v4704_v30, %v4648_v29  ;;  %v4708_v30 = vrot.slane %v7815_v43, 1  ;;  %v4586_v16 = vrot.slane %v4584_v35, 1  ;;  %v4589_v33 = vshll.u32 %v8067_v3, 16 }
 0x2f1   : > { %v8072_v32 = vpop.f32.mrf.mxu1  ;;  %v4503_v57 = vor.u32 %v7874_v24, %v9450_v38  ;;  %v4360_v4 = vor.u32 %v4358_v59, %v4357_v55  ;;  %v9453_v38 = vrot.slane %v7789_v17, 1  ;;  %v4520_v59 = vsel %vm991_vm9, %v7895_v41, %v7887_v8 }
 0x2f2   : > { %9449 = vst [vmem:[#allocation65_spill] sm:$0xff] %v8072_v32  ;;  %v8074_v49 = vmax.bf16 %v4775_v26, %v4760_v40  ;;  %v4776_v61 = vmax.bf16 %v4760_v40, %v7991_v15  ;;  %v4777_v29 = vmax.bf16 %v4761_v58, %v4760_v40  ;;  %v8091_v15 = vsel %vm6568_vm6, %v4357_v55, 4286578559  ;;  %v8093_v32 = vpop.f32.mrf.mxu0 }
 0x2f3   : > { %v4508_v24 = vsel %vm991_vm9, %v4503_v57, %v7852_v48  ;;  %v4710_v35 = vsel %vm1243_vm8, %v4708_v30, %v9453_v38  ;;  %v8105_v40 = vsel %vm6568_vm6, 4286578559, %v4366_v44  ;;  %v9455_v48 = vrot.slane %v7834_v23, 1 }
 0x2f4   : > { %v8087_v26 = vmax.bf16 %v4776_v61, %v4761_v58  ;;  %v4650_v55 = vmax.bf16 %v4508_v24, %v7815_v43  ;;  %v9456_v17 = vrot.slane %v7806_v19, 1  ;;  %v8119_v8 = vsel %vm6568_vm6, %v4363_v5, 4286578559 }
 0x2f5   : > { %v8121_v41 = vrot.slane %v4367_v34, 7  ;;  %v4370_v44 = vshll.u32 %v6122_v63, 16  ;;  %v8123_v38 = vrot.slane %v4589_v33, 1  ;;  %v4608_v5 = vshll.u32 %v8105_v40, 16  ;;  %v8135_v34 = vpop.f32.mrf.mxu0 }
 0x2f6   : > { %v8085_v21 = vpop.f32.mrf.mxu1  ;;  %9452 = vst [vmem:[#allocation67_spill] sm:$0xff] %v8087_v26  ;;  %v4651_v26 = vmax.bf16 %v4520_v59, %v7806_v19  ;;  %v4713_v57 = vsel %vm1243_vm8, %v9456_v17, %v9455_v48  ;;  %v4762_v23 = vmax.bf16 %v4710_v35, %v4650_v55  ;;  %v8130_v19 = vor.u32 %v4586_v16, %v4582_v28 }
 0x2f7   : > { %9451 = vst [vmem:[#allocation66_spill] sm:$0xff] %v8085_v21  ;;  %v4601_v48 = vshll.u32 %v8091_v15, 16  ;;  %v8139_v63 = vsel %vm6568_vm6, 4286578559, %v4360_v4  ;;  %v4606_v16 = vshrl.u32 %v8105_v40, 16  ;;  %v8149_v55 = vor.u32 %v4370_v44, %v8121_v41 }
 0x2f8   : > { %v8107_v61 = vpop.f32.mrf.mxu1  ;;  %v8128_v59 = vmax.bf16 %v4713_v57, %v4651_v26  ;;  %v8144_v26 = vmax.bf16 %v4777_v29, %v4762_v23  ;;  %v4778_v28 = vmax.bf16 %v4762_v23, %v4761_v58  ;;  %v1673_v57 = vadd.f32 %v7581_v54, %v7583_v7  ;;  %v8156_v4 = vld [vmem:[%s9341_s4] ss:$0 sm:$0xff]  ;;  %v9462_v7 = vld [vmem:[#allocation20_spill] sm:$0xff] }
 0x2f9   : > { %9454 = vst [vmem:[#allocation68_spill] sm:$0xff] %v8107_v61  ;;  %v9461_v58 = vshrl.u32 %v7863_v9, 16  ;;  %v4714_v35 = vrot.slane %v7863_v9, 1  ;;  %v4610_v33 = vrot.slane %v4608_v5, 1  ;;  %v1665_v54 = vadd.f32 %v7586_v42, %v7590_v13 }
 0x2fa   : > { %v8126_v24 = vpop.f32.mrf.mxu1  ;;  %9459 = vst [vmem:[#allocation71_spill] sm:$0xff] %v8144_v26  ;;  %v8159_v29 = vmax.bf16 %v4778_v28, %v8128_v59  ;;  %v4779_v44 = vmax.bf16 %v8128_v59, %v4762_v23  ;;  %v8170_v26 = vpop.f32.mrf.mxu0  ;;  %v4544_v23 = vsel %vm991_vm9, %v7913_v62, %v7915_v39  ;;  %v9466_v42 = vrot.slane %v7870_v60, 1  ;;  %v9468_v39 = vld [vmem:[#allocation22_spill] sm:$0xff]  ;;  %v9469_v62 = vld [vmem:[#allocation21_spill] sm:$0xff] }
 0x2fb   : > { %9457 = vst [vmem:[#allocation69_spill] sm:$0xff] %v8126_v24  ;;  %v4527_v43 = vor.u32 %v7907_v1, %v9461_v58  ;;  %9464 = vst [vmem:[#allocation20_spill] sm:$0xff] %v8170_v26  ;;  %v9465_v1 = vrot.slane %v7856_v27, 1  ;;  %v9467_v13 = vrot.slane %v7839_v12, 1  ;;  %v1668_v60 = vadd.f32 %v9469_v62, %v9468_v39  ;;  %v9473_v27 = vld [vmem:[#allocation28_spill] sm:$0xff]  ;;  %v9474_v26 = vld [vmem:[#allocation29_spill] sm:$0xff] }
 0x2fc   : > { %v8142_v30 = vpop.f32.mrf.mxu1  ;;  %9460 = vst [vmem:[#allocation72_spill] sm:$0xff] %v8159_v29  ;;  %v9475_v39 = vld [vmem:[#allocation30_spill] sm:$0xff] }
 0x2fd   : > { %9458 = vst [vmem:[#allocation70_spill] sm:$0xff] %v8142_v30  ;;  %v9463_v30 = vld [vmem:[#allocation19_spill] sm:$0xff]  ;;  %v4532_v29 = vsel %vm991_vm9, %v4527_v43, %v7901_v10  ;;  %v4716_v58 = vsel %vm1243_vm8, %v4714_v35, %v9465_v1  ;;  %v4653_v10 = vmax.bf16 %v4544_v23, %v7839_v12  ;;  %v8190_v35 = vrot.slane %v4601_v48, 1  ;;  %v8194_v1 = vpop.f32.mrf.mxu0  ;;  %v9470_v12 = vld [vmem:[#allocation25_spill] sm:$0xff] }
 0x2fe   : > { %v5784_v17 = vpop.f32.mrf.mxu1  ;;  %v1676_v24 = vadd.f32 %v9463_v30, %v9462_v7  ;;  %v4719_v30 = vsel %vm1243_vm8, %v9467_v13, %v9466_v42  ;;  %v9472_v13 = vld [vmem:[#allocation26_spill] sm:$0xff]  ;;  %v1692_v62 = vadd.f32 %v9475_v39, %v9474_v26 }
 0x2ff   : > { %v1965_v61 = vadd.f32 %v5784_v17, %v1673_v57  ;;  %v4652_v57 = vmax.bf16 %v4532_v29, %v7863_v9  ;;  %v8197_v9 = vor.u32 %v4610_v33, %v4606_v16  ;;  %v9471_v29 = vld [vmem:[#allocation24_spill] sm:$0xff]  ;;  %v1681_v48 = vadd.f32 %v9473_v27, %v9472_v13  ;;  %v8205_v37 = vpop.f32.mrf.mxu0 }
 0x300   : > { %v1836_v28 = vpop.f32.mrf.mxu1  ;;  %v1689_v23 = vadd.f32 %v9471_v29, %v9470_v12  ;;  %v4765_v21 = vmax.bf16 %v4719_v30, %v4653_v10  ;;  %v4720_v30 = vrot.slane %v7922_v51, 1  ;;  %v9480_v13 = vld [vmem:[#allocation32_spill] sm:$0xff] }
 0x301   : > { %v2004_v17 = vadd.f32 %v8156_v4, %v1965_v61  ;;  %v1963_v5 = vadd.f32 %v1836_v28, %v1665_v54  ;;  %v4764_v28 = vmax.bf16 %v4716_v58, %v4652_v57  ;;  %v9476_v58 = vshrl.u32 %v7922_v51, 16  ;;  %v8231_v12 = vpop.f32.mrf.mxu0 }
 0x302   : > { %v5785_v7 = vpop.f32.mrf.mxu1 }
 0x303   : > { %v2036_v42 = vmax.f32 %v2004_v17, 0.0  ;;  %v2002_v61 = vadd.f32 %v8156_v4, %v1963_v5  ;;  %v1966_v54 = vadd.f32 %v5785_v7, %v1676_v24  ;;  %v8209_v24 = vmax.bf16 %v4779_v44, %v4764_v28 }
 0x304   : > { %v1839_v43 = vpop.f32.mrf.mxu1  ;;  %v4780_v16 = vmax.bf16 %v4764_v28, %v8128_v59  ;;  %v4551_v57 = vor.u32 %v7996_v0, %v9476_v58  ;;  %v4781_v10 = vmax.bf16 %v4765_v21, %v4764_v28  ;;  %v9477_v59 = vrot.slane %v7905_v45, 1  ;;  %v9479_v45 = vld [vmem:[#allocation31_spill] sm:$0xff] }
 0x305   : > { %v2005_v17 = vadd.f32 %v8156_v4, %v1966_v54  ;;  %v1964_v5 = vadd.f32 %v1839_v43, %v1668_v60  ;;  %2102 = vrot.lane.b32.xlu1 %v2036_v42, %s6187_s29  ;;  %v2034_v26 = vmax.f32 %v2002_v61, 0.0  ;;  %v4568_v0 = vsel %vm991_vm9, %v8060_v50, %v7999_v6 }
 0x306   : > { %v5788_v33 = vpop.f32.mrf.mxu1  ;;  %v8217_v60 = vmax.bf16 %v4780_v16, %v4765_v21  ;;  %v4556_v44 = vsel %vm991_vm9, %v4551_v57, %v7972_v11  ;;  %v4722_v42 = vsel %vm1243_vm8, %v4720_v30, %v9477_v59  ;;  %v9478_v61 = vshll.u32 %v8119_v8, 16  ;;  %v9488_v59 = vld [vmem:[#allocation37_spill] sm:$0xff] }
 0x307   : > { %v2037_v27 = vmax.f32 %v2005_v17, 0.0  ;;  %v2003_v7 = vadd.f32 %v8156_v4, %v1964_v5  ;;  %v1969_v54 = vadd.f32 %v5788_v33, %v1689_v23  ;;  %v4654_v11 = vmax.bf16 %v4556_v44, %v7922_v51  ;;  %v9484_v51 = vld [vmem:[#allocation34_spill] sm:$0xff]  ;;  %v9487_v44 = vld [vmem:[#allocation36_spill] sm:$0xff] }
 0x308   : > { %v1852_v43 = vpop.f32.mrf.mxu1  ;;  %v8229_v28 = vrot.slane %v9478_v61, 1  ;;  %v1684_v39 = vadd.f32 %v9480_v13, %v9479_v45  ;;  %v4655_v50 = vmax.bf16 %v4568_v0, %v7947_v31  ;;  %v9481_v5 = vrot.slane %v7928_v18, 1  ;;  %v8253_v45 = vpop.f32.mrf.mxu0 }
 0x309   : > { %v2008_v29 = vadd.f32 %v8156_v4, %v1969_v54  ;;  %v1967_v23 = vadd.f32 %v1852_v43, %v1681_v48  ;;  %2104 = vrot.lane.b32.xlu0 %v2037_v27, %s6187_s29  ;;  %2098 = vrot.lane.b32.xlu1 %v2034_v26, %s6187_s29  ;;  %v2035_v17 = vmax.f32 %v2003_v7, 0.0  ;;  %v9482_v33 = vrot.slane %v7947_v31, 1  ;;  %v9483_v26 = vld [vmem:[#allocation33_spill] sm:$0xff]  ;;  %v9485_v54 = vld [vmem:[#allocation35_spill] sm:$0xff]  ;;  %v9486_v43 = vld [vmem:[#allocation6_spill] sm:$0xff] }
 0x30a   : > { %v5789_v6 = vpop.f32.mrf.mxu1  ;;  %v4766_v30 = vmax.bf16 %v4722_v42, %v4654_v11  ;;  %v1705_v27 = vadd.f32 %v9484_v51, %v9483_v26  ;;  %v1697_v7 = vadd.f32 %v9486_v43, %v9485_v54  ;;  %v1708_v0 = vadd.f32 %v9488_v59, %v9487_v44  ;;  %v8277_v51 = vpop.f32.mrf.mxu0  ;;  %v9493_v43 = vld [vmem:[#allocation40_spill] sm:$0xff] }
 0x30b   : > { %v4725_v16 = vsel %vm1243_vm8, %v9482_v33, %v9481_v5  ;;  %v2040_v48 = vmax.f32 %v2008_v29, 0.0  ;;  %v2006_v58 = vadd.f32 %v8156_v4, %v1967_v23  ;;  %v1970_v57 = vadd.f32 %v5789_v6, %v1692_v62 }
 0x30c   : > { %v1855_v61 = vpop.f32.mrf.mxu1  ;;  %v4767_v18 = vmax.bf16 %v4725_v16, %v4655_v50  ;;  %v4735_v31 = vrot.slane %v8105_v40, 1  ;;  %v8258_v62 = vmax.bf16 %v4781_v10, %v4766_v30  ;;  %v4782_v11 = vmax.bf16 %v4766_v30, %v4765_v21 }
 0x30d   : > { %v2009_v29 = vadd.f32 %v8156_v4, %v1970_v57  ;;  %v1968_v23 = vadd.f32 %v1855_v61, %v1684_v39  ;;  %2100 = vrot.lane.b32.xlu0 %v2035_v17, %s6187_s29  ;;  %2110 = vrot.lane.b32.xlu1 %v2040_v48, %s6187_s29  ;;  %v9489_v13 = vshrl.u32 %v7978_v53, 16  ;;  %v4726_v50 = vrot.slane %v7978_v53, 1 }
 0x30e   : > { %v5792_v42 = vpop.f32.mrf.mxu1  ;;  %v4783_v5 = vmax.bf16 %v4767_v18, %v4766_v30  ;;  %v2038_v33 = vmax.f32 %v2006_v58, 0.0  ;;  %v8265_v17 = vmax.bf16 %v4782_v11, %v4767_v18  ;;  %v9490_v21 = vrot.slane %v8003_v46, 1 }
 0x30f   : > { %v4575_v6 = vor.u32 %v8062_v47, %v9489_v13  ;;  %v2041_v16 = vmax.f32 %v2009_v29, 0.0  ;;  %v2007_v57 = vadd.f32 %v8156_v4, %v1968_v23  ;;  %v1973_v39 = vadd.f32 %v5792_v42, %v1705_v27 }
 0x310   : > { %v1868_v26 = vpop.f32.mrf.mxu1  ;;  %v4728_v48 = vsel %vm1243_vm8, %v4726_v50, %v9490_v21  ;;  %v4592_v47 = vsel %vm991_vm9, %v8130_v19, %v8123_v38  ;;  %v9491_v58 = vshll.u32 %v8139_v63, 16  ;;  %v9494_v19 = vrot.slane %v8067_v3, 1  ;;  %v9497_v50 = vld [vmem:[#allocation42_spill] sm:$0xff] }
 0x311   : > { %v4580_v10 = vsel %vm991_vm9, %v4575_v6, %v8070_v25  ;;  %v2012_v27 = vadd.f32 %v8156_v4, %v1973_v39  ;;  %v1971_v54 = vadd.f32 %v1868_v26, %v1697_v7  ;;  %2112 = vrot.lane.b32.xlu0 %v2041_v16, %s6187_s29  ;;  %2106 = vrot.lane.b32.xlu1 %v2038_v33, %s6187_s29  ;;  %v9492_v25 = vld [vmem:[#allocation38_spill] sm:$0xff]  ;;  %v2039_v59 = vmax.f32 %v2007_v57, 0.0  ;;  %v8291_v7 = vpop.f32.mrf.mxu0  ;;  %v9496_v6 = vld [vmem:[#allocation39_spill] sm:$0xff]  ;;  %v9498_v16 = vld [vmem:[#allocation41_spill] sm:$0xff] }
 0x312   : > { %v4598_v30 = vrot.slane %v9491_v58, 1  ;;  %v4656_v46 = vmax.bf16 %v4580_v10, %v7978_v53  ;;  %v1700_v44 = vadd.f32 %v9493_v43, %v9492_v25  ;;  %v5793_v61 = vpop.f32.mrf.mxu1  ;;  %v4657_v38 = vmax.bf16 %v4592_v47, %v8027_v2  ;;  %v9499_v57 = vld [vmem:[#allocation44_spill] sm:$0xff]  ;;  %v9500_v26 = vld [vmem:[#allocation43_spill] sm:$0xff]  ;;  %v9501_v10 = vld [vmem:[#allocation46_spill] sm:$0xff] }
 0x313   : > { %v9495_v29 = vrot.slane %v8027_v2, 1  ;;  %v2044_v42 = vmax.f32 %v2012_v27, 0.0  ;;  %v2010_v11 = vadd.f32 %v8156_v4, %v1971_v54  ;;  %v1974_v13 = vadd.f32 %v5793_v61, %v1708_v0 }
 0x314   : > { %v4768_v53 = vmax.bf16 %v4728_v48, %v4656_v46  ;;  %v1721_v33 = vadd.f32 %v9497_v50, %v9496_v6  ;;  %v1713_v39 = vadd.f32 %v9499_v57, %v9498_v16  ;;  %v1724_v3 = vadd.f32 %v9501_v10, %v9500_v26  ;;  %v1871_v21 = vpop.f32.mrf.mxu1  ;;  %v9505_v50 = vld [vmem:[#allocation49_spill] sm:$0xff] }
 0x315   : > { %v4731_v23 = vsel %vm1243_vm8, %v9495_v29, %v9494_v19  ;;  %v8305_v47 = vsel %vm6568_vm6, %v8121_v41, 4286578559  ;;  %v2013_v0 = vadd.f32 %v8156_v4, %v1974_v13  ;;  %v1972_v48 = vadd.f32 %v1871_v21, %v1700_v44  ;;  %2108 = vrot.lane.b32.xlu0 %v2039_v59, %s6187_s29  ;;  %2118 = vrot.lane.b32.xlu1 %v2044_v42, %s6187_s29  ;;  %v8316_v41 = vpop.f32.mrf.mxu0 }
 0x316   : > { %v8300_v2 = vmax.bf16 %v4731_v23, %v4657_v38  ;;  %v8310_v58 = vmax.bf16 %v4783_v5, %v4768_v53  ;;  %v5796_v27 = vpop.f32.mrf.mxu1  ;;  %v4784_v54 = vmax.bf16 %v4768_v53, %v4767_v18  ;;  %v9502_v46 = vshrl.u32 %v8139_v63, 16 }
 0x317   : > { %v4732_v43 = vrot.slane %v8139_v63, 1  ;;  %v2042_v38 = vmax.f32 %v2010_v11, 0.0  ;;  %v2045_v19 = vmax.f32 %v2013_v0, 0.0  ;;  %v2011_v44 = vadd.f32 %v8156_v4, %v1972_v48  ;;  %v9507_v0 = vld [vmem:[#allocation47_spill] sm:$0xff]  ;;  %v9508_v48 = vld [vmem:[#allocation50_spill] sm:$0xff] }
 0x318   : > { %v4599_v25 = vor.u32 %v4598_v30, %v9502_v46  ;;  %v4785_v61 = vmax.bf16 %v8300_v2, %v4768_v53  ;;  %v1977_v59 = vadd.f32 %v5796_v27, %v1721_v33  ;;  %v1884_v29 = vpop.f32.mrf.mxu1  ;;  %v8320_v5 = vmax.bf16 %v4784_v54, %v8300_v2  ;;  %v9509_v54 = vld [vmem:[#allocation48_spill] sm:$0xff] }
 0x319   : > { %v9503_v30 = vrot.slane %v8091_v15, 1  ;;  %v4616_v42 = vsel %vm991_vm9, %v8197_v9, %v8229_v28  ;;  %v4625_v11 = vshll.u32 %v8305_v47, 16  ;;  %v1975_v53 = vadd.f32 %v1884_v29, %v1713_v39  ;;  %2120 = vrot.lane.b32.xlu0 %v2045_v19, %s6187_s29  ;;  %2114 = vrot.lane.b32.xlu1 %v2042_v38, %s6187_s29  ;;  %v8343_v39 = vpop.f32.mrf.mxu0  ;;  %v9510_v46 = vld [vmem:[#allocation52_spill] sm:$0xff] }
 0x31a   : > { %v4604_v18 = vsel %vm991_vm9, %v4599_v25, %v8190_v35  ;;  %v2016_v13 = vadd.f32 %v8156_v4, %v1977_v59  ;;  %v9504_v35 = vld [vmem:[#allocation45_spill] sm:$0xff]  ;;  %v2043_v33 = vmax.f32 %v2011_v44, 0.0  ;;  %v5797_v16 = vpop.f32.mrf.mxu1  ;;  %v4659_v57 = vmax.bf16 %v4616_v42, %v8105_v40  ;;  %v3406_v40 = vpop.permute.xlu0 %3405 }
 0x31b   : > { %v4734_v23 = vsel %vm1243_vm8, %v4732_v43, %v9503_v30  ;;  %v4658_v6 = vmax.bf16 %v4604_v18, %v8139_v63  ;;  %v1716_v15 = vadd.f32 %v9505_v50, %v9504_v35  ;;  %v9506_v9 = vrot.slane %v8119_v8, 1  ;;  %v9511_v43 = vld [vmem:[#allocation51_spill] sm:$0xff]  ;;  %v9512_v18 = vld [vmem:[#allocation53_spill] sm:$0xff] }
 0x31c   : > { %v2048_v26 = vmax.f32 %v2016_v13, 0.0  ;;  %v2014_v10 = vadd.f32 %v8156_v4, %v1975_v53  ;;  %v1978_v21 = vadd.f32 %v5797_v16, %v1724_v3  ;;  %v1737_v27 = vadd.f32 %v9508_v48, %v9507_v0  ;;  %v1887_v38 = vpop.f32.mrf.mxu1  ;;  %v8371_v53 = vpop.f32.mrf.mxu0 }
 0x31d   : > { %v4737_v28 = vsel %vm1243_vm8, %v4735_v31, %v9506_v9  ;;  %v8346_v63 = vmax.bf16 %v4734_v23, %v4658_v6  ;;  %v1729_v25 = vadd.f32 %v9510_v46, %v9509_v54  ;;  %v1740_v8 = vadd.f32 %v7918_v22, %v9511_v43  ;;  %2116 = vrot.lane.b32.xlu0 %v2043_v33, %s6187_s29  ;;  %v3399_v3 = vpop.permute.xlu1 %3398  ;;  %v9513_v22 = vld [vmem:[#allocation18_spill] sm:$0xff] }
 0x31e   : > { %v8354_v31 = vmax.bf16 %v4737_v28, %v4659_v57  ;;  %v4627_v19 = vrot.slane %v4625_v11, 1  ;;  %v2017_v44 = vadd.f32 %v8156_v4, %v1978_v21  ;;  %v1976_v59 = vadd.f32 %v1887_v38, %v1716_v15  ;;  %2126 = vrot.lane.b32.xlu1 %v2048_v26, %s6187_s29  ;;  %v5800_v42 = vpop.f32.mrf.mxu1  ;;  %v3422_v21 = vpop.permute.xlu0 %3421 }
 0x31f   : > { %v8360_v29 = vmax.bf16 %v4785_v61, %v8346_v63  ;;  %v1732_v30 = vadd.f32 %v7961_v14, %v9512_v18  ;;  %v3424_v23 = vsel %vm2846_vm12, %v9513_v22, %v3399_v3  ;;  %v4786_v11 = vmax.bf16 %v8346_v63, %v8300_v2  ;;  %v8378_v2 = vpop.f32.mrf.mxu0  ;;  %v9516_v22 = vld [vmem:[#allocation61_spill] sm:$0xff] }
 0x320   : > { %v4420_v13 = vsel %vm6568_vm6, 4286578559, %v8149_v55  ;;  %v2046_v6 = vmax.f32 %v2014_v10, 0.0  ;;  %v2049_v35 = vmax.f32 %v2017_v44, 0.0  ;;  %v2015_v61 = vadd.f32 %v8156_v4, %v1976_v59  ;;  %v1900_v15 = vpop.f32.mrf.mxu1 }
 0x321   : > { %v1981_v50 = vadd.f32 %v5800_v42, %v1737_v27  ;;  %v3426_v14 = vsel %vm453_vm1, %v3424_v23, %v3406_v40  ;;  %v8376_v33 = vmax.bf16 %v4786_v11, %v8354_v31  ;;  %v4618_v16 = vshrl.u32 %v4420_v13, 16  ;;  %v3417_v9 = vpop.permute.xlu1 %3416  ;;  %v8397_v59 = vpop.f32.mrf.mxu0  ;;  %v9517_v11 = vld [vmem:[#allocation8_spill] sm:$0xff] }
 0x322   : > { %v4620_v57 = vshll.u32 %v4420_v13, 16  ;;  %v1979_v55 = vadd.f32 %v1900_v15, %v1729_v25  ;;  %2128 = vrot.lane.b32.xlu0 %v2049_v35, %s6187_s29  ;;  %2122 = vrot.lane.b32.xlu1 %v2046_v6, %s6187_s29  ;;  %v4739_v28 = vrot.slane %v8305_v47, 1  ;;  %v4787_v26 = vmax.bf16 %v8354_v31, %v8346_v63  ;;  %v5801_v48 = vpop.f32.mrf.mxu1  ;;  %v9514_v63 = vld [vmem:[#allocation54_spill] sm:$0xff]  ;;  %v9518_v6 = vld [vmem:[#allocation7_spill] sm:$0xff] }
 0x323   : > { %v2020_v36 = vadd.f32 %v8156_v4, %v1981_v50  ;;  %v2047_v10 = vmax.f32 %v2015_v61, 0.0  ;;  %v3428_v0 = vsel %vm2907_vm13, %v3426_v14, %v3417_v9  ;;  %v4738_v54 = vrot.slane %v4420_v13, 1  ;;  %v9519_v14 = vld [vmem:[#allocation59_spill] sm:$0xff] }
 0x324   : > { %v4622_v27 = vrot.slane %v4620_v57, 1  ;;  %v2018_v25 = vadd.f32 %v8156_v4, %v1979_v55  ;;  %v8389_v43 = vsel %vm715_vm2, %v3428_v0, %v3422_v21  ;;  %v1982_v40 = vadd.f32 %v5801_v48, %v1740_v8  ;;  %v1903_v38 = vpop.f32.mrf.mxu1  ;;  %v9515_v8 = vld [vmem:[#allocation55_spill] sm:$0xff]  ;;  %v9522_v55 = vld [vmem:[#allocation56_spill] sm:$0xff]  ;;  %v8417_v21 = vpop.f32.mrf.mxu0  ;;  %v9523_v48 = vld [vmem:[#allocation57_spill] sm:$0xff] }
 0x325   : > { %v2052_v46 = vmax.f32 %v2020_v36, 0.0  ;;  %5913 = vmatmul.mubr.msk.bf16.gmra.mxu0 %vm3021_vm14, %v8389_v43  ;;  %5946 = vmatprep.mubr.msk.bf16.mxu1 %vm3021_vm14, %v8389_v43  ;;  %v1753_v44 = vadd.f32 %v7980_v56, %v9514_v63  ;;  %v1980_v18 = vadd.f32 %v1903_v38, %v1732_v30  ;;  %v1745_v23 = vadd.f32 %v9516_v22, %v9515_v8  ;;  %v9526_v22 = vld [vmem:[#allocation62_spill] sm:$0xff] }
 0x326   : > { %v4623_v47 = vor.u32 %v4622_v27, %v4618_v16  ;;  %v2021_v3 = vadd.f32 %v8156_v4, %v1982_v40  ;;  %2124 = vrot.lane.b32.xlu0 %v2047_v10, %s6187_s29  ;;  %v2050_v42 = vmax.f32 %v2018_v25, 0.0  ;;  %5947 = vmatmul.mubr.msk.bf16.gmra.mxu1 %vm3021_vm14, %v9517_v11  ;;  %v5804_v56 = vpop.f32.mrf.mxu1  ;;  %v4740_v61 = vsel %vm1243_vm8, %v4738_v54, %v4739_v28  ;;  %v9520_v16 = vld [vmem:[#allocation58_spill] sm:$0xff] }
 0x327   : > { %2134 = vrot.lane.b32.xlu1 %v2052_v46, %s6187_s29  ;;  %5952 = vmatprep.mubr.msk.bf16.mxu0 %vm3021_vm14, %v9518_v6  ;;  %v2019_v50 = vadd.f32 %v8156_v4, %v1980_v18  ;;  %v1985_v15 = vadd.f32 %v5804_v56, %v1753_v44  ;;  %v9521_v57 = vmax.bf16 %v9519_v14, %v9520_v16  ;;  %v9525_v44 = vld [vmem:[#allocation60_spill] sm:$0xff]  ;;  %v9528_v6 = vld [vmem:[#allocation63_spill] sm:$0xff] }
 0x328   : > { %v4628_v35 = vsel %vm991_vm9, %v4623_v47, %v4627_v19  ;;  %v2053_v30 = vmax.f32 %v2021_v3, 0.0  ;;  %v1756_v9 = vadd.f32 %v8058_v20, %v9522_v55  ;;  %v1916_v10 = vpop.f32.mrf.mxu1  ;;  %v1748_v27 = vadd.f32 %v8078_v52, %v9523_v48  ;;  %v9524_v47 = vld [vmem:[#allocation10_spill] sm:$0xff]  ;;  %v8436_v52 = vpop.f32.mrf.mxu0 }
 0x329   : > { %5986 = vmatprep.mubr.msk.bf16.mxu1 %vm453_vm1, %v9521_v57  ;;  %v4660_v36 = vmax.bf16 %v4628_v35, %v4420_v13  ;;  %v2024_v19 = vadd.f32 %v8156_v4, %v1985_v15  ;;  %v1983_v0 = vadd.f32 %v1916_v10, %v1745_v23  ;;  %v2051_v54 = vmax.f32 %v2019_v50, 0.0  ;;  %v9529_v15 = vld [vmem:[#allocation64_spill] sm:$0xff] }
 0x32a   : > { %2136 = vrot.lane.b32.xlu0 %v2053_v30, %s6187_s29  ;;  %v5805_v13 = vpop.f32.mrf.mxu1  ;;  %v1769_v3 = vadd.f32 %v8093_v32, %v9525_v44  ;;  %v1761_v23 = vadd.f32 %v8135_v34, %v9526_v22  ;;  %v8447_v32 = vpop.f32.mrf.mxu0  ;;  %v9530_v34 = vld [vmem:[#allocation20_spill] sm:$0xff] }
 0x32b   : > { %2130 = vrot.lane.b32.xlu1 %v2050_v42, %s6187_s29  ;;  %v8422_v28 = vmax.bf16 %v4740_v61, %v4660_v36  ;;  %v2056_v46 = vmax.f32 %v2024_v19, 0.0  ;;  %v2022_v20 = vadd.f32 %v8156_v4, %v1983_v0  ;;  %v1986_v25 = vadd.f32 %v5805_v13, %v1756_v9  ;;  %v9527_v42 = vld [vmem:[#allocation9_spill] sm:$0xff]  ;;  %v9533_v13 = vld [vmem:[#allocation66_spill] sm:$0xff] }
 0x32c   : > { %v1919_v38 = vpop.f32.mrf.mxu1  ;;  %v1772_v14 = vadd.f32 %v9530_v34, %v9529_v15  ;;  %v9531_v36 = vld [vmem:[#allocation65_spill] sm:$0xff]  ;;  %v8459_v10 = vpop.f32.mrf.mxu0 }
 0x32d   : > { %v4788_v40 = vmax.bf16 %v8422_v28, %v8354_v31  ;;  %5953 = vmatmul.mubr.msk.bf16.vlgmr.msra.gmra.mxu0 %vm3021_vm14, %v9524_v47  ;;  %v8432_v63 = vmax.bf16 %v4787_v26, %v8422_v28  ;;  %v2025_v18 = vadd.f32 %v8156_v4, %v1986_v25  ;;  %v1984_v8 = vadd.f32 %v1919_v38, %v1748_v27  ;;  %v9535_v47 = vld [vmem:[#allocation11_spill] sm:$0xff] }
 0x32e   : > { %2132 = vrot.lane.b32.xlu0 %v2051_v54, %s6187_s29  ;;  %5956 = vmatprep.mubr.msk.bf16.mxu0 %vm3021_vm14, %v9527_v42  ;;  %v5808_v26 = vpop.f32.mrf.mxu1  ;;  %v2054_v56 = vmax.f32 %v2022_v20, 0.0  ;;  %v1764_v55 = vadd.f32 %v8194_v1, %v9531_v36  ;;  %v9532_v54 = vld [vmem:[#allocation12_spill] sm:$0xff]  ;;  %v9537_v42 = vld [vmem:[#allocation71_spill] sm:$0xff] }
 0x32f   : > { %2142 = vrot.lane.b32.xlu1 %v2056_v46, %s6187_s29  ;;  %5987 = vmatmul.mubr.msk.bf16.vlgmr.msra.gmra.mxu1 %vm453_vm1, %v9528_v6  ;;  %v2057_v35 = vmax.f32 %v2025_v18, 0.0  ;;  %v2023_v61 = vadd.f32 %v8156_v4, %v1984_v8  ;;  %v1989_v30 = vadd.f32 %v5808_v26, %v1769_v3  ;;  %v1785_v46 = vadd.f32 %v8205_v37, %v9533_v13  ;;  %v9534_v1 = vld [vmem:[#allocation68_spill] sm:$0xff]  ;;  %v9536_v3 = vld [vmem:[#allocation67_spill] sm:$0xff]  ;;  %v8475_v18 = vpop.f32.mrf.mxu0  ;;  %v9538_v6 = vld [vmem:[#allocation69_spill] sm:$0xff] }
 0x330   : > { %5990 = vmatprep.mubr.msk.bf16.mxu1 %vm453_vm1, %v8074_v49  ;;  %v1932_v50 = vpop.f32.mrf.mxu1  ;;  %v1777_v38 = vadd.f32 %v8231_v12, %v9534_v1  ;;  %v1788_v12 = vadd.f32 %v8253_v45, %v9538_v6  ;;  %v9540_v45 = vld [vmem:[#allocation13_spill] sm:$0xff] }
 0x331   : > { %v2028_v16 = vadd.f32 %v8156_v4, %v1989_v30  ;;  %v1987_v57 = vadd.f32 %v1932_v50, %v1761_v23  ;;  %v2055_v19 = vmax.f32 %v2023_v61, 0.0  ;;  %v9539_v61 = vld [vmem:[#allocation70_spill] sm:$0xff]  ;;  %v8487_v15 = vpop.f32.mrf.mxu0 }
 0x332   : > { %2144 = vrot.lane.b32.xlu0 %v2057_v35, %s6187_s29  ;;  %v5809_v9 = vpop.f32.mrf.mxu1  ;;  %v1780_v30 = vadd.f32 %v8277_v51, %v9539_v61  ;;  %v9541_v51 = vld [vmem:[#allocation5_spill] sm:$0xff]  ;;  %v9552_v61 = vld [vmem:[#allocation27_spill] sm:$0xff] }
 0x333   : > { %2138 = vrot.lane.b32.xlu1 %v2054_v56, %s6187_s29  ;;  %v2060_v0 = vmax.f32 %v2028_v16, 0.0  ;;  %v2026_v49 = vadd.f32 %v8156_v4, %v1987_v57  ;;  %v1990_v48 = vadd.f32 %v5809_v9, %v1772_v14 }
 0x334   : > { %v1935_v27 = vpop.f32.mrf.mxu1 }
 0x335   : > { %5957 = vmatmul.mubr.msk.bf16.gmra.mxu0 %vm3021_vm14, %v9532_v54  ;;  %v2029_v20 = vadd.f32 %v8156_v4, %v1990_v48  ;;  %v1988_v25 = vadd.f32 %v1935_v27, %v1764_v55  ;;  %v2058_v37 = vmax.f32 %v2026_v49, 0.0  ;;  %v8492_v55 = vpop.f32.mrf.mxu0  ;;  %v9542_v49 = vld [vmem:[#allocation72_spill] sm:$0xff] }
 0x336   : > { %2140 = vrot.lane.b32.xlu0 %v2055_v19, %s6187_s29  ;;  %5960 = vmatprep.mubr.msk.bf16.mxu0 %vm3021_vm14, %v9535_v47  ;;  %v5812_v44 = vpop.f32.mrf.mxu1 }
 0x337   : > { %2150 = vrot.lane.b32.xlu1 %v2060_v0, %s6187_s29  ;;  %5991 = vmatmul.mubr.msk.bf16.gmra.mxu1 %vm453_vm1, %v9536_v3  ;;  %v2061_v8 = vmax.f32 %v2029_v20, 0.0  ;;  %v2027_v22 = vadd.f32 %v8156_v4, %v1988_v25  ;;  %v1993_v23 = vadd.f32 %v5812_v44, %v1785_v46  ;;  %v8508_v46 = vpop.f32.mrf.mxu0 }
 0x338   : > { %5994 = vmatprep.mubr.msk.bf16.mxu1 %vm453_vm1, %v9537_v42  ;;  %v1948_v26 = vpop.f32.mrf.mxu1  ;;  %v9548_v42 = vld [vmem:[#allocation16_spill] sm:$0xff] }
 0x339   : > { %v2032_v56 = vadd.f32 %v8156_v4, %v1993_v23  ;;  %v1991_v35 = vadd.f32 %v1948_v26, %v1777_v38  ;;  %v2059_v34 = vmax.f32 %v2027_v22, 0.0  ;;  %v9543_v38 = vld [vmem:[#allocation15_spill] sm:$0xff]  ;;  %v9547_v23 = vld [vmem:[#allocation17_spill] sm:$0xff] }
 0x33a   : > { %2152 = vrot.lane.b32.xlu0 %v2061_v8, %s6187_s29  ;;  %v5813_v50 = vpop.f32.mrf.mxu1 }
 0x33b   : > { %2146 = vrot.lane.b32.xlu1 %v2058_v37, %s6187_s29  ;;  %v2064_v14 = vmax.f32 %v2032_v56, 0.0  ;;  %v2030_v16 = vadd.f32 %v8156_v4, %v1991_v35  ;;  %v1994_v57 = vadd.f32 %v5813_v50, %v1788_v12  ;;  %v9551_v35 = vld [vmem:[#allocation23_spill] sm:$0xff] }
 0x33c   : > { %v1951_v36 = vpop.f32.mrf.mxu1 }
 0x33d   : > { %5961 = vmatmul.mubr.msk.bf16.gmra.mxu0 %vm3021_vm14, %v9540_v45  ;;  %v2033_v9 = vadd.f32 %v8156_v4, %v1994_v57  ;;  %v1992_v19 = vadd.f32 %v1951_v36, %v1780_v30  ;;  %v2062_v48 = vmax.f32 %v2030_v16, 0.0 }
 0x33e   : > { %2148 = vrot.lane.b32.xlu0 %v2059_v34, %s6187_s29  ;;  %5964 = vmatprep.mubr.msk.bf16.mxu0 %vm3021_vm14, %v9541_v51  ;;  %v8499_v0 = vpop.f32.mrf.mxu1 }
 0x33f   : > { %2158 = vrot.lane.b32.xlu1 %v2064_v14, %s6187_s29  ;;  %5995 = vmatmul.mubr.msk.bf16.gmra.mxu1 %vm453_vm1, %v9542_v49  ;;  %v2065_v27 = vmax.f32 %v2033_v9, 0.0  ;;  %v2031_v54 = vadd.f32 %v8156_v4, %v1992_v19  ;;  %v8518_v4 = vpop.f32.mrf.mxu0 }
 0x340   : > { %5998 = vmatprep.mubr.msk.bf16.mxu1 %vm453_vm1, %v8209_v24  ;;  %v8506_v13 = vpop.f32.mrf.mxu1  ;;  %v9544_v24 = vld [vmem:[#allocation14_spill] sm:$0xff] }
 0x341   : > { %v2063_v25 = vmax.f32 %v2031_v54, 0.0  ;;  %v8531_v3 = vpop.f32.mrf.mxu0 }
 0x342   : > { %2160 = vrot.lane.b32.xlu0 %v2065_v27, %s6187_s29  ;;  %v8512_v20 = vpop.f32.mrf.mxu1  ;;  %9545 = vst [vmem:[#allocation19_spill] sm:$0xff] %v8531_v3 }
 0x343   : > { %2154 = vrot.lane.b32.xlu1 %v2062_v48, %s6187_s29  ;;  %v8535_v8 = vpop.f32.mrf.mxu0 }
 0x344   : > { %v8514_v1 = vpop.f32.mrf.mxu1  ;;  %9546 = vst [vmem:[#allocation22_spill] sm:$0xff] %v8535_v8 }
 0x345   : > { %5965 = vmatmul.mubr.msk.bf16.gmra.mxu0 %vm3021_vm14, %v9543_v38 }
 0x346   : > { %2156 = vrot.lane.b32.xlu0 %v2063_v25, %s6187_s29  ;;  %5968 = vmatprep.mubr.msk.bf16.mxu0 %vm3021_vm14, %v9544_v24  ;;  %v8523_v47 = vpop.f32.mrf.mxu1 }
 0x347   : > { %5999 = vmatmul.mubr.msk.bf16.gmra.mxu1 %vm453_vm1, %v8217_v60 }
 0x348   : > { %6002 = vmatprep.mubr.msk.bf16.mxu1 %vm453_vm1, %v8258_v62  ;;  %v8529_v44 = vpop.f32.mrf.mxu1  ;;  %v8547_v62 = vpop.f32.mrf.mxu0 }
 0x349   : > { %9549 = vst [vmem:[#allocation21_spill] sm:$0xff] %v8547_v62 }
 0x34a   : > { %v8533_v37 = vpop.f32.mrf.mxu1  ;;  %v8555_v12 = vpop.f32.mrf.mxu0 }
 0x34b   : > { %9550 = vst [vmem:[#allocation25_spill] sm:$0xff] %v8555_v12 }
 0x34c   : > { %v8537_v22 = vpop.f32.mrf.mxu1 }
 0x34d   : > { %5969 = vmatmul.mubr.msk.bf16.gmra.mxu0 %vm3021_vm14, %v9547_v23 }
 0x34e   : > { %5972 = vmatprep.mubr.msk.bf16.mxu0 %vm3021_vm14, %v9548_v42  ;;  %v8543_v60 = vpop.f32.mrf.mxu1 }
 0x34f   : > { %6003 = vmatmul.mubr.msk.bf16.gmra.mxu1 %vm453_vm1, %v8265_v17 }
 0x350   : > { %6006 = vmatprep.mubr.msk.bf16.mxu1 %vm453_vm1, %v8310_v58  ;;  %v8551_v26 = vpop.f32.mrf.mxu1  ;;  %v8567_v58 = vpop.f32.mrf.mxu0 }
 0x351   : > { %9553 = vst [vmem:[#allocation24_spill] sm:$0xff] %v8567_v58 }
 0x352   : > { %v8553_v6 = vpop.f32.mrf.mxu1  ;;  %v8573_v50 = vpop.f32.mrf.mxu0 }
 0x353   : > { %9554 = vst [vmem:[#allocation26_spill] sm:$0xff] %v8573_v50 }
 0x354   : > { %v8557_v56 = vpop.f32.mrf.mxu1  ;;  %v8581_v16 = vpop.f32.mrf.mxu0 }
 0x355   : > { %5973 = vmatmul.mubr.msk.bf16.gmra.mxu0 %vm3021_vm14, %v9551_v35  ;;  %9557 = vst [vmem:[#allocation30_spill] sm:$0xff] %v8581_v16 }
 0x356   : > { %5976 = vmatprep.mubr.msk.bf16.mxu0 %vm3021_vm14, %v9552_v61  ;;  %v8563_v17 = vpop.f32.mrf.mxu1  ;;  %v8593_v57 = vpop.f32.mrf.mxu0 }
 0x357   : > { %6007 = vmatmul.mubr.msk.bf16.gmra.mxu1 %vm453_vm1, %v8320_v5  ;;  %9560 = vst [vmem:[#allocation33_spill] sm:$0xff] %v8593_v57 }
 0x358   : > { %6010 = vmatprep.mubr.msk.bf16.mxu1 %vm453_vm1, %v8360_v29  ;;  %v8571_v30 = vpop.f32.mrf.mxu1 }
 0x35a   : > { %v8575_v34 = vpop.f32.mrf.mxu1 }
 0x35b   : > { %9555 = vst [vmem:[#allocation28_spill] sm:$0xff] %v8575_v34 }
 0x35c   : > { %v8577_v14 = vpop.f32.mrf.mxu1 }
 0x35d   : > { %9556 = vst [vmem:[#allocation29_spill] sm:$0xff] %v8577_v14  ;;  %5977 = vmatmul.mubr.msk.bf16.gmra.mxu0 %vm3021_vm14, %v8389_v43  ;;  %v9562_v43 = vmov 4286578559  }
 0x35e   : > { %5980 = vmatprep.mubr.msk.bf16.mxu0 %vm3021_vm14, %v9517_v11  ;;  %v8585_v5 = vpop.f32.mrf.mxu1  ;;  %v4804_v45 = vmax.bf16 %v9562_v43, %v4788_v40 }
 0x35f   : > { %9558 = vst [vmem:[#allocation31_spill] sm:$0xff] %v8585_v5  ;;  %6011 = vmatmul.mubr.msk.bf16.gmra.mxu1 %vm453_vm1, %v8376_v33  ;;  %v8605_v33 = vpop.f32.mrf.mxu0 }
 0x360   : > { %6014 = vmatprep.mubr.msk.bf16.mxu1 %vm453_vm1, %v8432_v63  ;;  %v8591_v29 = vpop.f32.mrf.mxu1  ;;  %9564 = vst [vmem:[#allocation6_spill] sm:$0xff] %v8605_v33 }
 0x361   : > { %9559 = vst [vmem:[#allocation32_spill] sm:$0xff] %v8591_v29  ;;  %v8610_v63 = vpop.f32.mrf.mxu0 }
 0x362   : > { %v8595_v36 = vpop.f32.mrf.mxu1  ;;  %9566 = vst [vmem:[#allocation37_spill] sm:$0xff] %v8610_v63 }
 0x363   : > { %9561 = vst [vmem:[#allocation34_spill] sm:$0xff] %v8595_v36  ;;  %v8616_v31 = vpop.f32.mrf.mxu0 }
 0x364   : > { %v8601_v9 = vpop.f32.mrf.mxu1  ;;  %9569 = vst [vmem:[#allocation39_spill] sm:$0xff] %v8616_v31 }
 0x365   : > { %9563 = vst [vmem:[#allocation35_spill] sm:$0xff] %v8601_v9  ;;  %5981 = vmatmul.mubr.msk.bf16.gmra.mxu0 %vm3021_vm14, %v9517_v11  ;;  %v8622_v11 = vpop.f32.mrf.mxu0 }
 0x366   : > { %v8607_v19 = vpop.f32.mrf.mxu1  ;;  %9572 = vst [vmem:[#allocation44_spill] sm:$0xff] %v8622_v11 }
 0x367   : > { %9565 = vst [vmem:[#allocation36_spill] sm:$0xff] %v8607_v19  ;;  %6015 = vmatmul.mubr.msk.bf16.gmra.mxu1 %vm453_vm1, %v4804_v45  ;;  %v8628_v54 = vpop.f32.mrf.mxu0  ;;  %vm5185_vm1 = vcmask 195744  }
 0x368   : > { %v8612_v51 = vpop.f32.mrf.mxu1  ;;  %9575 = vst [vmem:[#allocation45_spill] sm:$0xff] %v8628_v54 }
 0x369   : > { %9567 = vst [vmem:[#allocation38_spill] sm:$0xff] %v8612_v51 }
 0x36a   : > { %v8614_v49 = vpop.f32.mrf.mxu1 }
 0x36b   : > { %9568 = vst [vmem:[#allocation40_spill] sm:$0xff] %v8614_v49 }
 0x36c   : > { %v8618_v28 = vpop.f32.mrf.mxu1 }
 0x36d   : > { %9570 = vst [vmem:[#allocation42_spill] sm:$0xff] %v8618_v28 }
 0x36e   : > { %v8620_v40 = vpop.f32.mrf.mxu1 }
 0x36f   : > { %9571 = vst [vmem:[#allocation41_spill] sm:$0xff] %v8620_v40 }
 0x370   : > { %v8624_v48 = vpop.f32.mrf.mxu1 }
 0x371   : > { %9573 = vst [vmem:[#allocation43_spill] sm:$0xff] %v8624_v48 }
 0x372   : > { %v8626_v27 = vpop.f32.mrf.mxu1 }
 0x373   : > { %9574 = vst [vmem:[#allocation46_spill] sm:$0xff] %v8626_v27 }
 0x374   : > { %v8630_v25 = vpop.f32.mrf.mxu1 }
 0x375   : > { %9576 = vst [vmem:[#allocation49_spill] sm:$0xff] %v8630_v25  ;;  %v8632_v38 = vpop.f32.mrf.mxu0 }
 0x376   : > { %9577 = vst [vmem:[#allocation47_spill] sm:$0xff] %v8632_v38  ;;  %v8634_v24 = vpop.f32.mrf.mxu1 }
 0x377   : > { %9578 = vst [vmem:[#allocation50_spill] sm:$0xff] %v8634_v24  ;;  %v8636_v23 = vpop.f32.mrf.mxu0  ;;  %v2103_v42 = vpop.permute.xlu1 %2102 }
 0x378   : > { %9579 = vst [vmem:[#allocation48_spill] sm:$0xff] %v8636_v23  ;;  %2197 = vst.msk [vmem:[%s6366_s22 + $0x10] sm:$0xff] %vm2194_vm15, %v2103_v42  ;;  %v8640_v35 = vpop.f32.mrf.mxu1 }
 0x379   : > { %9580 = vst [vmem:[#allocation52_spill] sm:$0xff] %v8640_v35  ;;  %v8642_v61 = vpop.f32.mrf.mxu0 }
 0x37a   : > { %9581 = vst [vmem:[#allocation51_spill] sm:$0xff] %v8642_v61  ;;  %v8644_v43 = vpop.f32.mrf.mxu1 }
 0x37b   : > { %9582 = vst [vmem:[#allocation53_spill] sm:$0xff] %v8644_v43  ;;  %v8646_v45 = vpop.f32.mrf.mxu0  ;;  %v2099_v25 = vpop.permute.xlu1 %2098 }
 0x37c   : > { %9583 = vst [vmem:[#allocation18_spill] sm:$0xff] %v8646_v45  ;;  %2195 = vst.msk [vmem:[%s6366_s22] sm:$0xff] %vm2194_vm15, %v2099_v25  ;;  %v2105_v24 = vpop.permute.xlu0 %2104  ;;  %v8650_v38 = vpop.f32.mrf.mxu1 }
 0x37d   : > { %9584 = vst [vmem:[#allocation54_spill] sm:$0xff] %v8650_v38  ;;  %2198 = vst.msk [vmem:[%s6366_s22 + $0x18] sm:$0xff] %vm2194_vm15, %v2105_v24  ;;  %v8654_v42 = vpop.f32.mrf.mxu0 }
 0x37e   : > { %v8656_v35 = vpop.f32.mrf.mxu1 }
 0x37f   : > { %v8658_v23 = vpop.f32.mrf.mxu0  ;;  %v2111_v61 = vpop.permute.xlu1 %2110 }
 0x380   : > { %2201 = vst.msk [vmem:[%s6366_s22 + $0x30] sm:$0xff] %vm2194_vm15, %v2111_v61  ;;  %v2101_v45 = vpop.permute.xlu0 %2100  ;;  %v8662_v25 = vpop.f32.mrf.mxu1 }
 0x381   : > { %2196 = vst.msk [vmem:[%s6366_s22 + $0x8] sm:$0xff] %vm2194_vm15, %v2101_v45  ;;  %v8666_v38 = vpop.f32.mrf.mxu0 }
 0x382   : > { %v8668_v24 = vpop.f32.mrf.mxu1 }
 0x383   : > { %v8670_v43 = vpop.f32.mrf.mxu0  ;;  %v2107_v54 = vpop.permute.xlu1 %2106 }
 0x384   : > { %2199 = vst.msk [vmem:[%s6366_s22 + $0x20] sm:$0xff] %vm2194_vm15, %v2107_v54  ;;  %v2113_v27 = vpop.permute.xlu0 %2112  ;;  %v8674_v11 = vpop.f32.mrf.mxu1 }
 0x385   : > { %2202 = vst.msk [vmem:[%s6366_s22 + $0x38] sm:$0xff] %vm2194_vm15, %v2113_v27  ;;  %v8678_v61 = vpop.f32.mrf.mxu0 }
 0x386   : > { %v8680_v48 = vpop.f32.mrf.mxu1 }
 0x387   : > { %v2119_v45 = vpop.permute.xlu1 %2118  ;;  %v8686_v40 = vpop.f32.mrf.mxu0 }
 0x388   : > { %2205 = vst.msk [vmem:[%s6366_s22 + $0x50] sm:$0xff] %vm2194_vm15, %v2119_v45  ;;  %v2109_v31 = vpop.permute.xlu0 %2108  ;;  %v8688_v63 = vpop.f32.mrf.mxu1 }
 0x389   : > { %2200 = vst.msk [vmem:[%s6366_s22 + $0x28] sm:$0xff] %vm2194_vm15, %v2109_v31  ;;  %v8694_v28 = vpop.f32.mrf.mxu0 }
 0x38a   : > { %v8696_v45 = vpop.f32.mrf.mxu1 }
 0x38b   : > { %v2115_v54 = vpop.permute.xlu1 %2114  ;;  %v8702_v49 = vpop.f32.mrf.mxu0 }
 0x38c   : > { %2203 = vst.msk [vmem:[%s6366_s22 + $0x40] sm:$0xff] %vm2194_vm15, %v2115_v54  ;;  %v2121_v27 = vpop.permute.xlu0 %2120  ;;  %v8704_v54 = vpop.f32.mrf.mxu1 }
 0x38d   : > { %2206 = vst.msk [vmem:[%s6366_s22 + $0x58] sm:$0xff] %vm2194_vm15, %v2121_v27  ;;  %v8710_v51 = vpop.f32.mrf.mxu0 }
 0x38f   : > { %v8718_v19 = vpop.f32.mrf.mxu0 }
 0x390   : > { %v2127_v33 = vpop.permute.xlu1 %2126  ;;  %v2117_v31 = vpop.permute.xlu0 %2116 }
 0x391   : > { %2209 = vst.msk [vmem:[%s6366_s22 + $0x70] sm:$0xff] %vm2194_vm15, %v2127_v33  ;;  %2204 = vst.msk [vmem:[%s6366_s22 + $0x48] sm:$0xff] %vm2194_vm15, %v2117_v31  ;;  %v8712_v33 = vpop.f32.mrf.mxu1  ;;  %v8726_v9 = vpop.f32.mrf.mxu0 }
 0x393   : > { %v8734_v36 = vpop.f32.mrf.mxu0 }
 0x394   : > { %v2123_v57 = vpop.permute.xlu1 %2122  ;;  %v2129_v27 = vpop.permute.xlu0 %2128 }
 0x395   : > { %2207 = vst.msk [vmem:[%s6366_s22 + $0x60] sm:$0xff] %vm2194_vm15, %v2123_v57  ;;  %2210 = vst.msk [vmem:[%s6366_s22 + $0x78] sm:$0xff] %vm2194_vm15, %v2129_v27  ;;  %v8720_v57 = vpop.f32.mrf.mxu1  ;;  %v8742_v29 = vpop.f32.mrf.mxu0 }
 0x397   : > { %v8750_v5 = vpop.f32.mrf.mxu0 }
 0x398   : > { %v2125_v31 = vpop.permute.xlu0 %2124  ;;  %9587 = vst [vmem:[#allocation8_spill] sm:$0xff] %v8750_v5 }
 0x399   : > { %v2135_v16 = vpop.permute.xlu1 %2134  ;;  %2208 = vst.msk [vmem:[%s6366_s22 + $0x68] sm:$0xff] %vm2194_vm15, %v2125_v31  ;;  %v8758_v14 = vpop.f32.mrf.mxu0 }
 0x39a   : > { %2213 = vst.msk [vmem:[%s6366_s22 + $0x90] sm:$0xff] %vm2194_vm15, %v2135_v16  ;;  %v8728_v16 = vpop.f32.mrf.mxu1  ;;  %9589 = vst [vmem:[#allocation59_spill] sm:$0xff] %v8758_v14 }
 0x39b   : > { %v8766_v3 = vpop.f32.mrf.mxu0 }
 0x39c   : > { %v2137_v27 = vpop.permute.xlu0 %2136  ;;  %9591 = vst [vmem:[#allocation56_spill] sm:$0xff] %v8766_v3 }
 0x39d   : > { %v2131_v50 = vpop.permute.xlu1 %2130  ;;  %2214 = vst.msk [vmem:[%s6366_s22 + $0x98] sm:$0xff] %vm2194_vm15, %v2137_v27 }
 0x39e   : > { %2211 = vst.msk [vmem:[%s6366_s22 + $0x80] sm:$0xff] %vm2194_vm15, %v2131_v50  ;;  %v8736_v50 = vpop.f32.mrf.mxu1 }
 0x39f   : > { %9585 = vst [vmem:[#allocation55_spill] sm:$0xff] %v8736_v50 }
 0x3a0   : > { %v2133_v31 = vpop.permute.xlu0 %2132 }
 0x3a1   : > { %v2143_v58 = vpop.permute.xlu1 %2142  ;;  %2212 = vst.msk [vmem:[%s6366_s22 + $0x88] sm:$0xff] %vm2194_vm15, %v2133_v31 }
 0x3a2   : > { %2217 = vst.msk [vmem:[%s6366_s22 + $0xb0] sm:$0xff] %vm2194_vm15, %v2143_v58  ;;  %v8744_v58 = vpop.f32.mrf.mxu1 }
 0x3a3   : > { %9586 = vst [vmem:[#allocation61_spill] sm:$0xff] %v8744_v58 }
 0x3a4   : > { %v2145_v27 = vpop.permute.xlu0 %2144 }
 0x3a5   : > { %v2139_v12 = vpop.permute.xlu1 %2138  ;;  %2218 = vst.msk [vmem:[%s6366_s22 + $0xb8] sm:$0xff] %vm2194_vm15, %v2145_v27 }
 0x3a6   : > { %2215 = vst.msk [vmem:[%s6366_s22 + $0xa0] sm:$0xff] %vm2194_vm15, %v2139_v12  ;;  %v8752_v12 = vpop.f32.mrf.mxu1 }
 0x3a7   : > { %9588 = vst [vmem:[#allocation7_spill] sm:$0xff] %v8752_v12 }
 0x3a8   : > { %v2141_v31 = vpop.permute.xlu0 %2140 }
 0x3a9   : > { %v2151_v62 = vpop.permute.xlu1 %2150  ;;  %2216 = vst.msk [vmem:[%s6366_s22 + $0xa8] sm:$0xff] %vm2194_vm15, %v2141_v31 }
 0x3aa   : > { %2221 = vst.msk [vmem:[%s6366_s22 + $0xd0] sm:$0xff] %vm2194_vm15, %v2151_v62  ;;  %v8760_v62 = vpop.f32.mrf.mxu1 }
 0x3ab   : > { %9590 = vst [vmem:[#allocation58_spill] sm:$0xff] %v8760_v62 }
 0x3ac   : > { %v2153_v27 = vpop.permute.xlu0 %2152  ;;  %v8768_v12 = vpop.f32.mrf.mxu1 }
 0x3ad   : > { %v2147_v8 = vpop.permute.xlu1 %2146  ;;  %2222 = vst.msk [vmem:[%s6366_s22 + $0xd8] sm:$0xff] %vm2194_vm15, %v2153_v27  ;;  %9592 = vst [vmem:[#allocation57_spill] sm:$0xff] %v8768_v12  ;;  %v8774_v27 = vpop.f32.mrf.mxu0 }
 0x3ae   : > { %2219 = vst.msk [vmem:[%s6366_s22 + $0xc0] sm:$0xff] %vm2194_vm15, %v2147_v8  ;;  %9593 = vst [vmem:[#allocation10_spill] sm:$0xff] %v8774_v27  ;;  %v8776_v14 = vpop.f32.mrf.mxu1 }
 0x3af   : > { %9594 = vst [vmem:[#allocation60_spill] sm:$0xff] %v8776_v14 }
 0x3b0   : > { %v2149_v31 = vpop.permute.xlu0 %2148 }
 0x3b1   : > { %v2159_v58 = vpop.permute.xlu1 %2158  ;;  %2220 = vst.msk [vmem:[%s6366_s22 + $0xc8] sm:$0xff] %vm2194_vm15, %v2149_v31  ;;  %v8782_v31 = vpop.f32.mrf.mxu1 }
 0x3b2   : > { %2225 = vst.msk [vmem:[%s6366_s22 + $0xf0] sm:$0xff] %vm2194_vm15, %v2159_v58  ;;  %v8780_v58 = vpop.f32.mrf.mxu0  ;;  %9596 = vst [vmem:[#allocation9_spill] sm:$0xff] %v8782_v31 }
 0x3b3   : > { %9595 = vst [vmem:[#allocation62_spill] sm:$0xff] %v8780_v58  ;;  %v8786_v50 = vpop.f32.mrf.mxu1 }
 0x3b4   : > { %v2161_v8 = vpop.permute.xlu0 %2160  ;;  %v8784_v3 = vpop.f32.mrf.mxu0  ;;  %9598 = vst [vmem:[#allocation64_spill] sm:$0xff] %v8786_v50 }
 0x3b5   : > { %v2155_v5 = vpop.permute.xlu1 %2154  ;;  %2226 = vst.msk [vmem:[%s6366_s22 + $0xf8] sm:$0xff] %vm2194_vm15, %v2161_v8  ;;  %9597 = vst [vmem:[#allocation63_spill] sm:$0xff] %v8784_v3 }
 0x3b6   : > { %2223 = vst.msk [vmem:[%s6366_s22 + $0xe0] sm:$0xff] %vm2194_vm15, %v2155_v5  ;;  %v8788_v12 = vpop.f32.mrf.mxu0  ;;  %v8790_v5 = vpop.f32.mrf.mxu1 }
 0x3b7   : > { %9599 = vst [vmem:[#allocation20_spill] sm:$0xff] %v8788_v12  ;;  %9600 = vst [vmem:[#allocation65_spill] sm:$0xff] %v8790_v5 }
 0x3b8   : > { %v2157_v62 = vpop.permute.xlu0 %2156  ;;  %v8792_v8 = vpop.f32.mrf.mxu0 }
 0x3b9   : > { %2224 = vst.msk [vmem:[%s6366_s22 + $0xe8] sm:$0xff] %vm2194_vm15, %v2157_v62  ;;  %9601 = vst [vmem:[#allocation12_spill] sm:$0xff] %v8792_v8  ;;  %v8794_v27 = vpop.f32.mrf.mxu1 }
 0x3ba   : > { %9602 = vst [vmem:[#allocation66_spill] sm:$0xff] %v8794_v27  ;;  %v8796_v14 = vpop.f32.mrf.mxu0 }
 0x3bb   : > { %9603 = vst [vmem:[#allocation68_spill] sm:$0xff] %v8796_v14  ;;  %v8798_v34 = vpop.f32.mrf.mxu1 }
 0x3bc   : > { %9604 = vst [vmem:[#allocation11_spill] sm:$0xff] %v8798_v34  ;;  %v8800_v62 = vpop.f32.mrf.mxu0 }
 0x3bd   : > { %9605 = vst [vmem:[#allocation67_spill] sm:$0xff] %v8800_v62  ;;  %v8802_v58 = vpop.f32.mrf.mxu1 }
 0x3be   : > { %9606 = vst [vmem:[#allocation71_spill] sm:$0xff] %v8802_v58  ;;  %v8804_v31 = vpop.f32.mrf.mxu0 }
 0x3bf   : > { %v8806_v3 = vpop.f32.mrf.mxu1 }
 0x3c0   : > { %9607 = vst [vmem:[#allocation69_spill] sm:$0xff] %v8806_v3  ;;  %v8808_v50 = vpop.f32.mrf.mxu0  ;;  %v3270_v3 = vadd.f32 %v8499_v0, %v8291_v7  ;;  %v3265_v0 = vadd.f32 %v8514_v1, %v8371_v53  ;;  %v3278_v1 = vadd.f32 %v8529_v44, %v8397_v59 }
 0x3c1   : > { %9608 = vst [vmem:[#allocation70_spill] sm:$0xff] %v8808_v50  ;;  %v8810_v12 = vpop.f32.mrf.mxu1 }
 0x3c2   : > { %9609 = vst [vmem:[#allocation13_spill] sm:$0xff] %v8810_v12  ;;  %v8812_v5 = vpop.f32.mrf.mxu0 }
 0x3c3   : > { %9610 = vst [vmem:[#allocation5_spill] sm:$0xff] %v8812_v5  ;;  %v8814_v8 = vpop.f32.mrf.mxu1 }
 0x3c4   : > { %9611 = vst [vmem:[#allocation72_spill] sm:$0xff] %v8814_v8  ;;  %v8816_v27 = vpop.f32.mrf.mxu0  ;;  %v3262_v8 = vadd.f32 %v8506_v13, %v8316_v41 }
 0x3c5   : > { %9612 = vst [vmem:[#allocation15_spill] sm:$0xff] %v8816_v27  ;;  %v8818_v14 = vpop.f32.mrf.mxu1  ;;  %v3607_v27 = vadd.f32 %v8654_v42, %v3270_v3 }
 0x3c6   : > { %9613 = vst [vmem:[#allocation14_spill] sm:$0xff] %v8818_v14  ;;  %v8820_v34 = vpop.f32.mrf.mxu0 }
 0x3c7   : > { %9614 = vst [vmem:[#allocation17_spill] sm:$0xff] %v8820_v34  ;;  %v8822_v62 = vpop.f32.mrf.mxu1  ;;  %v3811_v41 = vadd.f32 %v8656_v35, %v3607_v27 }
 0x3c8   : > { %9615 = vst [vmem:[#allocation16_spill] sm:$0xff] %v8822_v62  ;;  %v3273_v62 = vadd.f32 %v8512_v20, %v8343_v39  ;;  %v8855_v39 = vld [vmem:[%s9343_s6] ss:$0 sm:$0xff]  ;;  %v3286_v20 = vadd.f32 %v8523_v47, %v8378_v2  ;;  %v3289_v2 = vadd.f32 %v8533_v37, %v8417_v21  ;;  %v3609_v47 = vadd.f32 %v8686_v40, %v3278_v1 }
 0x3ca   : > { %v3608_v13 = vadd.f32 %v8666_v38, %v3273_v62  ;;  %v3611_v62 = vadd.f32 %v8678_v61, %v3286_v20  ;;  %v3612_v21 = vadd.f32 %v8694_v28, %v3289_v2  ;;  %v3294_v28 = vadd.f32 %v8551_v26, %v8459_v10 }
 0x3cc   : > { %v3812_v27 = vadd.f32 %v8668_v24, %v3608_v13  ;;  %v3281_v24 = vadd.f32 %v8537_v22, %v8436_v52  ;;  %v3815_v13 = vadd.f32 %v8680_v48, %v3611_v62  ;;  %v3613_v10 = vadd.f32 %v8718_v19, %v3294_v28 }
 0x3cd   : > { %v3297_v62 = vadd.f32 %v8557_v56, %v8487_v15  ;;  %v3318_v19 = vadd.f32 %v8563_v17, %v8492_v55 }
 0x3ce   : > { %v3610_v52 = vadd.f32 %v8702_v49, %v3281_v24  ;;  %v3305_v49 = vadd.f32 %v8553_v6, %v8475_v18 }
 0x3cf   : > { %v3614_v15 = vadd.f32 %v8734_v36, %v3297_v62  ;;  %v3619_v24 = vadd.f32 %v8742_v29, %v3318_v19  ;;  %v9619_v36 = vld [vmem:[#allocation28_spill] sm:$0xff]  ;;  %v9632_v19 = vld [vmem:[#allocation10_spill] sm:$0xff] }
 0x3d0   : > { %v3814_v1 = vadd.f32 %v8704_v54, %v3610_v52  ;;  %v3616_v18 = vadd.f32 %v8726_v9, %v3305_v49  ;;  %v9627_v49 = vld [vmem:[#allocation31_spill] sm:$0xff] }
 0x3d2   : > { %v3820_v55 = vadd.f32 %v8728_v16, %v3616_v18  ;;  %v9630_v18 = vld [vmem:[#allocation21_spill] sm:$0xff] }
 0x3e5   : > { %v8824_v58 = vpop.f32.mrf.mxu0 }
 0x3e6   : > { %9616 = vst [vmem:[#allocation23_spill] sm:$0xff] %v8824_v58  ;;  %v8828_v50 = vpop.f32.mrf.mxu1  ;;  %v3605_v58 = vadd.f32 %v8658_v23, %v3262_v8  ;;  %v3606_v8 = vadd.f32 %v8670_v43, %v3265_v0 }
 0x3e7   : > { %v8830_v12 = vpop.f32.mrf.mxu0 }
 0x3e8   : > { %v8835_v5 = vpop.f32.mrf.mxu1  ;;  %v3809_v23 = vadd.f32 %v8662_v25, %v3605_v58  ;;  %v3810_v59 = vadd.f32 %v8674_v11, %v3606_v8  ;;  %v3813_v11 = vadd.f32 %v8688_v63, %v3609_v47 }
 0x3e9   : > { %v8837_v14 = vpop.f32.mrf.mxu0 }
 0x3ea   : > { %v8842_v34 = vpop.f32.mrf.mxu1 }
 0x3eb   : > { %9617 = vst [vmem:[#allocation27_spill] sm:$0xff] %v8842_v34  ;;  %v8844_v7 = vpop.f32.mrf.mxu0 }
 0x3ec   : > { %v8850_v3 = vpop.f32.mrf.mxu1 }
 0x3ed   : > { %9618 = vst [vmem:[#allocation73_spill] sm:$0xff] %v8850_v3  ;;  %v5954_v42 = vpop.f32.mrf.mxu0 }
 0x3ee   : > { %v4015_v53 = vadd.f32 %v5954_v42, %v3811_v41 }
 0x3ef   : > { %v3886_v38 = vpop.f32.mrf.mxu0  ;;  %v8863_v35 = vpop.f32.mrf.mxu1 }
 0x3f0   : > { %v4054_v3 = vadd.f32 %v8855_v39, %v4015_v53  ;;  %v4013_v34 = vadd.f32 %v3886_v38, %v3809_v23 }
 0x3f1   : > { %v5955_v43 = vpop.f32.mrf.mxu0  ;;  %v8871_v25 = vpop.f32.mrf.mxu1 }
 0x3f2   : > { %v4086_v44 = vmax.f32 %v4054_v3, 0.0  ;;  %v4052_v58 = vadd.f32 %v8855_v39, %v4013_v34  ;;  %v4016_v0 = vadd.f32 %v5955_v43, %v3812_v27  ;;  %v3302_v34 = vadd.f32 %v8543_v60, %v8447_v32 }
 0x3f3   : > { %v3889_v61 = vpop.f32.mrf.mxu0  ;;  %v8877_v41 = vpop.f32.mrf.mxu1  ;;  %v3816_v32 = vadd.f32 %v8696_v45, %v3612_v21  ;;  %v3321_v21 = vadd.f32 %v9619_v36, %v8518_v4 }
 0x3f4   : > { %v4055_v37 = vadd.f32 %v8855_v39, %v4016_v0  ;;  %v4014_v40 = vadd.f32 %v3889_v61, %v3810_v59  ;;  %4152 = vrot.lane.b32.xlu1 %v4086_v44, %s6193_s21  ;;  %v4084_v3 = vmax.f32 %v4052_v58, 0.0  ;;  %v3615_v23 = vadd.f32 %v8710_v51, %v3302_v34 }
 0x3f5   : > { %v5958_v22 = vpop.f32.mrf.mxu0  ;;  %v8891_v53 = vpop.f32.mrf.mxu1  ;;  %v3817_v59 = vadd.f32 %v8720_v57, %v3613_v10  ;;  %v3310_v0 = vadd.f32 %v8571_v30, %v8508_v46  ;;  %v9621_v46 = vld [vmem:[#allocation8_spill] sm:$0xff]  ;;  %v9628_v10 = vld [vmem:[#allocation7_spill] sm:$0xff] }
 0x3f6   : > { %v4087_v42 = vmax.f32 %v4055_v37, 0.0  ;;  %v4053_v48 = vadd.f32 %v8855_v39, %v4014_v40  ;;  %v4019_v20 = vadd.f32 %v5958_v22, %v3815_v13  ;;  %v3819_v2 = vadd.f32 %v8712_v33, %v3615_v23  ;;  %v9620_v37 = vld [vmem:[#allocation55_spill] sm:$0xff] }
 0x3f7   : > { %v3902_v8 = vpop.f32.mrf.mxu0  ;;  %v8905_v43 = vpop.f32.mrf.mxu1  ;;  %v3818_v40 = vadd.f32 %v9620_v37, %v3614_v15  ;;  %v3617_v30 = vadd.f32 %v9621_v46, %v3310_v0  ;;  %v9622_v22 = vld [vmem:[#allocation19_spill] sm:$0xff]  ;;  %v9634_v0 = vld [vmem:[#allocation25_spill] sm:$0xff] }
 0x3f8   : > { %v4058_v60 = vadd.f32 %v8855_v39, %v4019_v20  ;;  %v4017_v63 = vadd.f32 %v3902_v8, %v3813_v11  ;;  %4148 = vrot.lane.b32.xlu1 %v4084_v3, %s6193_s21  ;;  %4154 = vrot.lane.b32.xlu0 %v4087_v42, %s6193_s21  ;;  %v4085_v51 = vmax.f32 %v4053_v48, 0.0  ;;  %v9623_v3 = vld [vmem:[#allocation29_spill] sm:$0xff]  ;;  %v9625_v8 = vld [vmem:[#allocation59_spill] sm:$0xff] }
 0x3f9   : > { %v5959_v26 = vpop.f32.mrf.mxu0  ;;  %v8919_v13 = vpop.f32.mrf.mxu1  ;;  %v3313_v42 = vadd.f32 %v9623_v3, %v9622_v22  ;;  %v9624_v48 = vld [vmem:[#allocation61_spill] sm:$0xff]  ;;  %v3620_v4 = vadd.f32 %v9625_v8, %v3321_v21  ;;  %v9642_v8 = vld [vmem:[#allocation26_spill] sm:$0xff] }
 0x3fa   : > { %v4090_v38 = vmax.f32 %v4058_v60, 0.0  ;;  %v4056_v27 = vadd.f32 %v8855_v39, %v4017_v63  ;;  %v4020_v45 = vadd.f32 %v5959_v26, %v3816_v32  ;;  %v3823_v20 = vadd.f32 %v9624_v48, %v3619_v24  ;;  %v9626_v63 = vld [vmem:[#allocation22_spill] sm:$0xff] }
 0x3fb   : > { %v3905_v47 = vpop.f32.mrf.mxu0  ;;  %v8933_v23 = vpop.f32.mrf.mxu1  ;;  %v3821_v26 = vadd.f32 %v9628_v10, %v3617_v30  ;;  %v9635_v24 = vld [vmem:[#allocation34_spill] sm:$0xff] }
 0x3fc   : > { %v4059_v6 = vadd.f32 %v8855_v39, %v4020_v45  ;;  %v4018_v54 = vadd.f32 %v3905_v47, %v3814_v1  ;;  %4150 = vrot.lane.b32.xlu0 %v4085_v51, %s6193_s21  ;;  %4160 = vrot.lane.b32.xlu1 %v4090_v38, %s6193_s21  ;;  %v4088_v33 = vmax.f32 %v4056_v27, 0.0  ;;  %v3334_v1 = vadd.f32 %v9627_v49, %v9626_v63  ;;  %v9629_v51 = vld [vmem:[#allocation56_spill] sm:$0xff] }
 0x3fd   : > { %v5962_v56 = vpop.f32.mrf.mxu0  ;;  %v3618_v38 = vadd.f32 %v9629_v51, %v3313_v42  ;;  %v9641_v42 = vld [vmem:[#allocation63_spill] sm:$0xff]  ;;  %v9645_v49 = vld [vmem:[#allocation20_spill] sm:$0xff] }
 0x3fe   : > { %v4091_v44 = vmax.f32 %v4059_v6, 0.0  ;;  %v4057_v58 = vadd.f32 %v8855_v39, %v4018_v54  ;;  %v4023_v9 = vadd.f32 %v5962_v56, %v3819_v2  ;;  %v9631_v6 = vld [vmem:[#allocation32_spill] sm:$0xff]  ;;  %v8947_v56 = vpop.f32.mrf.mxu1 }
 0x3ff   : > { %v3918_v61 = vpop.f32.mrf.mxu0  ;;  %v3326_v54 = vadd.f32 %v9631_v6, %v9630_v18 }
 0x400   : > { %v4062_v17 = vadd.f32 %v8855_v39, %v4023_v9  ;;  %v4021_v57 = vadd.f32 %v3918_v61, %v3817_v59  ;;  %4156 = vrot.lane.b32.xlu1 %v4088_v33, %s6193_s21  ;;  %4162 = vrot.lane.b32.xlu0 %v4091_v44, %s6193_s21  ;;  %v4089_v34 = vmax.f32 %v4057_v58, 0.0  ;;  %v3623_v59 = vadd.f32 %v9632_v19, %v3334_v1  ;;  %v9633_v33 = vld [vmem:[#allocation58_spill] sm:$0xff]  ;;  %v8961_v3 = vpop.f32.mrf.mxu1  ;;  %v9649_v19 = vld [vmem:[#allocation64_spill] sm:$0xff] }
 0x401   : > { %v5963_v29 = vpop.f32.mrf.mxu0  ;;  %v3824_v44 = vadd.f32 %v9633_v33, %v3620_v4  ;;  %v3337_v61 = vadd.f32 %v9635_v24, %v9634_v0  ;;  %v9643_v4 = vld [vmem:[#allocation36_spill] sm:$0xff]  ;;  %v9652_v0 = vld [vmem:[#allocation65_spill] sm:$0xff] }
 0x402   : > { %v4094_v11 = vmax.f32 %v4062_v17, 0.0  ;;  %v4060_v52 = vadd.f32 %v8855_v39, %v4021_v57  ;;  %v4024_v16 = vadd.f32 %v5963_v29, %v3820_v55  ;;  %v9636_v55 = vld [vmem:[#allocation57_spill] sm:$0xff]  ;;  %v9637_v57 = vld [vmem:[#allocation62_spill] sm:$0xff]  ;;  %v9638_v29 = vld [vmem:[#allocation24_spill] sm:$0xff] }
 0x403   : > { %v3921_v28 = vpop.f32.mrf.mxu0  ;;  %v3822_v17 = vadd.f32 %v9636_v55, %v3618_v38  ;;  %v3621_v36 = vadd.f32 %v9637_v57, %v3326_v54  ;;  %v3624_v48 = vadd.f32 %v9641_v42, %v3337_v61  ;;  %v8975_v54 = vpop.f32.mrf.mxu1  ;;  %v9653_v61 = vld [vmem:[#allocation68_spill] sm:$0xff] }
 0x404   : > { %v4063_v32 = vadd.f32 %v8855_v39, %v4024_v16  ;;  %v4022_v60 = vadd.f32 %v3921_v28, %v3818_v40  ;;  %4158 = vrot.lane.b32.xlu0 %v4089_v34, %s6193_s21  ;;  %4168 = vrot.lane.b32.xlu1 %v4094_v11, %s6193_s21  ;;  %v4092_v45 = vmax.f32 %v4060_v52, 0.0  ;;  %v9639_v34 = vld [vmem:[#allocation35_spill] sm:$0xff]  ;;  %v9640_v52 = vld [vmem:[#allocation60_spill] sm:$0xff] }
 0x405   : > { %v5966_v27 = vpop.f32.mrf.mxu0  ;;  %v3329_v11 = vadd.f32 %v9639_v34, %v9638_v29  ;;  %v3827_v16 = vadd.f32 %v9640_v52, %v3623_v59  ;;  %v3828_v59 = vadd.f32 %v9649_v19, %v3624_v48  ;;  %v9656_v29 = vld [vmem:[#allocation66_spill] sm:$0xff]  ;;  %v8989_v52 = vpop.f32.mrf.mxu1 }
 0x406   : > { %v4095_v62 = vmax.f32 %v4063_v32, 0.0  ;;  %v4061_v2 = vadd.f32 %v8855_v39, %v4022_v60  ;;  %v4027_v47 = vadd.f32 %v5966_v27, %v3823_v20  ;;  %v3350_v32 = vadd.f32 %v9643_v4, %v9642_v8  ;;  %v9644_v60 = vld [vmem:[#allocation9_spill] sm:$0xff]  ;;  %v9660_v4 = vld [vmem:[#allocation11_spill] sm:$0xff] }
 0x407   : > { %v3934_v15 = vpop.f32.mrf.mxu0  ;;  %v3825_v63 = vadd.f32 %v9644_v60, %v3621_v36  ;;  %v3622_v1 = vadd.f32 %v9645_v49, %v3329_v11 }
 0x408   : > { %v4066_v58 = vadd.f32 %v8855_v39, %v4027_v47  ;;  %v4025_v9 = vadd.f32 %v3934_v15, %v3821_v26  ;;  %4164 = vrot.lane.b32.xlu1 %v4092_v45, %s6193_s21  ;;  %4170 = vrot.lane.b32.xlu0 %v4095_v62, %s6193_s21  ;;  %v4093_v37 = vmax.f32 %v4061_v2, 0.0  ;;  %v9646_v45 = vld [vmem:[#allocation30_spill] sm:$0xff]  ;;  %v9648_v47 = vld [vmem:[#allocation12_spill] sm:$0xff] }
 0x409   : > { %v5967_v21 = vpop.f32.mrf.mxu0  ;;  %v9647_v62 = vld [vmem:[#allocation38_spill] sm:$0xff]  ;;  %v3627_v18 = vadd.f32 %v9648_v47, %v3350_v32  ;;  %v3826_v24 = vadd.f32 %v9652_v0, %v3622_v1  ;;  %v9003_v47 = vpop.f32.mrf.mxu1 }
 0x40a   : > { %v4098_v40 = vmax.f32 %v4066_v58, 0.0  ;;  %v4064_v46 = vadd.f32 %v8855_v39, %v4025_v9  ;;  %v4028_v30 = vadd.f32 %v5967_v21, %v3824_v44  ;;  %v3342_v2 = vadd.f32 %v9647_v62, %v9646_v45  ;;  %v9650_v44 = vld [vmem:[#allocation33_spill] sm:$0xff]  ;;  %v9651_v58 = vld [vmem:[#allocation40_spill] sm:$0xff]  ;;  %v9663_v45 = vld [vmem:[#allocation70_spill] sm:$0xff] }
 0x40b   : > { %v3937_v22 = vpop.f32.mrf.mxu0  ;;  %v3353_v9 = vadd.f32 %v9651_v58, %v9650_v44  ;;  %v3831_v34 = vadd.f32 %v9656_v29, %v3627_v18  ;;  %v9664_v18 = vld [vmem:[#allocation71_spill] sm:$0xff]  ;;  %v9667_v44 = vld [vmem:[#allocation69_spill] sm:$0xff]  ;;  %v9017_v29 = vpop.f32.mrf.mxu1 }
 0x40c   : > { %v4067_v20 = vadd.f32 %v8855_v39, %v4028_v30  ;;  %v4026_v28 = vadd.f32 %v3937_v22, %v3822_v17  ;;  %4166 = vrot.lane.b32.xlu0 %v4093_v37, %s6193_s21  ;;  %4176 = vrot.lane.b32.xlu1 %v4098_v40, %s6193_s21  ;;  %v4096_v26 = vmax.f32 %v4064_v46, 0.0  ;;  %v3625_v55 = vadd.f32 %v9653_v61, %v3342_v2  ;;  %v9654_v40 = vld [vmem:[#allocation6_spill] sm:$0xff] }
 0x40d   : > { %v5970_v10 = vpop.f32.mrf.mxu0  ;;  %v9655_v46 = vld [vmem:[#allocation42_spill] sm:$0xff] }
 0x40e   : > { %v4099_v51 = vmax.f32 %v4067_v20, 0.0  ;;  %v4065_v38 = vadd.f32 %v8855_v39, %v4026_v28  ;;  %v4031_v27 = vadd.f32 %v5970_v10, %v3827_v16  ;;  %v3345_v30 = vadd.f32 %v9655_v46, %v9654_v40  ;;  %v9657_v16 = vld [vmem:[#allocation67_spill] sm:$0xff]  ;;  %v9658_v20 = vld [vmem:[#allocation37_spill] sm:$0xff] }
 0x40f   : > { %v3950_v6 = vpop.f32.mrf.mxu0  ;;  %v3628_v22 = vadd.f32 %v9657_v16, %v3353_v9  ;;  %v9659_v28 = vld [vmem:[#allocation41_spill] sm:$0xff]  ;;  %v3829_v32 = vadd.f32 %v9660_v4, %v3625_v55 }
 0x410   : > { %v4070_v15 = vadd.f32 %v8855_v39, %v4031_v27  ;;  %v4029_v33 = vadd.f32 %v3950_v6, %v3825_v63  ;;  %4172 = vrot.lane.b32.xlu1 %v4096_v26, %s6193_s21  ;;  %4178 = vrot.lane.b32.xlu0 %v4099_v51, %s6193_s21  ;;  %v4097_v57 = vmax.f32 %v4065_v38, 0.0  ;;  %v3366_v8 = vadd.f32 %v9659_v28, %v9658_v20  ;;  %v9661_v51 = vld [vmem:[#allocation39_spill] sm:$0xff]  ;;  %v9668_v9 = vld [vmem:[#allocation5_spill] sm:$0xff]  ;;  %v9675_v28 = vld [vmem:[#allocation72_spill] sm:$0xff] }
 0x411   : > { %v5971_v17 = vpop.f32.mrf.mxu0  ;;  %v3626_v60 = vadd.f32 %v8804_v31, %v3345_v30  ;;  %v9662_v38 = vld [vmem:[#allocation43_spill] sm:$0xff]  ;;  %v3832_v6 = vadd.f32 %v9664_v18, %v3628_v22  ;;  %v9665_v31 = vld [vmem:[#allocation44_spill] sm:$0xff]  ;;  %v9671_v40 = vld [vmem:[#allocation13_spill] sm:$0xff] }
 0x412   : > { %v4102_v36 = vmax.f32 %v4070_v15, 0.0  ;;  %v4068_v21 = vadd.f32 %v8855_v39, %v4029_v33  ;;  %v4032_v37 = vadd.f32 %v5971_v17, %v3828_v59  ;;  %v3358_v27 = vadd.f32 %v9662_v38, %v9661_v51  ;;  %v9666_v15 = vld [vmem:[#allocation46_spill] sm:$0xff]  ;;  %v9676_v4 = vld [vmem:[#allocation17_spill] sm:$0xff]  ;;  %v9678_v51 = vld [vmem:[#allocation52_spill] sm:$0xff] }
 0x413   : > { %v3953_v11 = vpop.f32.mrf.mxu0  ;;  %v3631_v62 = vadd.f32 %v9663_v45, %v3366_v8  ;;  %v3369_v33 = vadd.f32 %v9666_v15, %v9665_v31  ;;  %v3830_v58 = vadd.f32 %v9667_v44, %v3626_v60  ;;  %v9680_v18 = vld [vmem:[#allocation14_spill] sm:$0xff]  ;;  %v9681_v31 = vld [vmem:[#allocation51_spill] sm:$0xff]  ;;  %v9682_v15 = vld [vmem:[#allocation53_spill] sm:$0xff] }
 0x414   : > { %v4071_v42 = vadd.f32 %v8855_v39, %v4032_v37  ;;  %v4030_v48 = vadd.f32 %v3953_v11, %v3826_v24  ;;  %4174 = vrot.lane.b32.xlu0 %v4097_v57, %s6193_s21  ;;  %4184 = vrot.lane.b32.xlu1 %v4102_v36, %s6193_s21  ;;  %v4100_v49 = vmax.f32 %v4068_v21, 0.0  ;;  %v3629_v0 = vadd.f32 %v9668_v9, %v3358_v27  ;;  %v9669_v36 = vld [vmem:[#allocation45_spill] sm:$0xff]  ;;  %v9679_v27 = vld [vmem:[#allocation23_spill] sm:$0xff]  ;;  %v9683_v44 = vld [vmem:[#allocation16_spill] sm:$0xff] }
 0x415   : > { %v5974_v63 = vpop.f32.mrf.mxu0  ;;  %v9670_v21 = vld [vmem:[#allocation49_spill] sm:$0xff]  ;;  %v3835_v46 = vadd.f32 %v9671_v40, %v3631_v62 }
 0x416   : > { %v4103_v1 = vmax.f32 %v4071_v42, 0.0  ;;  %v4069_v10 = vadd.f32 %v8855_v39, %v4030_v48  ;;  %v4035_v26 = vadd.f32 %v5974_v63, %v3831_v34  ;;  %v3361_v37 = vadd.f32 %v9670_v21, %v9669_v36  ;;  %v9672_v34 = vld [vmem:[#allocation15_spill] sm:$0xff]  ;;  %v9674_v48 = vld [vmem:[#allocation50_spill] sm:$0xff] }
 0x417   : > { %v3966_v2 = vpop.f32.mrf.mxu0  ;;  %v3632_v11 = vadd.f32 %v9672_v34, %v3369_v33  ;;  %v9673_v42 = vld [vmem:[#allocation47_spill] sm:$0xff]  ;;  %v3833_v8 = vadd.f32 %v9675_v28, %v3629_v0  ;;  %v3385_v33 = vadd.f32 %v9682_v15, %v9681_v31  ;;  %v9685_v36 = vld [vmem:[#allocation54_spill] sm:$0xff] }
 0x418   : > { %v4074_v19 = vadd.f32 %v8855_v39, %v4035_v26  ;;  %v4033_v59 = vadd.f32 %v3966_v2, %v3829_v32  ;;  %4180 = vrot.lane.b32.xlu1 %v4100_v49, %s6193_s21  ;;  %4186 = vrot.lane.b32.xlu0 %v4103_v1, %s6193_s21  ;;  %v4101_v61 = vmax.f32 %v4069_v10, 0.0  ;;  %v3382_v20 = vadd.f32 %v9674_v48, %v9673_v42  ;;  %v9677_v26 = vld [vmem:[#allocation48_spill] sm:$0xff]  ;;  %v9031_v2 = vpop.f32.mrf.mxu1 }
 0x419   : > { %v5975_v24 = vpop.f32.mrf.mxu0  ;;  %v3630_v32 = vadd.f32 %v9676_v4, %v3361_v37  ;;  %v3374_v38 = vadd.f32 %v9678_v51, %v9677_v26  ;;  %v9065_v51 = vld [vmem:[%s9345_s8] ss:$0 sm:$0xff] }
 0x41a   : > { %v4106_v55 = vmax.f32 %v4074_v19, 0.0  ;;  %v4072_v17 = vadd.f32 %v8855_v39, %v4033_v59  ;;  %v4036_v57 = vadd.f32 %v5975_v24, %v3832_v6  ;;  %v3635_v45 = vadd.f32 %v9679_v27, %v3382_v20 }
 0x41b   : > { %v3969_v30 = vpop.f32.mrf.mxu0  ;;  %v3836_v6 = vadd.f32 %v9680_v18, %v3632_v11  ;;  %v3633_v9 = vadd.f32 %v8830_v12, %v3374_v38 }
 0x41c   : > { %v4075_v16 = vadd.f32 %v8855_v39, %v4036_v57  ;;  %v4034_v22 = vadd.f32 %v3969_v30, %v3830_v58  ;;  %4182 = vrot.lane.b32.xlu0 %v4101_v61, %s6193_s21  ;;  %4192 = vrot.lane.b32.xlu1 %v4106_v55, %s6193_s21  ;;  %v4104_v63 = vmax.f32 %v4072_v17, 0.0  ;;  %v3834_v58 = vadd.f32 %v9683_v44, %v3630_v32  ;;  %v9684_v57 = vld [vmem:[#allocation18_spill] sm:$0xff] }
 0x41d   : > { %v5978_v60 = vpop.f32.mrf.mxu0  ;;  %v3377_v21 = vadd.f32 %v9685_v36, %v9684_v57  ;;  %v3839_v37 = vadd.f32 %v8828_v50, %v3635_v45  ;;  %v3636_v30 = vadd.f32 %v8837_v14, %v3385_v33  ;;  %v3837_v12 = vadd.f32 %v8835_v5, %v3633_v9  ;;  %v9686_v14 = vld [vmem:[#allocation27_spill] sm:$0xff]  ;;  %v9687_v5 = vld [vmem:[#allocation73_spill] sm:$0xff] }
 0x41e   : > { %v4107_v49 = vmax.f32 %v4075_v16, 0.0  ;;  %v4073_v1 = vadd.f32 %v8855_v39, %v4034_v22  ;;  %v4039_v10 = vadd.f32 %v5978_v60, %v3835_v46  ;;  %v9045_v46 = vpop.f32.mrf.mxu1  ;;  %v4899_v33 = vadd.f32 %v9065_v51, %v8871_v25 }
 0x41f   : > { %v3982_v62 = vpop.f32.mrf.mxu0  ;;  %v3634_v16 = vadd.f32 %v8844_v7, %v3377_v21  ;;  %v3840_v4 = vadd.f32 %v9686_v14, %v3636_v30  ;;  %v4918_v36 = vadd.f32 %v9065_v51, %v8947_v56  ;;  %v4939_v21 = vadd.f32 %v8961_v3, %v9065_v51 }
 0x420   : > { %v4078_v19 = vadd.f32 %v8855_v39, %v4039_v10  ;;  %v4037_v59 = vadd.f32 %v3982_v62, %v3833_v8  ;;  %4188 = vrot.lane.b32.xlu1 %v4104_v63, %s6193_s21  ;;  %4194 = vrot.lane.b32.xlu0 %v4107_v49, %s6193_s21  ;;  %v4105_v24 = vmax.f32 %v4073_v1, 0.0  ;;  %v9054_v8 = vpop.f32.mrf.mxu1  ;;  %v4942_v30 = vadd.f32 %v8989_v52, %v9065_v51 }
 0x421   : > { %v5979_v0 = vpop.f32.mrf.mxu0  ;;  %v3838_v7 = vadd.f32 %v9687_v5, %v3634_v16 }
 0x422   : > { %v4110_v61 = vmax.f32 %v4078_v19, 0.0  ;;  %v4076_v55 = vadd.f32 %v8855_v39, %v4037_v59  ;;  %v4040_v17 = vadd.f32 %v5979_v0, %v3836_v6  ;;  %v9067_v27 = vpop.f32.mrf.mxu1  ;;  %v4907_v6 = vadd.f32 %v8863_v35, %v9065_v51 }
 0x423   : > { %v3985_v40 = vpop.f32.mrf.mxu0  ;;  %v4902_v0 = vadd.f32 %v9065_v51, %v8891_v53  ;;  %v5036_v3 = vmax.f32 %v4942_v30, 0.0 }
 0x424   : > { %v4079_v34 = vadd.f32 %v8855_v39, %v4040_v17  ;;  %v4038_v11 = vadd.f32 %v3985_v40, %v3834_v58  ;;  %4190 = vrot.lane.b32.xlu0 %v4105_v24, %s6193_s21  ;;  %4200 = vrot.lane.b32.xlu1 %v4110_v61, %s6193_s21  ;;  %v4108_v42 = vmax.f32 %v4076_v55, 0.0  ;;  %v4962_v31 = vpop.f32.mrf.mxu1  ;;  %v5027_v15 = vmax.f32 %v4907_v6, 0.0 }
 0x425   : > { %v5982_v22 = vpop.f32.mrf.mxu0  ;;  %v4910_v58 = vadd.f32 %v8877_v41, %v9065_v51  ;;  %v4923_v24 = vadd.f32 %v8905_v43, %v9065_v51  ;;  %v5026_v25 = vmax.f32 %v4902_v0, 0.0  ;;  %v4915_v55 = vadd.f32 %v9065_v51, %v8919_v13 }
 0x426   : > { %v4111_v48 = vmax.f32 %v4079_v34, 0.0  ;;  %v4077_v50 = vadd.f32 %v8855_v39, %v4038_v11  ;;  %v4043_v20 = vadd.f32 %v5982_v22, %v3839_v37  ;;  %v6005_v9 = vpop.f32.mrf.mxu1  ;;  %v4926_v17 = vadd.f32 %v8933_v23, %v9065_v51 }
 0x427   : > { %v3998_v28 = vpop.f32.mrf.mxu0  ;;  %v5028_v35 = vmax.f32 %v4910_v58, 0.0  ;;  %v5031_v41 = vmax.f32 %v4923_v24, 0.0  ;;  %v5029_v53 = vmax.f32 %v4915_v55, 0.0  ;;  %v5030_v13 = vmax.f32 %v4918_v36, 0.0 }
 0x428   : > { %v4082_v32 = vadd.f32 %v8855_v39, %v4043_v20  ;;  %v4041_v60 = vadd.f32 %v3998_v28, %v3837_v12  ;;  %4196 = vrot.lane.b32.xlu1 %v4108_v42, %s6193_s21  ;;  %4202 = vrot.lane.b32.xlu0 %v4111_v48, %s6193_s21  ;;  %v4109_v49 = vmax.f32 %v4077_v50, 0.0  ;;  %v4965_v61 = vpop.f32.mrf.mxu1  ;;  %v5032_v43 = vmax.f32 %v4926_v17, 0.0 }
 0x429   : > { %v5983_v63 = vpop.f32.mrf.mxu0  ;;  %v5035_v23 = vmax.f32 %v4939_v21, 0.0  ;;  %v4931_v40 = vadd.f32 %v9065_v51, %v8975_v54  ;;  %v4934_v11 = vadd.f32 %v9065_v51, %v9003_v47  ;;  %v4955_v12 = vadd.f32 %v9017_v29, %v9065_v51 }
 0x42a   : > { %v4114_v1 = vmax.f32 %v4082_v32, 0.0  ;;  %v4080_v10 = vadd.f32 %v8855_v39, %v4041_v60  ;;  %v4044_v26 = vadd.f32 %v5983_v63, %v3840_v4  ;;  %v6008_v57 = vpop.f32.mrf.mxu1  ;;  %v4947_v22 = vadd.f32 %v9065_v51, %v9031_v2 }
 0x42b   : > { %v4001_v38 = vpop.f32.mrf.mxu0  ;;  %v5033_v56 = vmax.f32 %v4931_v40, 0.0  ;;  %v5034_v54 = vmax.f32 %v4934_v11, 0.0  ;;  %v5039_v52 = vmax.f32 %v4955_v12, 0.0  ;;  %v4958_v42 = vadd.f32 %v9045_v46, %v9065_v51 }
 0x42c   : > { %v4083_v45 = vadd.f32 %v8855_v39, %v4044_v26  ;;  %v4042_v62 = vadd.f32 %v4001_v38, %v3838_v7  ;;  %4198 = vrot.lane.b32.xlu0 %v4109_v49, %s6193_s21  ;;  %4208 = vrot.lane.b32.xlu1 %v4114_v1, %s6193_s21  ;;  %v4112_v18 = vmax.f32 %v4080_v10, 0.0  ;;  %v4978_v37 = vpop.f32.mrf.mxu1  ;;  %v5037_v47 = vmax.f32 %v4947_v22, 0.0 }
 0x42d   : > { %v5040_v29 = vmax.f32 %v4958_v42, 0.0  ;;  %v4950_v50 = vadd.f32 %v9065_v51, %v9054_v8  ;;  %v4971_v20 = vadd.f32 %v9067_v27, %v9065_v51  ;;  %v4963_v14 = vadd.f32 %v9065_v51, %v4962_v31 }
 0x42e   : > { %v4115_v19 = vmax.f32 %v4083_v45, 0.0  ;;  %v4081_v59 = vadd.f32 %v8855_v39, %v4042_v62  ;;  %v5025_v39 = vmax.f32 %v4899_v33, 0.0  ;;  %v6009_v34 = vpop.f32.mrf.mxu1  ;;  %v4974_v4 = vadd.f32 %v6005_v9, %v9065_v51 }
 0x42f   : > { %v5038_v2 = vmax.f32 %v4950_v50, 0.0  ;;  %v5043_v46 = vmax.f32 %v4971_v20, 0.0  ;;  %v5041_v8 = vmax.f32 %v4963_v14, 0.0  ;;  %v4966_v5 = vadd.f32 %v9065_v51, %v4965_v61 }
 0x430   : > { %4204 = vrot.lane.b32.xlu1 %v4112_v18, %s6193_s21  ;;  %4210 = vrot.lane.b32.xlu0 %v4115_v19, %s6193_s21  ;;  %v4113_v44 = vmax.f32 %v4081_v59, 0.0  ;;  %v4981_v16 = vpop.f32.mrf.mxu1  ;;  %v5044_v60 = vmax.f32 %v4974_v4, 0.0  ;;  %v4987_v7 = vadd.f32 %v6008_v57, %v9065_v51  ;;  %v4979_v10 = vadd.f32 %v9065_v51, %v4978_v37 }
 0x431   : > { %v5042_v49 = vmax.f32 %v4966_v5, 0.0  ;;  %v4990_v26 = vadd.f32 %v6009_v34, %v9065_v51  ;;  %v4982_v62 = vadd.f32 %v9065_v51, %v4981_v16 }
 0x432   : > { %v6012_v48 = vpop.f32.mrf.mxu1  ;;  %v5047_v1 = vmax.f32 %v4987_v7, 0.0  ;;  %v5045_v27 = vmax.f32 %v4979_v10, 0.0 }
 0x433   : > { %v5048_v45 = vmax.f32 %v4990_v26, 0.0  ;;  %v5003_v18 = vadd.f32 %v6012_v48, %v9065_v51  ;;  %v5046_v19 = vmax.f32 %v4982_v62, 0.0 }
 0x434   : > { %5093 = vrot.lane.b32.xlu1 %v5027_v15, %s6194_s28  ;;  %4206 = vrot.lane.b32.xlu0 %v4113_v44, %s6193_s21  ;;  %v4994_v28 = vpop.f32.mrf.mxu1  ;;  %s6123_s21 = scalar_lea.vmem %s9290_s27, 4096 }
 0x435   : > { %v5051_v59 = vmax.f32 %v5003_v18, 0.0  ;;  %v4995_v31 = vadd.f32 %v9065_v51, %v4994_v28  ;;  %p6124_p11 = scmp.ne.s32.totalorder %s9290_s27, %s6123_s21 }
 0x436   : > { %v6013_v32 = vpop.f32.mrf.mxu1 }
 0x437   : > { %v5006_v15 = vadd.f32 %v6013_v32, %v9065_v51  ;;  %v5049_v44 = vmax.f32 %v4995_v31, 0.0  ;;  %p6125_p12 = pnand %p6124_p11, %p6285_p5 }
 0x438   : > { %5089 = vrot.lane.b32.xlu1 %v5025_v39, %s6194_s28  ;;  %5095 = vrot.lane.b32.xlu0 %v5028_v35, %s6194_s28  ;;  %v4997_v63 = vpop.f32.mrf.mxu1 }
 0x439   : > { %v5052_v58 = vmax.f32 %v5006_v15, 0.0  ;;  %v4998_v9 = vadd.f32 %v9065_v51, %v4997_v63  ;;  %p6126_p13 = pneg %p6125_p12 }
 0x43a   : > { %v6016_v38 = vpop.f32.mrf.mxu1 }
 0x43b   : > { %v5050_v24 = vmax.f32 %v4998_v9, 0.0  ;;  %v5019_v61 = vadd.f32 %v6016_v38, %v9065_v51 }
 0x43c   : > { %5101 = vrot.lane.b32.xlu1 %v5031_v41, %s6194_s28  ;;  %5091 = vrot.lane.b32.xlu0 %v5026_v25, %s6194_s28  ;;  %v5010_v6 = vpop.f32.mrf.mxu1 }
 0x43d   : > { %v5011_v39 = vadd.f32 %v9065_v51, %v5010_v6  ;;  %v5055_v57 = vmax.f32 %v5019_v61, 0.0 }
 0x43e   : > { %v6017_v33 = vpop.f32.mrf.mxu1 }
 0x43f   : > { %v5053_v25 = vmax.f32 %v5011_v39, 0.0 }
 0x440   : > { %5097 = vrot.lane.b32.xlu1 %v5029_v53, %s6194_s28  ;;  %5103 = vrot.lane.b32.xlu0 %v5032_v43, %s6194_s28  ;;  %v5013_v0 = vpop.f32.mrf.mxu1  ;;  %v5022_v53 = vadd.f32 %v6017_v33, %v9065_v51 }
 0x441   : > { %v5014_v41 = vadd.f32 %v9065_v51, %v5013_v0 }
 0x442   : > { %v5056_v37 = vmax.f32 %v5022_v53, 0.0 }
 0x443   : > { %v5054_v43 = vmax.f32 %v5014_v41, 0.0 }
 0x444   : > { %5109 = vrot.lane.b32.xlu1 %v5035_v23, %s6194_s28  ;;  %5099 = vrot.lane.b32.xlu0 %v5030_v13, %s6194_s28 }
 0x448   : > { %5105 = vrot.lane.b32.xlu1 %v5033_v56, %s6194_s28  ;;  %5111 = vrot.lane.b32.xlu0 %v5036_v3, %s6194_s28 }
 0x44c   : > { %5117 = vrot.lane.b32.xlu1 %v5039_v52, %s6194_s28  ;;  %5107 = vrot.lane.b32.xlu0 %v5034_v54, %s6194_s28 }
 0x450   : > { %5113 = vrot.lane.b32.xlu1 %v5037_v47, %s6194_s28  ;;  %5119 = vrot.lane.b32.xlu0 %v5040_v29, %s6194_s28 }
 0x454   : > { %5125 = vrot.lane.b32.xlu1 %v5043_v46, %s6194_s28  ;;  %5115 = vrot.lane.b32.xlu0 %v5038_v2, %s6194_s28 }
 0x458   : > { %5121 = vrot.lane.b32.xlu1 %v5041_v8, %s6194_s28  ;;  %5127 = vrot.lane.b32.xlu0 %v5044_v60, %s6194_s28 }
 0x45c   : > { %5133 = vrot.lane.b32.xlu1 %v5047_v1, %s6194_s28  ;;  %5123 = vrot.lane.b32.xlu0 %v5042_v49, %s6194_s28 }
 0x460   : > { %5129 = vrot.lane.b32.xlu1 %v5045_v27, %s6194_s28  ;;  %5135 = vrot.lane.b32.xlu0 %v5048_v45, %s6194_s28 }
 0x464   : > { %5141 = vrot.lane.b32.xlu1 %v5051_v59, %s6194_s28  ;;  %5131 = vrot.lane.b32.xlu0 %v5046_v19, %s6194_s28 }
 0x466   : > { %v4153_v35 = vpop.permute.xlu1 %4152 }
 0x467   : > { %4247 = vst.msk [vmem:[%s6366_s22 + $0x10] sm:$0xff] %vm4244_vm0, %v4153_v35 }
 0x468   : > { %5137 = vrot.lane.b32.xlu1 %v5049_v44, %s6194_s28  ;;  %5143 = vrot.lane.b32.xlu0 %v5052_v58, %s6194_s28 }
 0x46a   : > { %v4149_v55 = vpop.permute.xlu1 %4148  ;;  %v4155_v17 = vpop.permute.xlu0 %4154 }
 0x46b   : > { %4245 = vst.msk [vmem:[%s6366_s22] sm:$0xff] %vm4244_vm0, %v4149_v55  ;;  %4248 = vst.msk [vmem:[%s6366_s22 + $0x18] sm:$0xff] %vm4244_vm0, %v4155_v17 }
 0x46c   : > { %5145 = vrot.lane.b32.xlu1 %v5053_v25, %s6194_s28  ;;  %5139 = vrot.lane.b32.xlu0 %v5050_v24, %s6194_s28 }
 0x46e   : > { %v4161_v36 = vpop.permute.xlu1 %4160  ;;  %v4151_v21 = vpop.permute.xlu0 %4150 }
 0x46f   : > { %4251 = vst.msk [vmem:[%s6366_s22 + $0x30] sm:$0xff] %vm4244_vm0, %v4161_v36  ;;  %4246 = vst.msk [vmem:[%s6366_s22 + $0x8] sm:$0xff] %vm4244_vm0, %v4151_v21 }
 0x470   : > { %5149 = vrot.lane.b32.xlu1 %v5055_v57, %s6194_s28  ;;  %5147 = vrot.lane.b32.xlu0 %v5054_v43, %s6194_s28 }
 0x472   : > { %v4157_v13 = vpop.permute.xlu1 %4156  ;;  %v4163_v51 = vpop.permute.xlu0 %4162 }
 0x473   : > { %4249 = vst.msk [vmem:[%s6366_s22 + $0x20] sm:$0xff] %vm4244_vm0, %v4157_v13  ;;  %4252 = vst.msk [vmem:[%s6366_s22 + $0x38] sm:$0xff] %vm4244_vm0, %v4163_v51 }
 0x474   : > { %5151 = vrot.lane.b32.xlu0 %v5056_v37, %s6194_s28  ;;  %s6129_s28 = scalar_lea.vmem %s6128_s16, 8192 }
 0x475   : > { %p6131_p1 = scmp.lt.s32.totalorder %s6129_s28, %s6123_s21 }
 0x476   : > { %v4169_v23 = vpop.permute.xlu1 %4168  ;;  %v4159_v40 = vpop.permute.xlu0 %4158 }
 0x477   : > { %4255 = vst.msk [vmem:[%s6366_s22 + $0x50] sm:$0xff] %vm4244_vm0, %v4169_v23  ;;  %4250 = vst.msk [vmem:[%s6366_s22 + $0x28] sm:$0xff] %vm4244_vm0, %v4159_v40  ;;  %p6132_p2 = por %p6131_p1, %p6130_p0 }
 0x479   : > { %p6133_p3 = pnand %p6132_p2, %p6126_p13 }
 0x47a   : > { %v4165_v30 = vpop.permute.xlu1 %4164  ;;  %v4171_v34 = vpop.permute.xlu0 %4170 }
 0x47b   : > { %4253 = vst.msk [vmem:[%s6366_s22 + $0x40] sm:$0xff] %vm4244_vm0, %v4165_v30  ;;  %4256 = vst.msk [vmem:[%s6366_s22 + $0x58] sm:$0xff] %vm4244_vm0, %v4171_v34 }
 0x47e   : > { %v4177_v56 = vpop.permute.xlu1 %4176  ;;  %v4167_v3 = vpop.permute.xlu0 %4166 }
 0x47f   : > { %4259 = vst.msk [vmem:[%s6366_s22 + $0x70] sm:$0xff] %vm4244_vm0, %v4177_v56  ;;  %4254 = vst.msk [vmem:[%s6366_s22 + $0x48] sm:$0xff] %vm4244_vm0, %v4167_v3 }
 0x482   : > { %v4173_v11 = vpop.permute.xlu1 %4172  ;;  %v4179_v12 = vpop.permute.xlu0 %4178 }
 0x483   : > { %4257 = vst.msk [vmem:[%s6366_s22 + $0x60] sm:$0xff] %vm4244_vm0, %v4173_v11  ;;  %4260 = vst.msk [vmem:[%s6366_s22 + $0x78] sm:$0xff] %vm4244_vm0, %v4179_v12 }
 0x486   : > { %v4185_v16 = vpop.permute.xlu1 %4184  ;;  %v4175_v54 = vpop.permute.xlu0 %4174 }
 0x487   : > { %4263 = vst.msk [vmem:[%s6366_s22 + $0x90] sm:$0xff] %vm4244_vm0, %v4185_v16  ;;  %4258 = vst.msk [vmem:[%s6366_s22 + $0x68] sm:$0xff] %vm4244_vm0, %v4175_v54 }
 0x48a   : > { %v4181_v52 = vpop.permute.xlu1 %4180  ;;  %v4187_v22 = vpop.permute.xlu0 %4186 }
 0x48b   : > { %4261 = vst.msk [vmem:[%s6366_s22 + $0x80] sm:$0xff] %vm4244_vm0, %v4181_v52  ;;  %4264 = vst.msk [vmem:[%s6366_s22 + $0x98] sm:$0xff] %vm4244_vm0, %v4187_v22 }
 0x48e   : > { %v4193_v42 = vpop.permute.xlu1 %4192  ;;  %v4183_v48 = vpop.permute.xlu0 %4182 }
 0x48f   : > { %4267 = vst.msk [vmem:[%s6366_s22 + $0xb0] sm:$0xff] %vm4244_vm0, %v4193_v42  ;;  %4262 = vst.msk [vmem:[%s6366_s22 + $0x88] sm:$0xff] %vm4244_vm0, %v4183_v48 }
 0x492   : > { %v4189_v47 = vpop.permute.xlu1 %4188  ;;  %v4195_v29 = vpop.permute.xlu0 %4194 }
 0x493   : > { %4265 = vst.msk [vmem:[%s6366_s22 + $0xa0] sm:$0xff] %vm4244_vm0, %v4189_v47  ;;  %4268 = vst.msk [vmem:[%s6366_s22 + $0xb8] sm:$0xff] %vm4244_vm0, %v4195_v29 }
 0x496   : > { %v4201_v50 = vpop.permute.xlu1 %4200  ;;  %v4191_v20 = vpop.permute.xlu0 %4190 }
 0x497   : > { %4271 = vst.msk [vmem:[%s6366_s22 + $0xd0] sm:$0xff] %vm4244_vm0, %v4201_v50  ;;  %4266 = vst.msk [vmem:[%s6366_s22 + $0xa8] sm:$0xff] %vm4244_vm0, %v4191_v20 }
 0x49a   : > { %v4197_v28 = vpop.permute.xlu1 %4196  ;;  %v4203_v2 = vpop.permute.xlu0 %4202 }
 0x49b   : > { %4269 = vst.msk [vmem:[%s6366_s22 + $0xc0] sm:$0xff] %vm4244_vm0, %v4197_v28  ;;  %4272 = vst.msk [vmem:[%s6366_s22 + $0xd8] sm:$0xff] %vm4244_vm0, %v4203_v2 }
 0x49e   : > { %v4209_v46 = vpop.permute.xlu1 %4208  ;;  %v4199_v14 = vpop.permute.xlu0 %4198 }
 0x49f   : > { %4275 = vst.msk [vmem:[%s6366_s22 + $0xf0] sm:$0xff] %vm4244_vm0, %v4209_v46  ;;  %4270 = vst.msk [vmem:[%s6366_s22 + $0xc8] sm:$0xff] %vm4244_vm0, %v4199_v14 }
 0x4a2   : > { %v4205_v4 = vpop.permute.xlu1 %4204  ;;  %v4211_v32 = vpop.permute.xlu0 %4210 }
 0x4a3   : > { %4273 = vst.msk [vmem:[%s6366_s22 + $0xe0] sm:$0xff] %vm4244_vm0, %v4205_v4  ;;  %4276 = vst.msk [vmem:[%s6366_s22 + $0xf8] sm:$0xff] %vm4244_vm0, %v4211_v32 }
 0x4a6   : > { %v5094_v8 = vpop.permute.xlu1 %5093  ;;  %v4207_v60 = vpop.permute.xlu0 %4206 }
 0x4a7   : > { %5188 = vst.msk [vmem:[%s6366_s22 + $0x10] sm:$0xff] %vm5185_vm1, %v5094_v8 }
 0x4a8   : > { %4274 = vst.msk [vmem:[%s6366_s22 + $0xe8] sm:$0xff] %vm4244_vm0, %v4207_v60 }
 0x4aa   : > { %v5090_v5 = vpop.permute.xlu1 %5089  ;;  %v5096_v7 = vpop.permute.xlu0 %5095 }
 0x4ab   : > { %5186 = vst.msk [vmem:[%s6366_s22] sm:$0xff] %vm5185_vm1, %v5090_v5  ;;  %5189 = vst.msk [vmem:[%s6366_s22 + $0x18] sm:$0xff] %vm5185_vm1, %v5096_v7 }
 0x4ae   : > { %v5102_v63 = vpop.permute.xlu1 %5101  ;;  %v5092_v49 = vpop.permute.xlu0 %5091 }
 0x4af   : > { %5192 = vst.msk [vmem:[%s6366_s22 + $0x30] sm:$0xff] %vm5185_vm1, %v5102_v63  ;;  %5187 = vst.msk [vmem:[%s6366_s22 + $0x8] sm:$0xff] %vm5185_vm1, %v5092_v49 }
 0x4b2   : > { %v5098_v1 = vpop.permute.xlu1 %5097  ;;  %v5104_v10 = vpop.permute.xlu0 %5103 }
 0x4b3   : > { %5190 = vst.msk [vmem:[%s6366_s22 + $0x20] sm:$0xff] %vm5185_vm1, %v5098_v1  ;;  %5193 = vst.msk [vmem:[%s6366_s22 + $0x38] sm:$0xff] %vm5185_vm1, %v5104_v10 }
 0x4b6   : > { %v5110_v26 = vpop.permute.xlu1 %5109  ;;  %v5100_v38 = vpop.permute.xlu0 %5099 }
 0x4b7   : > { %5196 = vst.msk [vmem:[%s6366_s22 + $0x50] sm:$0xff] %vm5185_vm1, %v5110_v26  ;;  %5191 = vst.msk [vmem:[%s6366_s22 + $0x28] sm:$0xff] %vm5185_vm1, %v5100_v38 }
 0x4ba   : > { %v5106_v27 = vpop.permute.xlu1 %5105  ;;  %v5112_v45 = vpop.permute.xlu0 %5111 }
 0x4bb   : > { %5194 = vst.msk [vmem:[%s6366_s22 + $0x40] sm:$0xff] %vm5185_vm1, %v5106_v27  ;;  %5197 = vst.msk [vmem:[%s6366_s22 + $0x58] sm:$0xff] %vm5185_vm1, %v5112_v45 }
 0x4be   : > { %v5118_v62 = vpop.permute.xlu1 %5117  ;;  %v5108_v18 = vpop.permute.xlu0 %5107 }
 0x4bf   : > { %5200 = vst.msk [vmem:[%s6366_s22 + $0x70] sm:$0xff] %vm5185_vm1, %v5118_v62  ;;  %5195 = vst.msk [vmem:[%s6366_s22 + $0x48] sm:$0xff] %vm5185_vm1, %v5108_v18 }
 0x4c2   : > { %v5114_v6 = vpop.permute.xlu1 %5113  ;;  %v5120_v19 = vpop.permute.xlu0 %5119 }
 0x4c3   : > { %5198 = vst.msk [vmem:[%s6366_s22 + $0x60] sm:$0xff] %vm5185_vm1, %v5114_v6  ;;  %5201 = vst.msk [vmem:[%s6366_s22 + $0x78] sm:$0xff] %vm5185_vm1, %v5120_v19 }
 0x4c6   : > { %v5126_v59 = vpop.permute.xlu1 %5125  ;;  %v5116_v31 = vpop.permute.xlu0 %5115 }
 0x4c7   : > { %5204 = vst.msk [vmem:[%s6366_s22 + $0x90] sm:$0xff] %vm5185_vm1, %v5126_v59  ;;  %5199 = vst.msk [vmem:[%s6366_s22 + $0x68] sm:$0xff] %vm5185_vm1, %v5116_v31 }
 0x4ca   : > { %v5122_v15 = vpop.permute.xlu1 %5121  ;;  %v5128_v33 = vpop.permute.xlu0 %5127 }
 0x4cb   : > { %5202 = vst.msk [vmem:[%s6366_s22 + $0x80] sm:$0xff] %vm5185_vm1, %v5122_v15  ;;  %5205 = vst.msk [vmem:[%s6366_s22 + $0x98] sm:$0xff] %vm5185_vm1, %v5128_v33 }
 0x4ce   : > { %v5134_v44 = vpop.permute.xlu1 %5133  ;;  %v5124_v58 = vpop.permute.xlu0 %5123 }
 0x4cf   : > { %5208 = vst.msk [vmem:[%s6366_s22 + $0xb0] sm:$0xff] %vm5185_vm1, %v5134_v44  ;;  %5203 = vst.msk [vmem:[%s6366_s22 + $0x88] sm:$0xff] %vm5185_vm1, %v5124_v58 }
 0x4d2   : > { %v5130_v9 = vpop.permute.xlu1 %5129  ;;  %v5136_v39 = vpop.permute.xlu0 %5135 }
 0x4d3   : > { %5206 = vst.msk [vmem:[%s6366_s22 + $0xa0] sm:$0xff] %vm5185_vm1, %v5130_v9  ;;  %5209 = vst.msk [vmem:[%s6366_s22 + $0xb8] sm:$0xff] %vm5185_vm1, %v5136_v39 }
 0x4d6   : > { %v5142_v35 = vpop.permute.xlu1 %5141  ;;  %v5132_v0 = vpop.permute.xlu0 %5131 }
 0x4d7   : > { %5212 = vst.msk [vmem:[%s6366_s22 + $0xd0] sm:$0xff] %vm5185_vm1, %v5142_v35  ;;  %5207 = vst.msk [vmem:[%s6366_s22 + $0xa8] sm:$0xff] %vm5185_vm1, %v5132_v0 }
 0x4da   : > { %v5138_v24 = vpop.permute.xlu1 %5137  ;;  %v5144_v61 = vpop.permute.xlu0 %5143 }
 0x4db   : > { %5210 = vst.msk [vmem:[%s6366_s22 + $0xc0] sm:$0xff] %vm5185_vm1, %v5138_v24  ;;  %5213 = vst.msk [vmem:[%s6366_s22 + $0xd8] sm:$0xff] %vm5185_vm1, %v5144_v61 }
 0x4de   : > { %v5146_v25 = vpop.permute.xlu1 %5145  ;;  %v5140_v41 = vpop.permute.xlu0 %5139 }
 0x4df   : > { %5214 = vst.msk [vmem:[%s6366_s22 + $0xe0] sm:$0xff] %vm5185_vm1, %v5146_v25  ;;  %5211 = vst.msk [vmem:[%s6366_s22 + $0xc8] sm:$0xff] %vm5185_vm1, %v5140_v41 }
 0x4e2   : > { %v5150_v55 = vpop.permute.xlu1 %5149  ;;  %v5148_v17 = vpop.permute.xlu0 %5147 }
 0x4e3   : > { %5216 = vst.msk [vmem:[%s6366_s22 + $0xf0] sm:$0xff] %vm5185_vm1, %v5150_v55  ;;  %5215 = vst.msk [vmem:[%s6366_s22 + $0xe8] sm:$0xff] %vm5185_vm1, %v5148_v17 }
 0x4e6   : > { %v5152_v57 = vpop.permute.xlu0 %5151 }
 0x4e7   : > { %5217 = vst.msk [vmem:[%s6366_s22 + $0xf8] sm:$0xff] %vm5185_vm1, %v5152_v57 }
 0x4e8   : > { %6136 = shalt.err (!%p6133_p3)
}
 0x4e9   : > { %s6137_s14 = scalar_lea.hbm %s9288_s23, 4096  ;;  %s6141_s26 = scalar_lea.hbm %s9346_s9, 8192 }
 0x4ea   : > { %p6138_p4 = scmp.ne.s32.totalorder %s9288_s23, %s6137_s14  ;;  %p6142_p9 = scmp.lt.s32.totalorder %s9288_s23, %s9346_s9 }
 0x4eb   : > { %p6143_p10 = scmp.lt.s32.totalorder %s6141_s26, %s6137_s14 }
 0x4ec   : > { %p6139_p7 = pnand %p6138_p4, %p6285_p5 }
 0x4ed   : > { %p6144_p11 = por %p6143_p10, %p6142_p9 }
 0x4ee   : > { %p6140_p8 = pneg %p6139_p7 }
 0x4f0   : > { %p6145_p12 = pnand %p6144_p11, %p6140_p8 }
 0x4f2   : > { %6148 = shalt.err (!%p6145_p12)
}
 0x4f3   : > { %s6196_s21 = smov 128  }
 0x4f4   : > { %6028 = dma.vmem_to_hbm [thread:$0]  (%p6285_p5), %s9290_s27, 4096, %s9288_s23, %s9296_s13, %s6196_s21, %s6196_s21, %s6187_s29  }
 0x4f5 PF: > { %p6034_p13 = scmp.ge.s32.totalorder %s6183_s12, 2  ;;  %s5247_s16 = sand.u32 1, %s6171_s30  }
 0x4f6   : > { %s5248_s28 = scalar_lea.sflag [#allocation3], %s5247_s16 }
 0x4f7   : > { %p6031_p0 = pnand %p6034_p13, %p6289_p6 }
 0x4f9   : > { %p6032_p1 = pneg %p6031_p0 }
 0x4fb   : > { %6166 = dma.done.wait (%p6032_p1), %s5248_s28, 4096  }
 0x4fc   : > { %6168 = vsyncadd (%p6032_p1), %s5248_s28, 4294963200  ;;  %p19_p2 = scmp.ge.s32.totalorder %s6272_s15, 4   ;;  %s9688_s30 = smov %s6175_s10 }
 0x4fd   : > { %s9689_s10 = smov %s6179_s11  ;;  %s9690_s11 = smov %s6283_s18 }
 0x4fe   : > { %s9691_s12 = smov %s6272_s15  ;;  %21 = sbr.rel (!%p19_p2) target bundleno = 3 (0x3), region = 97 }
 0x503   :  { %5253 = vsyncpa [#allocation3], 1 }
 0x504   :  { %5255 = vsyncpa [#allocation3 + $0x1], 1 }

</bundles_post_ra>
